<compile_context>
chip_gen: v6e
topology: v6e:2x2x1
jax: 0.10.0
libtpu: 0.0.40
codegen_flags: <defaults>
</compile_context>

<pallas_src>
import functools
import math

import jax
import jax.numpy as jnp
from jax.experimental import pallas as pl
from jax.experimental.pallas import tpu as pltpu


# ----------------------------------------------------------------------------
# Fused DecoderBlock kernel
# ----------------------------------------------------------------------------

def _decoder_block_kernel(*refs, n_heads, head_dim, has_mask, mxu_dtype, eps):
    it = iter(refs)
    k_ref = next(it)                      # (Sk, E)  cross-attn key source
    q_ref = next(it)                      # (Sq, E)  cross-attn query source
    x_ref = next(it)                      # (Sx, E)  self-attn input / residual
    m_ref = next(it) if has_mask else None
    (sa_wk, sa_wq, sa_wv, sa_wo, sa_bo, n0_g, n0_b,
     ca_wk, ca_wq, ca_wv, ca_wo, ca_bo, n1_g, n1_b,
     w1, b1, w2, b2, n2_g, n2_b, o_ref) = tuple(it)

    f32 = jnp.float32

    def _mha(key, query, value, wk_t, wq_t, wv_t, wo_t, bo, mzero):
        # key/query/value: f32 2-D; wk_t/wq_t/wv_t: (E,E) block-diag (pre-transposed,
        # wq_t pre-scaled by 1/sqrt(Dh)); wo_t = Wo.T (E,E) in bf16; bo: (1,E) f32.
        k = jnp.dot(key.astype(mxu_dtype), wk_t, preferred_element_type=f32)
        q = jnp.dot(query.astype(mxu_dtype), wq_t, preferred_element_type=f32)
        v = jnp.dot(value.astype(mxu_dtype), wv_t, preferred_element_type=f32)
        # Cast once, outside the head loop (the score / ctx matmuls consume bf16).
        k_b = k.astype(mxu_dtype)
        q_b = q.astype(mxu_dtype)
        v_b = v.astype(mxu_dtype)
        out = jnp.zeros((q.shape[0], wo_t.shape[1]), f32)
        for h in range(n_heads):                       # static unroll over heads
            sl = slice(h * head_dim, (h + 1) * head_dim)
            s = jnp.einsum('qd,kd->qk', q_b[:, sl], k_b[:, sl],
                           preferred_element_type=f32)          # (Sq, Sk)
            if mzero is not None:
                s = jnp.where(mzero, f32(-1e20), s)
            smax = jnp.max(s, axis=-1, keepdims=True)
            p = jnp.exp(s - smax)
            p = p * pl.reciprocal(jnp.sum(p, axis=-1, keepdims=True), approx=True)
            ctx = jnp.dot(p.astype(mxu_dtype), v_b[:, sl],
                          preferred_element_type=f32)            # (Sq, Dh)
            out = out + jnp.dot(ctx.astype(mxu_dtype), wo_t[sl, :],
                                preferred_element_type=f32)      # accumulate Wo slice
        return out + bo                                          # (Sq, E)

    def _add_ln(a, b, g, beta):
        s = a + b
        mean = jnp.mean(s, axis=-1, keepdims=True)
        c = s - mean
        var = jnp.mean(c * c, axis=-1, keepdims=True)            # biased, like torch
        return c * jax.lax.rsqrt(var + eps) * g + beta

    def _ffn(xin, w1_t, b1_, w2_t, b2_):
        h = jnp.dot(xin.astype(mxu_dtype), w1_t, preferred_element_type=f32) + b1_
        h = jnp.maximum(h, 0.0)
        return jnp.dot(h.astype(mxu_dtype), w2_t, preferred_element_type=f32) + b2_

    key_a = k_ref[...].astype(f32)
    query_a = q_ref[...].astype(f32)
    x_a = x_ref[...].astype(f32)
    mzero = (m_ref[...] == 0) if has_mask else None              # hoisted, once

    # DecoderBlock.forward(key, query, x, mask)
    attn = _mha(x_a, x_a, x_a, sa_wk[...], sa_wq[...], sa_wv[...],
                sa_wo[...], sa_bo[...], mzero)                   # self.attention(x,x,x,mask)
    value = _add_ln(attn, x_a, n0_g[...], n0_b[...])             # dropout(norm(attn + x)) ; dropout = id
    # TransformerBlock.forward(key, query, value)
    attn2 = _mha(key_a, query_a, value, ca_wk[...], ca_wq[...], ca_wv[...],
                 ca_wo[...], ca_bo[...], None)
    h1 = _add_ln(attn2, value, n1_g[...], n1_b[...])
    ff = _ffn(h1, w1[...], b1[...], w2[...], b2[...])
    out = _add_ln(ff, h1, n2_g[...], n2_b[...])
    o_ref[...] = out.astype(o_ref.dtype)


# ----------------------------------------------------------------------------
# pallas_call wrapper: one fused call per DecoderBlock, grid over batch rows
# ----------------------------------------------------------------------------

def decoder_block(p, key, query, x, n_heads, mask=None, mxu_dtype=jnp.bfloat16):
    B, Sk, E = key.shape
    Sq = query.shape[1]
    Sx = x.shape[1]
    Dh = E // n_heads
    has_mask = mask is not None

    def prep_attn(ap):
        # Block-diagonal (E,E) weights (shared Dh x Dh block per head), pre-transposed
        # so the kernel does x @ W; 1/sqrt(Dh) folded into the Q projection.
        eye = jnp.eye(n_heads, dtype=jnp.float32)
        wk_t = jnp.kron(eye, ap['wk'].T).astype(mxu_dtype)
        wq_t = (jnp.kron(eye, ap['wq'].T) * (1.0 / math.sqrt(Dh))).astype(mxu_dtype)
        wv_t = jnp.kron(eye, ap['wv'].T).astype(mxu_dtype)
        wo_t = ap['wo'].T.astype(mxu_dtype)
        return wk_t, wq_t, wv_t, wo_t, ap['bo']

    sa = prep_attn(p['self_attn'])
    ca = prep_attn(p['tb_attn'])
    w1_t = p['ff_w1'].T.astype(mxu_dtype)      # (E, F)
    w2_t = p['ff_w2'].T.astype(mxu_dtype)      # (F, E)

    weights = [*sa, p['norm_g'], p['norm_b'],
               *ca, p['tb_n1_g'], p['tb_n1_b'],
               w1_t, p['ff_b1'], w2_t, p['ff_b2'],
               p['tb_n2_g'], p['tb_n2_b']]

    # Batch dim squeezed from all activation blocks -> kernel sees 2-D (S, E) tiles.
    act_specs = [
        pl.BlockSpec((None, Sk, E), lambda b: (b, 0, 0)),
        pl.BlockSpec((None, Sq, E), lambda b: (b, 0, 0)),
        pl.BlockSpec((None, Sx, E), lambda b: (b, 0, 0)),
    ]
    args = [key, query, x]
    if has_mask:
        act_specs.append(pl.BlockSpec((None,) + mask.shape[1:], lambda b: (b, 0, 0)))
        args.append(mask)
    # Constant index_map -> weights DMA'd once, reused across the batch grid.
    w_specs = [pl.BlockSpec(w.shape, lambda b: (0, 0)) for w in weights]

    kernel = functools.partial(_decoder_block_kernel, n_heads=n_heads, head_dim=Dh,
                               has_mask=has_mask, mxu_dtype=mxu_dtype, eps=1e-5)
    return pl.pallas_call(
        kernel,
        out_shape=jax.ShapeDtypeStruct((B, Sq, E), jnp.float32),
        grid=(B,),
        in_specs=act_specs + w_specs,
        out_specs=pl.BlockSpec((None, Sq, E), lambda b: (b, 0, 0)),
        compiler_params=pltpu.CompilerParams(
            dimension_semantics=("parallel",),          # >=2 parallel steps -> both v7x TCs
            vmem_limit_bytes=64 * 1024 * 1024),
    )(*args, *weights)


# ----------------------------------------------------------------------------
# Model forward (mirrors the PyTorch module structure)
# ----------------------------------------------------------------------------

def decoder_forward(params, token_ids, encoder_output, n_heads, mask=None):
    emb = params['embedding']
    E = emb.shape[1]
    x = jnp.take(emb, token_ids, axis=0)                          # nn.Embedding (glue gather)
    S = x.shape[1]
    x = x * jnp.sqrt(jnp.float32(E)) + params['pe'][:S][None]     # PositionalEncoding
    # self.dropout(...) : identity in eval mode
    for blk in params['blocks']:
        # Decoder calls: block(encoder_output, x, encoder_output, mask)
        x = decoder_block(blk, encoder_output, x, encoder_output, n_heads, mask)
    return x


# ----------------------------------------------------------------------------
# Deterministic parameter initialization (synthetic, no checkpoint)
# ----------------------------------------------------------------------------

def make_positional_encoding(seq_len, d):
    pos = jnp.arange(seq_len, dtype=jnp.float32)[:, None]
    even_i = jnp.arange(0, d, 2, dtype=jnp.float32)[None, :]
    pe = jnp.zeros((seq_len, d), jnp.float32)
    pe = pe.at[:, 0::2].set(jnp.sin(pos / jnp.power(10000.0, (2.0 * even_i) / d)))
    pe = pe.at[:, 1::2].set(jnp.cos(pos / jnp.power(10000.0, (2.0 * (even_i + 1.0)) / d)))
    return pe


def _init_linear(key, out_dim, in_dim, scale=0.02):
    return scale * jax.random.normal(key, (out_dim, in_dim), jnp.float32)


def init_attention_params(key, E, n_heads):
    Dh = E // n_heads
    k = jax.random.split(key, 4)
    return {
        'wk': _init_linear(k[0], Dh, Dh),      # Linear(Dh, Dh, bias=False)
        'wq': _init_linear(k[1], Dh, Dh),
        'wv': _init_linear(k[2], Dh, Dh),
        'wo': _init_linear(k[3], E, E),        # Linear(E, E) (with bias)
        'bo': jnp.zeros((1, E), jnp.float32),
    }


def init_decoder_block_params(key, E, n_heads, expansion):
    F = expansion * E
    k = jax.random.split(key, 4)
    return {
        'self_attn': init_attention_params(k[0], E, n_heads),
        'norm_g': jnp.ones((1, E), jnp.float32),
        'norm_b': jnp.zeros((1, E), jnp.float32),
        'tb_attn': init_attention_params(k[1], E, n_heads),
        'tb_n1_g': jnp.ones((1, E), jnp.float32),
        'tb_n1_b': jnp.zeros((1, E), jnp.float32),
        'tb_n2_g': jnp.ones((1, E), jnp.float32),
        'tb_n2_b': jnp.zeros((1, E), jnp.float32),
        'ff_w1': _init_linear(k[2], F, E),
        'ff_b1': jnp.zeros((1, F), jnp.float32),
        'ff_w2': _init_linear(k[3], E, F),
        'ff_b2': jnp.zeros((1, E), jnp.float32),
    }


def init_decoder_params(key, vocab, seq_len, E, n_heads, expansion, n_blocks):
    k_emb, k_blk = jax.random.split(key)
    blk = init_decoder_block_params(k_blk, E, n_heads, expansion)
    return {
        'embedding': 0.02 * jax.random.normal(k_emb, (vocab, E), jnp.float32),
        'pe': make_positional_encoding(seq_len, E),
        # `replikasi` deep-copies one initialized block -> identical params per block.
        'blocks': [blk] * n_blocks,
    }


# ----------------------------------------------------------------------------
# Demo
# ----------------------------------------------------------------------------

if __name__ == "__main__":
    VOCAB, SEQ, EMB, HEADS, EXPANSION, BLOCKS, BATCH = 50, 8, 32, 4, 4, 2, 2

    root = jax.random.PRNGKey(0)
    k_par, k_tok, k_enc = jax.random.split(root, 3)
    params = init_decoder_params(k_par, VOCAB, SEQ, EMB, HEADS, EXPANSION, BLOCKS)
    tokens = jax.random.randint(k_tok, (BATCH, SEQ), 0, VOCAB)
    encoder_output = jax.random.normal(k_enc, (BATCH, SEQ, EMB), jnp.float32)

    fwd = jax.jit(functools.partial(decoder_forward, n_heads=HEADS))
    out = fwd(params, tokens, encoder_output)
    jax.block_until_ready(out)

    assert out.shape == (BATCH, SEQ, EMB) and out.dtype == jnp.float32
    assert bool(jnp.all(jnp.isfinite(out)))
    print("KERNEL_OK")
</pallas_src>

<mosaic_0001>
module attributes {stable_mosaic.version = 11 : i64} {
  func.func @_decoder_block_kernel(%arg0: i32, %arg1: memref<1x8x32xf32, #tpu.memory_space<vmem>>, %arg2: memref<1x8x32xf32, #tpu.memory_space<vmem>>, %arg3: memref<1x8x32xf32, #tpu.memory_space<vmem>>, %arg4: memref<32x32xbf16, #tpu.memory_space<vmem>>, %arg5: memref<32x32xbf16, #tpu.memory_space<vmem>>, %arg6: memref<32x32xbf16, #tpu.memory_space<vmem>>, %arg7: memref<32x32xbf16, #tpu.memory_space<vmem>>, %arg8: memref<1x32xf32, #tpu.memory_space<vmem>>, %arg9: memref<1x32xf32, #tpu.memory_space<vmem>>, %arg10: memref<1x32xf32, #tpu.memory_space<vmem>>, %arg11: memref<32x32xbf16, #tpu.memory_space<vmem>>, %arg12: memref<32x32xbf16, #tpu.memory_space<vmem>>, %arg13: memref<32x32xbf16, #tpu.memory_space<vmem>>, %arg14: memref<32x32xbf16, #tpu.memory_space<vmem>>, %arg15: memref<1x32xf32, #tpu.memory_space<vmem>>, %arg16: memref<1x32xf32, #tpu.memory_space<vmem>>, %arg17: memref<1x32xf32, #tpu.memory_space<vmem>>, %arg18: memref<32x128xbf16, #tpu.memory_space<vmem>>, %arg19: memref<1x128xf32, #tpu.memory_space<vmem>>, %arg20: memref<128x32xbf16, #tpu.memory_space<vmem>>, %arg21: memref<1x32xf32, #tpu.memory_space<vmem>>, %arg22: memref<1x32xf32, #tpu.memory_space<vmem>>, %arg23: memref<1x32xf32, #tpu.memory_space<vmem>>, %arg24: memref<1x8x32xf32, #tpu.memory_space<vmem>>) attributes {dimension_semantics = [#tpu.dimension_semantics<parallel>], iteration_bounds = array<i64: 2>, scalar_prefetch = 0 : i64, scratch_operands = 0 : i64, tpu.core_type = #tpu.core_type<tc>, window_params = [{transform_indices = @transform_0, window_bounds = array<i64: 1, 8, 32>}, {transform_indices = @transform_1, window_bounds = array<i64: 1, 8, 32>}, {transform_indices = @transform_2, window_bounds = array<i64: 1, 8, 32>}, {pipeline_mode = #tpu.pipeline_mode<synchronous>, transform_indices = @transform_3, window_bounds = array<i64: 32, 32>}, {pipeline_mode = #tpu.pipeline_mode<synchronous>, transform_indices = @transform_4, window_bounds = array<i64: 32, 32>}, {pipeline_mode = #tpu.pipeline_mode<synchronous>, transform_indices = @transform_5, window_bounds = array<i64: 32, 32>}, {pipeline_mode = #tpu.pipeline_mode<synchronous>, transform_indices = @transform_6, window_bounds = array<i64: 32, 32>}, {pipeline_mode = #tpu.pipeline_mode<synchronous>, transform_indices = @transform_7, window_bounds = array<i64: 1, 32>}, {pipeline_mode = #tpu.pipeline_mode<synchronous>, transform_indices = @transform_8, window_bounds = array<i64: 1, 32>}, {pipeline_mode = #tpu.pipeline_mode<synchronous>, transform_indices = @transform_9, window_bounds = array<i64: 1, 32>}, {pipeline_mode = #tpu.pipeline_mode<synchronous>, transform_indices = @transform_10, window_bounds = array<i64: 32, 32>}, {pipeline_mode = #tpu.pipeline_mode<synchronous>, transform_indices = @transform_11, window_bounds = array<i64: 32, 32>}, {pipeline_mode = #tpu.pipeline_mode<synchronous>, transform_indices = @transform_12, window_bounds = array<i64: 32, 32>}, {pipeline_mode = #tpu.pipeline_mode<synchronous>, transform_indices = @transform_13, window_bounds = array<i64: 32, 32>}, {pipeline_mode = #tpu.pipeline_mode<synchronous>, transform_indices = @transform_14, window_bounds = array<i64: 1, 32>}, {pipeline_mode = #tpu.pipeline_mode<synchronous>, transform_indices = @transform_15, window_bounds = array<i64: 1, 32>}, {pipeline_mode = #tpu.pipeline_mode<synchronous>, transform_indices = @transform_16, window_bounds = array<i64: 1, 32>}, {pipeline_mode = #tpu.pipeline_mode<synchronous>, transform_indices = @transform_17, window_bounds = array<i64: 32, 128>}, {pipeline_mode = #tpu.pipeline_mode<synchronous>, transform_indices = @transform_18, window_bounds = array<i64: 1, 128>}, {pipeline_mode = #tpu.pipeline_mode<synchronous>, transform_indices = @transform_19, window_bounds = array<i64: 128, 32>}, {pipeline_mode = #tpu.pipeline_mode<synchronous>, transform_indices = @transform_20, window_bounds = array<i64: 1, 32>}, {pipeline_mode = #tpu.pipeline_mode<synchronous>, transform_indices = @transform_21, window_bounds = array<i64: 1, 32>}, {pipeline_mode = #tpu.pipeline_mode<synchronous>, transform_indices = @transform_22, window_bounds = array<i64: 1, 32>}, {transform_indices = @transform_23, window_bounds = array<i64: 1, 8, 32>}]} {
    %c0 = arith.constant 0 : index
    %c0_0 = arith.constant 0 : index
    %c0_1 = arith.constant 0 : index
    %0 = vector.load %arg1[%c0, %c0_0, %c0_1] : memref<1x8x32xf32, #tpu.memory_space<vmem>>, vector<1x8x32xf32>
    %1 = vector.shape_cast %0 : vector<1x8x32xf32> to vector<8x32xf32>
    %c0_2 = arith.constant 0 : index
    %c0_3 = arith.constant 0 : index
    %c0_4 = arith.constant 0 : index
    %2 = vector.load %arg2[%c0_2, %c0_3, %c0_4] : memref<1x8x32xf32, #tpu.memory_space<vmem>>, vector<1x8x32xf32>
    %3 = vector.shape_cast %2 : vector<1x8x32xf32> to vector<8x32xf32>
    %c0_5 = arith.constant 0 : index
    %c0_6 = arith.constant 0 : index
    %c0_7 = arith.constant 0 : index
    %4 = vector.load %arg3[%c0_5, %c0_6, %c0_7] : memref<1x8x32xf32, #tpu.memory_space<vmem>>, vector<1x8x32xf32>
    %5 = vector.shape_cast %4 : vector<1x8x32xf32> to vector<8x32xf32>
    %c0_8 = arith.constant 0 : index
    %c0_9 = arith.constant 0 : index
    %6 = vector.load %arg4[%c0_8, %c0_9] : memref<32x32xbf16, #tpu.memory_space<vmem>>, vector<32x32xbf16>
    %c0_10 = arith.constant 0 : index
    %c0_11 = arith.constant 0 : index
    %7 = vector.load %arg5[%c0_10, %c0_11] : memref<32x32xbf16, #tpu.memory_space<vmem>>, vector<32x32xbf16>
    %c0_12 = arith.constant 0 : index
    %c0_13 = arith.constant 0 : index
    %8 = vector.load %arg6[%c0_12, %c0_13] : memref<32x32xbf16, #tpu.memory_space<vmem>>, vector<32x32xbf16>
    %c0_14 = arith.constant 0 : index
    %c0_15 = arith.constant 0 : index
    %9 = vector.load %arg7[%c0_14, %c0_15] : memref<32x32xbf16, #tpu.memory_space<vmem>>, vector<32x32xbf16>
    %c0_16 = arith.constant 0 : index
    %c0_17 = arith.constant 0 : index
    %10 = vector.load %arg8[%c0_16, %c0_17] : memref<1x32xf32, #tpu.memory_space<vmem>>, vector<1x32xf32>
    %11 = arith.truncf %5 : vector<8x32xf32> to vector<8x32xbf16>
    %cst = arith.constant dense<0.000000e+00> : vector<8x32xf32>
    %12 = tpu.matmul %11, %6, %cst {dimension_numbers = #tpu.dot_dimension_numbers<[1], [0], [0], [1], [0, 0, 1, 1], [], []>} : vector<8x32xbf16>, vector<32x32xbf16>, vector<8x32xf32> -> vector<8x32xf32>
    %13 = arith.truncf %5 : vector<8x32xf32> to vector<8x32xbf16>
    %cst_18 = arith.constant dense<0.000000e+00> : vector<8x32xf32>
    %14 = tpu.matmul %13, %7, %cst_18 {dimension_numbers = #tpu.dot_dimension_numbers<[1], [0], [0], [1], [0, 0, 1, 1], [], []>} : vector<8x32xbf16>, vector<32x32xbf16>, vector<8x32xf32> -> vector<8x32xf32>
    %15 = arith.truncf %5 : vector<8x32xf32> to vector<8x32xbf16>
    %cst_19 = arith.constant dense<0.000000e+00> : vector<8x32xf32>
    %16 = tpu.matmul %15, %8, %cst_19 {dimension_numbers = #tpu.dot_dimension_numbers<[1], [0], [0], [1], [0, 0, 1, 1], [], []>} : vector<8x32xbf16>, vector<32x32xbf16>, vector<8x32xf32> -> vector<8x32xf32>
    %17 = arith.truncf %12 : vector<8x32xf32> to vector<8x32xbf16>
    %18 = arith.truncf %14 : vector<8x32xf32> to vector<8x32xbf16>
    %19 = arith.truncf %16 : vector<8x32xf32> to vector<8x32xbf16>
    %cst_20 = arith.constant 0.000000e+00 : f32
    %20 = vector.broadcast %cst_20 : f32 to vector<8x32xf32>
    %21 = vector.extract_strided_slice %18 {offsets = [0, 0], sizes = [8, 8], strides = [1, 1]} : vector<8x32xbf16> to vector<8x8xbf16>
    %22 = vector.extract_strided_slice %17 {offsets = [0, 0], sizes = [8, 8], strides = [1, 1]} : vector<8x32xbf16> to vector<8x8xbf16>
    "tpu.trace_start"() <{level = 10 : i32, message = "qd,kd->qk"}> : () -> ()
    %cst_21 = arith.constant dense<0.000000e+00> : vector<8x8xf32>
    %23 = tpu.matmul %21, %22, %cst_21 {dimension_numbers = #tpu.dot_dimension_numbers<[1], [1], [0], [0], [0, 0, 1, 0], [], []>} : vector<8x8xbf16>, vector<8x8xbf16>, vector<8x8xf32> -> vector<8x8xf32>
    "tpu.trace_stop"() : () -> ()
    %cst_22 = arith.constant dense<0xFF800000> : vector<8xf32>
    %24 = vector.multi_reduction <maximumf>, %23, %cst_22 [1] : vector<8x8xf32> to vector<8xf32>
    %25 = vector.shape_cast %24 : vector<8xf32> to vector<8x1xf32>
    %26 = vector.broadcast %25 : vector<8x1xf32> to vector<8x8xf32>
    %27 = arith.subf %23, %26 : vector<8x8xf32>
    %28 = math.exp %27 : vector<8x8xf32>
    %cst_23 = arith.constant dense<0.000000e+00> : vector<8xf32>
    %29 = vector.multi_reduction <add>, %28, %cst_23 [1] : vector<8x8xf32> to vector<8xf32>
    %30 = vector.shape_cast %29 : vector<8xf32> to vector<8x1xf32>
    %31 = tpu.reciprocal %30 {approx = true} : vector<8x1xf32> -> vector<8x1xf32>
    %32 = vector.broadcast %31 : vector<8x1xf32> to vector<8x8xf32>
    %33 = arith.mulf %28, %32 : vector<8x8xf32>
    %34 = arith.truncf %33 : vector<8x8xf32> to vector<8x8xbf16>
    %35 = vector.extract_strided_slice %19 {offsets = [0, 0], sizes = [8, 8], strides = [1, 1]} : vector<8x32xbf16> to vector<8x8xbf16>
    %cst_24 = arith.constant dense<0.000000e+00> : vector<8x8xf32>
    %36 = tpu.matmul %34, %35, %cst_24 {dimension_numbers = #tpu.dot_dimension_numbers<[1], [0], [0], [1], [0, 0, 1, 1], [], []>} : vector<8x8xbf16>, vector<8x8xbf16>, vector<8x8xf32> -> vector<8x8xf32>
    %37 = arith.truncf %36 : vector<8x8xf32> to vector<8x8xbf16>
    %38 = vector.extract_strided_slice %9 {offsets = [0, 0], sizes = [8, 32], strides = [1, 1]} : vector<32x32xbf16> to vector<8x32xbf16>
    %cst_25 = arith.constant dense<0.000000e+00> : vector<8x32xf32>
    %39 = tpu.matmul %37, %38, %cst_25 {dimension_numbers = #tpu.dot_dimension_numbers<[1], [0], [0], [1], [0, 0, 1, 1], [], []>} : vector<8x8xbf16>, vector<8x32xbf16>, vector<8x32xf32> -> vector<8x32xf32>
    %40 = arith.addf %20, %39 : vector<8x32xf32>
    %41 = vector.extract_strided_slice %18 {offsets = [0, 8], sizes = [8, 8], strides = [1, 1]} : vector<8x32xbf16> to vector<8x8xbf16>
    %42 = vector.extract_strided_slice %17 {offsets = [0, 8], sizes = [8, 8], strides = [1, 1]} : vector<8x32xbf16> to vector<8x8xbf16>
    "tpu.trace_start"() <{level = 10 : i32, message = "qd,kd->qk"}> : () -> ()
    %cst_26 = arith.constant dense<0.000000e+00> : vector<8x8xf32>
    %43 = tpu.matmul %41, %42, %cst_26 {dimension_numbers = #tpu.dot_dimension_numbers<[1], [1], [0], [0], [0, 0, 1, 0], [], []>} : vector<8x8xbf16>, vector<8x8xbf16>, vector<8x8xf32> -> vector<8x8xf32>
    "tpu.trace_stop"() : () -> ()
    %cst_27 = arith.constant dense<0xFF800000> : vector<8xf32>
    %44 = vector.multi_reduction <maximumf>, %43, %cst_27 [1] : vector<8x8xf32> to vector<8xf32>
    %45 = vector.shape_cast %44 : vector<8xf32> to vector<8x1xf32>
    %46 = vector.broadcast %45 : vector<8x1xf32> to vector<8x8xf32>
    %47 = arith.subf %43, %46 : vector<8x8xf32>
    %48 = math.exp %47 : vector<8x8xf32>
    %cst_28 = arith.constant dense<0.000000e+00> : vector<8xf32>
    %49 = vector.multi_reduction <add>, %48, %cst_28 [1] : vector<8x8xf32> to vector<8xf32>
    %50 = vector.shape_cast %49 : vector<8xf32> to vector<8x1xf32>
    %51 = tpu.reciprocal %50 {approx = true} : vector<8x1xf32> -> vector<8x1xf32>
    %52 = vector.broadcast %51 : vector<8x1xf32> to vector<8x8xf32>
    %53 = arith.mulf %48, %52 : vector<8x8xf32>
    %54 = arith.truncf %53 : vector<8x8xf32> to vector<8x8xbf16>
    %55 = vector.extract_strided_slice %19 {offsets = [0, 8], sizes = [8, 8], strides = [1, 1]} : vector<8x32xbf16> to vector<8x8xbf16>
    %cst_29 = arith.constant dense<0.000000e+00> : vector<8x8xf32>
    %56 = tpu.matmul %54, %55, %cst_29 {dimension_numbers = #tpu.dot_dimension_numbers<[1], [0], [0], [1], [0, 0, 1, 1], [], []>} : vector<8x8xbf16>, vector<8x8xbf16>, vector<8x8xf32> -> vector<8x8xf32>
    %57 = arith.truncf %56 : vector<8x8xf32> to vector<8x8xbf16>
    %58 = vector.extract_strided_slice %9 {offsets = [8, 0], sizes = [8, 32], strides = [1, 1]} : vector<32x32xbf16> to vector<8x32xbf16>
    %cst_30 = arith.constant dense<0.000000e+00> : vector<8x32xf32>
    %59 = tpu.matmul %57, %58, %cst_30 {dimension_numbers = #tpu.dot_dimension_numbers<[1], [0], [0], [1], [0, 0, 1, 1], [], []>} : vector<8x8xbf16>, vector<8x32xbf16>, vector<8x32xf32> -> vector<8x32xf32>
    %60 = arith.addf %40, %59 : vector<8x32xf32>
    %61 = vector.extract_strided_slice %18 {offsets = [0, 16], sizes = [8, 8], strides = [1, 1]} : vector<8x32xbf16> to vector<8x8xbf16>
    %62 = vector.extract_strided_slice %17 {offsets = [0, 16], sizes = [8, 8], strides = [1, 1]} : vector<8x32xbf16> to vector<8x8xbf16>
    "tpu.trace_start"() <{level = 10 : i32, message = "qd,kd->qk"}> : () -> ()
    %cst_31 = arith.constant dense<0.000000e+00> : vector<8x8xf32>
    %63 = tpu.matmul %61, %62, %cst_31 {dimension_numbers = #tpu.dot_dimension_numbers<[1], [1], [0], [0], [0, 0, 1, 0], [], []>} : vector<8x8xbf16>, vector<8x8xbf16>, vector<8x8xf32> -> vector<8x8xf32>
    "tpu.trace_stop"() : () -> ()
    %cst_32 = arith.constant dense<0xFF800000> : vector<8xf32>
    %64 = vector.multi_reduction <maximumf>, %63, %cst_32 [1] : vector<8x8xf32> to vector<8xf32>
    %65 = vector.shape_cast %64 : vector<8xf32> to vector<8x1xf32>
    %66 = vector.broadcast %65 : vector<8x1xf32> to vector<8x8xf32>
    %67 = arith.subf %63, %66 : vector<8x8xf32>
    %68 = math.exp %67 : vector<8x8xf32>
    %cst_33 = arith.constant dense<0.000000e+00> : vector<8xf32>
    %69 = vector.multi_reduction <add>, %68, %cst_33 [1] : vector<8x8xf32> to vector<8xf32>
    %70 = vector.shape_cast %69 : vector<8xf32> to vector<8x1xf32>
    %71 = tpu.reciprocal %70 {approx = true} : vector<8x1xf32> -> vector<8x1xf32>
    %72 = vector.broadcast %71 : vector<8x1xf32> to vector<8x8xf32>
    %73 = arith.mulf %68, %72 : vector<8x8xf32>
    %74 = arith.truncf %73 : vector<8x8xf32> to vector<8x8xbf16>
    %75 = vector.extract_strided_slice %19 {offsets = [0, 16], sizes = [8, 8], strides = [1, 1]} : vector<8x32xbf16> to vector<8x8xbf16>
    %cst_34 = arith.constant dense<0.000000e+00> : vector<8x8xf32>
    %76 = tpu.matmul %74, %75, %cst_34 {dimension_numbers = #tpu.dot_dimension_numbers<[1], [0], [0], [1], [0, 0, 1, 1], [], []>} : vector<8x8xbf16>, vector<8x8xbf16>, vector<8x8xf32> -> vector<8x8xf32>
    %77 = arith.truncf %76 : vector<8x8xf32> to vector<8x8xbf16>
    %78 = vector.extract_strided_slice %9 {offsets = [16, 0], sizes = [8, 32], strides = [1, 1]} : vector<32x32xbf16> to vector<8x32xbf16>
    %cst_35 = arith.constant dense<0.000000e+00> : vector<8x32xf32>
    %79 = tpu.matmul %77, %78, %cst_35 {dimension_numbers = #tpu.dot_dimension_numbers<[1], [0], [0], [1], [0, 0, 1, 1], [], []>} : vector<8x8xbf16>, vector<8x32xbf16>, vector<8x32xf32> -> vector<8x32xf32>
    %80 = arith.addf %60, %79 : vector<8x32xf32>
    %81 = vector.extract_strided_slice %18 {offsets = [0, 24], sizes = [8, 8], strides = [1, 1]} : vector<8x32xbf16> to vector<8x8xbf16>
    %82 = vector.extract_strided_slice %17 {offsets = [0, 24], sizes = [8, 8], strides = [1, 1]} : vector<8x32xbf16> to vector<8x8xbf16>
    "tpu.trace_start"() <{level = 10 : i32, message = "qd,kd->qk"}> : () -> ()
    %cst_36 = arith.constant dense<0.000000e+00> : vector<8x8xf32>
    %83 = tpu.matmul %81, %82, %cst_36 {dimension_numbers = #tpu.dot_dimension_numbers<[1], [1], [0], [0], [0, 0, 1, 0], [], []>} : vector<8x8xbf16>, vector<8x8xbf16>, vector<8x8xf32> -> vector<8x8xf32>
    "tpu.trace_stop"() : () -> ()
    %cst_37 = arith.constant dense<0xFF800000> : vector<8xf32>
    %84 = vector.multi_reduction <maximumf>, %83, %cst_37 [1] : vector<8x8xf32> to vector<8xf32>
    %85 = vector.shape_cast %84 : vector<8xf32> to vector<8x1xf32>
    %86 = vector.broadcast %85 : vector<8x1xf32> to vector<8x8xf32>
    %87 = arith.subf %83, %86 : vector<8x8xf32>
    %88 = math.exp %87 : vector<8x8xf32>
    %cst_38 = arith.constant dense<0.000000e+00> : vector<8xf32>
    %89 = vector.multi_reduction <add>, %88, %cst_38 [1] : vector<8x8xf32> to vector<8xf32>
    %90 = vector.shape_cast %89 : vector<8xf32> to vector<8x1xf32>
    %91 = tpu.reciprocal %90 {approx = true} : vector<8x1xf32> -> vector<8x1xf32>
    %92 = vector.broadcast %91 : vector<8x1xf32> to vector<8x8xf32>
    %93 = arith.mulf %88, %92 : vector<8x8xf32>
    %94 = arith.truncf %93 : vector<8x8xf32> to vector<8x8xbf16>
    %95 = vector.extract_strided_slice %19 {offsets = [0, 24], sizes = [8, 8], strides = [1, 1]} : vector<8x32xbf16> to vector<8x8xbf16>
    %cst_39 = arith.constant dense<0.000000e+00> : vector<8x8xf32>
    %96 = tpu.matmul %94, %95, %cst_39 {dimension_numbers = #tpu.dot_dimension_numbers<[1], [0], [0], [1], [0, 0, 1, 1], [], []>} : vector<8x8xbf16>, vector<8x8xbf16>, vector<8x8xf32> -> vector<8x8xf32>
    %97 = arith.truncf %96 : vector<8x8xf32> to vector<8x8xbf16>
    %98 = vector.extract_strided_slice %9 {offsets = [24, 0], sizes = [8, 32], strides = [1, 1]} : vector<32x32xbf16> to vector<8x32xbf16>
    %cst_40 = arith.constant dense<0.000000e+00> : vector<8x32xf32>
    %99 = tpu.matmul %97, %98, %cst_40 {dimension_numbers = #tpu.dot_dimension_numbers<[1], [0], [0], [1], [0, 0, 1, 1], [], []>} : vector<8x8xbf16>, vector<8x32xbf16>, vector<8x32xf32> -> vector<8x32xf32>
    %100 = arith.addf %80, %99 : vector<8x32xf32>
    %101 = vector.broadcast %10 : vector<1x32xf32> to vector<8x32xf32>
    %102 = arith.addf %100, %101 : vector<8x32xf32>
    %c0_41 = arith.constant 0 : index
    %c0_42 = arith.constant 0 : index
    %103 = vector.load %arg9[%c0_41, %c0_42] : memref<1x32xf32, #tpu.memory_space<vmem>>, vector<1x32xf32>
    %c0_43 = arith.constant 0 : index
    %c0_44 = arith.constant 0 : index
    %104 = vector.load %arg10[%c0_43, %c0_44] : memref<1x32xf32, #tpu.memory_space<vmem>>, vector<1x32xf32>
    %105 = arith.addf %102, %5 : vector<8x32xf32>
    %cst_45 = arith.constant dense<0.000000e+00> : vector<8xf32>
    %106 = vector.multi_reduction <add>, %105, %cst_45 [1] : vector<8x32xf32> to vector<8xf32>
    %107 = vector.shape_cast %106 : vector<8xf32> to vector<8x1xf32>
    %cst_46 = arith.constant 3.200000e+01 : f32
    %108 = vector.broadcast %cst_46 : f32 to vector<8x1xf32>
    %109 = arith.divf %107, %108 : vector<8x1xf32>
    %110 = vector.broadcast %109 : vector<8x1xf32> to vector<8x32xf32>
    %111 = arith.subf %105, %110 : vector<8x32xf32>
    %112 = arith.mulf %111, %111 : vector<8x32xf32>
    %cst_47 = arith.constant dense<0.000000e+00> : vector<8xf32>
    %113 = vector.multi_reduction <add>, %112, %cst_47 [1] : vector<8x32xf32> to vector<8xf32>
    %114 = vector.shape_cast %113 : vector<8xf32> to vector<8x1xf32>
    %cst_48 = arith.constant 3.200000e+01 : f32
    %115 = vector.broadcast %cst_48 : f32 to vector<8x1xf32>
    %116 = arith.divf %114, %115 : vector<8x1xf32>
    %cst_49 = arith.constant 9.99999974E-6 : f32
    %117 = vector.broadcast %cst_49 : f32 to vector<8x1xf32>
    %118 = arith.addf %116, %117 : vector<8x1xf32>
    %119 = math.rsqrt %118 : vector<8x1xf32>
    %120 = vector.broadcast %119 : vector<8x1xf32> to vector<8x32xf32>
    %121 = arith.mulf %111, %120 : vector<8x32xf32>
    %122 = vector.broadcast %103 : vector<1x32xf32> to vector<8x32xf32>
    %123 = arith.mulf %121, %122 : vector<8x32xf32>
    %124 = vector.broadcast %104 : vector<1x32xf32> to vector<8x32xf32>
    %125 = arith.addf %123, %124 : vector<8x32xf32>
    %c0_50 = arith.constant 0 : index
    %c0_51 = arith.constant 0 : index
    %126 = vector.load %arg11[%c0_50, %c0_51] : memref<32x32xbf16, #tpu.memory_space<vmem>>, vector<32x32xbf16>
    %c0_52 = arith.constant 0 : index
    %c0_53 = arith.constant 0 : index
    %127 = vector.load %arg12[%c0_52, %c0_53] : memref<32x32xbf16, #tpu.memory_space<vmem>>, vector<32x32xbf16>
    %c0_54 = arith.constant 0 : index
    %c0_55 = arith.constant 0 : index
    %128 = vector.load %arg13[%c0_54, %c0_55] : memref<32x32xbf16, #tpu.memory_space<vmem>>, vector<32x32xbf16>
    %c0_56 = arith.constant 0 : index
    %c0_57 = arith.constant 0 : index
    %129 = vector.load %arg14[%c0_56, %c0_57] : memref<32x32xbf16, #tpu.memory_space<vmem>>, vector<32x32xbf16>
    %c0_58 = arith.constant 0 : index
    %c0_59 = arith.constant 0 : index
    %130 = vector.load %arg15[%c0_58, %c0_59] : memref<1x32xf32, #tpu.memory_space<vmem>>, vector<1x32xf32>
    %131 = arith.truncf %1 : vector<8x32xf32> to vector<8x32xbf16>
    %cst_60 = arith.constant dense<0.000000e+00> : vector<8x32xf32>
    %132 = tpu.matmul %131, %126, %cst_60 {dimension_numbers = #tpu.dot_dimension_numbers<[1], [0], [0], [1], [0, 0, 1, 1], [], []>} : vector<8x32xbf16>, vector<32x32xbf16>, vector<8x32xf32> -> vector<8x32xf32>
    %133 = arith.truncf %3 : vector<8x32xf32> to vector<8x32xbf16>
    %cst_61 = arith.constant dense<0.000000e+00> : vector<8x32xf32>
    %134 = tpu.matmul %133, %127, %cst_61 {dimension_numbers = #tpu.dot_dimension_numbers<[1], [0], [0], [1], [0, 0, 1, 1], [], []>} : vector<8x32xbf16>, vector<32x32xbf16>, vector<8x32xf32> -> vector<8x32xf32>
    %135 = arith.truncf %125 : vector<8x32xf32> to vector<8x32xbf16>
    %cst_62 = arith.constant dense<0.000000e+00> : vector<8x32xf32>
    %136 = tpu.matmul %135, %128, %cst_62 {dimension_numbers = #tpu.dot_dimension_numbers<[1], [0], [0], [1], [0, 0, 1, 1], [], []>} : vector<8x32xbf16>, vector<32x32xbf16>, vector<8x32xf32> -> vector<8x32xf32>
    %137 = arith.truncf %132 : vector<8x32xf32> to vector<8x32xbf16>
    %138 = arith.truncf %134 : vector<8x32xf32> to vector<8x32xbf16>
    %139 = arith.truncf %136 : vector<8x32xf32> to vector<8x32xbf16>
    %cst_63 = arith.constant 0.000000e+00 : f32
    %140 = vector.broadcast %cst_63 : f32 to vector<8x32xf32>
    %141 = vector.extract_strided_slice %138 {offsets = [0, 0], sizes = [8, 8], strides = [1, 1]} : vector<8x32xbf16> to vector<8x8xbf16>
    %142 = vector.extract_strided_slice %137 {offsets = [0, 0], sizes = [8, 8], strides = [1, 1]} : vector<8x32xbf16> to vector<8x8xbf16>
    "tpu.trace_start"() <{level = 10 : i32, message = "qd,kd->qk"}> : () -> ()
    %cst_64 = arith.constant dense<0.000000e+00> : vector<8x8xf32>
    %143 = tpu.matmul %141, %142, %cst_64 {dimension_numbers = #tpu.dot_dimension_numbers<[1], [1], [0], [0], [0, 0, 1, 0], [], []>} : vector<8x8xbf16>, vector<8x8xbf16>, vector<8x8xf32> -> vector<8x8xf32>
    "tpu.trace_stop"() : () -> ()
    %cst_65 = arith.constant dense<0xFF800000> : vector<8xf32>
    %144 = vector.multi_reduction <maximumf>, %143, %cst_65 [1] : vector<8x8xf32> to vector<8xf32>
    %145 = vector.shape_cast %144 : vector<8xf32> to vector<8x1xf32>
    %146 = vector.broadcast %145 : vector<8x1xf32> to vector<8x8xf32>
    %147 = arith.subf %143, %146 : vector<8x8xf32>
    %148 = math.exp %147 : vector<8x8xf32>
    %cst_66 = arith.constant dense<0.000000e+00> : vector<8xf32>
    %149 = vector.multi_reduction <add>, %148, %cst_66 [1] : vector<8x8xf32> to vector<8xf32>
    %150 = vector.shape_cast %149 : vector<8xf32> to vector<8x1xf32>
    %151 = tpu.reciprocal %150 {approx = true} : vector<8x1xf32> -> vector<8x1xf32>
    %152 = vector.broadcast %151 : vector<8x1xf32> to vector<8x8xf32>
    %153 = arith.mulf %148, %152 : vector<8x8xf32>
    %154 = arith.truncf %153 : vector<8x8xf32> to vector<8x8xbf16>
    %155 = vector.extract_strided_slice %139 {offsets = [0, 0], sizes = [8, 8], strides = [1, 1]} : vector<8x32xbf16> to vector<8x8xbf16>
    %cst_67 = arith.constant dense<0.000000e+00> : vector<8x8xf32>
    %156 = tpu.matmul %154, %155, %cst_67 {dimension_numbers = #tpu.dot_dimension_numbers<[1], [0], [0], [1], [0, 0, 1, 1], [], []>} : vector<8x8xbf16>, vector<8x8xbf16>, vector<8x8xf32> -> vector<8x8xf32>
    %157 = arith.truncf %156 : vector<8x8xf32> to vector<8x8xbf16>
    %158 = vector.extract_strided_slice %129 {offsets = [0, 0], sizes = [8, 32], strides = [1, 1]} : vector<32x32xbf16> to vector<8x32xbf16>
    %cst_68 = arith.constant dense<0.000000e+00> : vector<8x32xf32>
    %159 = tpu.matmul %157, %158, %cst_68 {dimension_numbers = #tpu.dot_dimension_numbers<[1], [0], [0], [1], [0, 0, 1, 1], [], []>} : vector<8x8xbf16>, vector<8x32xbf16>, vector<8x32xf32> -> vector<8x32xf32>
    %160 = arith.addf %140, %159 : vector<8x32xf32>
    %161 = vector.extract_strided_slice %138 {offsets = [0, 8], sizes = [8, 8], strides = [1, 1]} : vector<8x32xbf16> to vector<8x8xbf16>
    %162 = vector.extract_strided_slice %137 {offsets = [0, 8], sizes = [8, 8], strides = [1, 1]} : vector<8x32xbf16> to vector<8x8xbf16>
    "tpu.trace_start"() <{level = 10 : i32, message = "qd,kd->qk"}> : () -> ()
    %cst_69 = arith.constant dense<0.000000e+00> : vector<8x8xf32>
    %163 = tpu.matmul %161, %162, %cst_69 {dimension_numbers = #tpu.dot_dimension_numbers<[1], [1], [0], [0], [0, 0, 1, 0], [], []>} : vector<8x8xbf16>, vector<8x8xbf16>, vector<8x8xf32> -> vector<8x8xf32>
    "tpu.trace_stop"() : () -> ()
    %cst_70 = arith.constant dense<0xFF800000> : vector<8xf32>
    %164 = vector.multi_reduction <maximumf>, %163, %cst_70 [1] : vector<8x8xf32> to vector<8xf32>
    %165 = vector.shape_cast %164 : vector<8xf32> to vector<8x1xf32>
    %166 = vector.broadcast %165 : vector<8x1xf32> to vector<8x8xf32>
    %167 = arith.subf %163, %166 : vector<8x8xf32>
    %168 = math.exp %167 : vector<8x8xf32>
    %cst_71 = arith.constant dense<0.000000e+00> : vector<8xf32>
    %169 = vector.multi_reduction <add>, %168, %cst_71 [1] : vector<8x8xf32> to vector<8xf32>
    %170 = vector.shape_cast %169 : vector<8xf32> to vector<8x1xf32>
    %171 = tpu.reciprocal %170 {approx = true} : vector<8x1xf32> -> vector<8x1xf32>
    %172 = vector.broadcast %171 : vector<8x1xf32> to vector<8x8xf32>
    %173 = arith.mulf %168, %172 : vector<8x8xf32>
    %174 = arith.truncf %173 : vector<8x8xf32> to vector<8x8xbf16>
    %175 = vector.extract_strided_slice %139 {offsets = [0, 8], sizes = [8, 8], strides = [1, 1]} : vector<8x32xbf16> to vector<8x8xbf16>
    %cst_72 = arith.constant dense<0.000000e+00> : vector<8x8xf32>
    %176 = tpu.matmul %174, %175, %cst_72 {dimension_numbers = #tpu.dot_dimension_numbers<[1], [0], [0], [1], [0, 0, 1, 1], [], []>} : vector<8x8xbf16>, vector<8x8xbf16>, vector<8x8xf32> -> vector<8x8xf32>
    %177 = arith.truncf %176 : vector<8x8xf32> to vector<8x8xbf16>
    %178 = vector.extract_strided_slice %129 {offsets = [8, 0], sizes = [8, 32], strides = [1, 1]} : vector<32x32xbf16> to vector<8x32xbf16>
    %cst_73 = arith.constant dense<0.000000e+00> : vector<8x32xf32>
    %179 = tpu.matmul %177, %178, %cst_73 {dimension_numbers = #tpu.dot_dimension_numbers<[1], [0], [0], [1], [0, 0, 1, 1], [], []>} : vector<8x8xbf16>, vector<8x32xbf16>, vector<8x32xf32> -> vector<8x32xf32>
    %180 = arith.addf %160, %179 : vector<8x32xf32>
    %181 = vector.extract_strided_slice %138 {offsets = [0, 16], sizes = [8, 8], strides = [1, 1]} : vector<8x32xbf16> to vector<8x8xbf16>
    %182 = vector.extract_strided_slice %137 {offsets = [0, 16], sizes = [8, 8], strides = [1, 1]} : vector<8x32xbf16> to vector<8x8xbf16>
    "tpu.trace_start"() <{level = 10 : i32, message = "qd,kd->qk"}> : () -> ()
    %cst_74 = arith.constant dense<0.000000e+00> : vector<8x8xf32>
    %183 = tpu.matmul %181, %182, %cst_74 {dimension_numbers = #tpu.dot_dimension_numbers<[1], [1], [0], [0], [0, 0, 1, 0], [], []>} : vector<8x8xbf16>, vector<8x8xbf16>, vector<8x8xf32> -> vector<8x8xf32>
    "tpu.trace_stop"() : () -> ()
    %cst_75 = arith.constant dense<0xFF800000> : vector<8xf32>
    %184 = vector.multi_reduction <maximumf>, %183, %cst_75 [1] : vector<8x8xf32> to vector<8xf32>
    %185 = vector.shape_cast %184 : vector<8xf32> to vector<8x1xf32>
    %186 = vector.broadcast %185 : vector<8x1xf32> to vector<8x8xf32>
    %187 = arith.subf %183, %186 : vector<8x8xf32>
    %188 = math.exp %187 : vector<8x8xf32>
    %cst_76 = arith.constant dense<0.000000e+00> : vector<8xf32>
    %189 = vector.multi_reduction <add>, %188, %cst_76 [1] : vector<8x8xf32> to vector<8xf32>
    %190 = vector.shape_cast %189 : vector<8xf32> to vector<8x1xf32>
    %191 = tpu.reciprocal %190 {approx = true} : vector<8x1xf32> -> vector<8x1xf32>
    %192 = vector.broadcast %191 : vector<8x1xf32> to vector<8x8xf32>
    %193 = arith.mulf %188, %192 : vector<8x8xf32>
    %194 = arith.truncf %193 : vector<8x8xf32> to vector<8x8xbf16>
    %195 = vector.extract_strided_slice %139 {offsets = [0, 16], sizes = [8, 8], strides = [1, 1]} : vector<8x32xbf16> to vector<8x8xbf16>
    %cst_77 = arith.constant dense<0.000000e+00> : vector<8x8xf32>
    %196 = tpu.matmul %194, %195, %cst_77 {dimension_numbers = #tpu.dot_dimension_numbers<[1], [0], [0], [1], [0, 0, 1, 1], [], []>} : vector<8x8xbf16>, vector<8x8xbf16>, vector<8x8xf32> -> vector<8x8xf32>
    %197 = arith.truncf %196 : vector<8x8xf32> to vector<8x8xbf16>
    %198 = vector.extract_strided_slice %129 {offsets = [16, 0], sizes = [8, 32], strides = [1, 1]} : vector<32x32xbf16> to vector<8x32xbf16>
    %cst_78 = arith.constant dense<0.000000e+00> : vector<8x32xf32>
    %199 = tpu.matmul %197, %198, %cst_78 {dimension_numbers = #tpu.dot_dimension_numbers<[1], [0], [0], [1], [0, 0, 1, 1], [], []>} : vector<8x8xbf16>, vector<8x32xbf16>, vector<8x32xf32> -> vector<8x32xf32>
    %200 = arith.addf %180, %199 : vector<8x32xf32>
    %201 = vector.extract_strided_slice %138 {offsets = [0, 24], sizes = [8, 8], strides = [1, 1]} : vector<8x32xbf16> to vector<8x8xbf16>
    %202 = vector.extract_strided_slice %137 {offsets = [0, 24], sizes = [8, 8], strides = [1, 1]} : vector<8x32xbf16> to vector<8x8xbf16>
    "tpu.trace_start"() <{level = 10 : i32, message = "qd,kd->qk"}> : () -> ()
    %cst_79 = arith.constant dense<0.000000e+00> : vector<8x8xf32>
    %203 = tpu.matmul %201, %202, %cst_79 {dimension_numbers = #tpu.dot_dimension_numbers<[1], [1], [0], [0], [0, 0, 1, 0], [], []>} : vector<8x8xbf16>, vector<8x8xbf16>, vector<8x8xf32> -> vector<8x8xf32>
    "tpu.trace_stop"() : () -> ()
    %cst_80 = arith.constant dense<0xFF800000> : vector<8xf32>
    %204 = vector.multi_reduction <maximumf>, %203, %cst_80 [1] : vector<8x8xf32> to vector<8xf32>
    %205 = vector.shape_cast %204 : vector<8xf32> to vector<8x1xf32>
    %206 = vector.broadcast %205 : vector<8x1xf32> to vector<8x8xf32>
    %207 = arith.subf %203, %206 : vector<8x8xf32>
    %208 = math.exp %207 : vector<8x8xf32>
    %cst_81 = arith.constant dense<0.000000e+00> : vector<8xf32>
    %209 = vector.multi_reduction <add>, %208, %cst_81 [1] : vector<8x8xf32> to vector<8xf32>
    %210 = vector.shape_cast %209 : vector<8xf32> to vector<8x1xf32>
    %211 = tpu.reciprocal %210 {approx = true} : vector<8x1xf32> -> vector<8x1xf32>
    %212 = vector.broadcast %211 : vector<8x1xf32> to vector<8x8xf32>
    %213 = arith.mulf %208, %212 : vector<8x8xf32>
    %214 = arith.truncf %213 : vector<8x8xf32> to vector<8x8xbf16>
    %215 = vector.extract_strided_slice %139 {offsets = [0, 24], sizes = [8, 8], strides = [1, 1]} : vector<8x32xbf16> to vector<8x8xbf16>
    %cst_82 = arith.constant dense<0.000000e+00> : vector<8x8xf32>
    %216 = tpu.matmul %214, %215, %cst_82 {dimension_numbers = #tpu.dot_dimension_numbers<[1], [0], [0], [1], [0, 0, 1, 1], [], []>} : vector<8x8xbf16>, vector<8x8xbf16>, vector<8x8xf32> -> vector<8x8xf32>
    %217 = arith.truncf %216 : vector<8x8xf32> to vector<8x8xbf16>
    %218 = vector.extract_strided_slice %129 {offsets = [24, 0], sizes = [8, 32], strides = [1, 1]} : vector<32x32xbf16> to vector<8x32xbf16>
    %cst_83 = arith.constant dense<0.000000e+00> : vector<8x32xf32>
    %219 = tpu.matmul %217, %218, %cst_83 {dimension_numbers = #tpu.dot_dimension_numbers<[1], [0], [0], [1], [0, 0, 1, 1], [], []>} : vector<8x8xbf16>, vector<8x32xbf16>, vector<8x32xf32> -> vector<8x32xf32>
    %220 = arith.addf %200, %219 : vector<8x32xf32>
    %221 = vector.broadcast %130 : vector<1x32xf32> to vector<8x32xf32>
    %222 = arith.addf %220, %221 : vector<8x32xf32>
    %c0_84 = arith.constant 0 : index
    %c0_85 = arith.constant 0 : index
    %223 = vector.load %arg16[%c0_84, %c0_85] : memref<1x32xf32, #tpu.memory_space<vmem>>, vector<1x32xf32>
    %c0_86 = arith.constant 0 : index
    %c0_87 = arith.constant 0 : index
    %224 = vector.load %arg17[%c0_86, %c0_87] : memref<1x32xf32, #tpu.memory_space<vmem>>, vector<1x32xf32>
    %225 = arith.addf %222, %125 : vector<8x32xf32>
    %cst_88 = arith.constant dense<0.000000e+00> : vector<8xf32>
    %226 = vector.multi_reduction <add>, %225, %cst_88 [1] : vector<8x32xf32> to vector<8xf32>
    %227 = vector.shape_cast %226 : vector<8xf32> to vector<8x1xf32>
    %cst_89 = arith.constant 3.200000e+01 : f32
    %228 = vector.broadcast %cst_89 : f32 to vector<8x1xf32>
    %229 = arith.divf %227, %228 : vector<8x1xf32>
    %230 = vector.broadcast %229 : vector<8x1xf32> to vector<8x32xf32>
    %231 = arith.subf %225, %230 : vector<8x32xf32>
    %232 = arith.mulf %231, %231 : vector<8x32xf32>
    %cst_90 = arith.constant dense<0.000000e+00> : vector<8xf32>
    %233 = vector.multi_reduction <add>, %232, %cst_90 [1] : vector<8x32xf32> to vector<8xf32>
    %234 = vector.shape_cast %233 : vector<8xf32> to vector<8x1xf32>
    %cst_91 = arith.constant 3.200000e+01 : f32
    %235 = vector.broadcast %cst_91 : f32 to vector<8x1xf32>
    %236 = arith.divf %234, %235 : vector<8x1xf32>
    %cst_92 = arith.constant 9.99999974E-6 : f32
    %237 = vector.broadcast %cst_92 : f32 to vector<8x1xf32>
    %238 = arith.addf %236, %237 : vector<8x1xf32>
    %239 = math.rsqrt %238 : vector<8x1xf32>
    %240 = vector.broadcast %239 : vector<8x1xf32> to vector<8x32xf32>
    %241 = arith.mulf %231, %240 : vector<8x32xf32>
    %242 = vector.broadcast %223 : vector<1x32xf32> to vector<8x32xf32>
    %243 = arith.mulf %241, %242 : vector<8x32xf32>
    %244 = vector.broadcast %224 : vector<1x32xf32> to vector<8x32xf32>
    %245 = arith.addf %243, %244 : vector<8x32xf32>
    %c0_93 = arith.constant 0 : index
    %c0_94 = arith.constant 0 : index
    %246 = vector.load %arg18[%c0_93, %c0_94] : memref<32x128xbf16, #tpu.memory_space<vmem>>, vector<32x128xbf16>
    %c0_95 = arith.constant 0 : index
    %c0_96 = arith.constant 0 : index
    %247 = vector.load %arg19[%c0_95, %c0_96] : memref<1x128xf32, #tpu.memory_space<vmem>>, vector<1x128xf32>
    %c0_97 = arith.constant 0 : index
    %c0_98 = arith.constant 0 : index
    %248 = vector.load %arg20[%c0_97, %c0_98] : memref<128x32xbf16, #tpu.memory_space<vmem>>, vector<128x32xbf16>
    %c0_99 = arith.constant 0 : index
    %c0_100 = arith.constant 0 : index
    %249 = vector.load %arg21[%c0_99, %c0_100] : memref<1x32xf32, #tpu.memory_space<vmem>>, vector<1x32xf32>
    %250 = arith.truncf %245 : vector<8x32xf32> to vector<8x32xbf16>
    %cst_101 = arith.constant dense<0.000000e+00> : vector<8x128xf32>
    %251 = tpu.matmul %250, %246, %cst_101 {dimension_numbers = #tpu.dot_dimension_numbers<[1], [0], [0], [1], [0, 0, 1, 1], [], []>} : vector<8x32xbf16>, vector<32x128xbf16>, vector<8x128xf32> -> vector<8x128xf32>
    %252 = vector.broadcast %247 : vector<1x128xf32> to vector<8x128xf32>
    %253 = arith.addf %251, %252 : vector<8x128xf32>
    %cst_102 = arith.constant 0.000000e+00 : f32
    %254 = vector.broadcast %cst_102 : f32 to vector<8x128xf32>
    %255 = arith.maximumf %253, %254 : vector<8x128xf32>
    %256 = arith.truncf %255 : vector<8x128xf32> to vector<8x128xbf16>
    %cst_103 = arith.constant dense<0.000000e+00> : vector<8x32xf32>
    %257 = tpu.matmul %256, %248, %cst_103 {dimension_numbers = #tpu.dot_dimension_numbers<[1], [0], [0], [1], [0, 0, 1, 1], [], []>} : vector<8x128xbf16>, vector<128x32xbf16>, vector<8x32xf32> -> vector<8x32xf32>
    %258 = vector.broadcast %249 : vector<1x32xf32> to vector<8x32xf32>
    %259 = arith.addf %257, %258 : vector<8x32xf32>
    %c0_104 = arith.constant 0 : index
    %c0_105 = arith.constant 0 : index
    %260 = vector.load %arg22[%c0_104, %c0_105] : memref<1x32xf32, #tpu.memory_space<vmem>>, vector<1x32xf32>
    %c0_106 = arith.constant 0 : index
    %c0_107 = arith.constant 0 : index
    %261 = vector.load %arg23[%c0_106, %c0_107] : memref<1x32xf32, #tpu.memory_space<vmem>>, vector<1x32xf32>
    %262 = arith.addf %259, %245 : vector<8x32xf32>
    %cst_108 = arith.constant dense<0.000000e+00> : vector<8xf32>
    %263 = vector.multi_reduction <add>, %262, %cst_108 [1] : vector<8x32xf32> to vector<8xf32>
    %264 = vector.shape_cast %263 : vector<8xf32> to vector<8x1xf32>
    %cst_109 = arith.constant 3.200000e+01 : f32
    %265 = vector.broadcast %cst_109 : f32 to vector<8x1xf32>
    %266 = arith.divf %264, %265 : vector<8x1xf32>
    %267 = vector.broadcast %266 : vector<8x1xf32> to vector<8x32xf32>
    %268 = arith.subf %262, %267 : vector<8x32xf32>
    %269 = arith.mulf %268, %268 : vector<8x32xf32>
    %cst_110 = arith.constant dense<0.000000e+00> : vector<8xf32>
    %270 = vector.multi_reduction <add>, %269, %cst_110 [1] : vector<8x32xf32> to vector<8xf32>
    %271 = vector.shape_cast %270 : vector<8xf32> to vector<8x1xf32>
    %cst_111 = arith.constant 3.200000e+01 : f32
    %272 = vector.broadcast %cst_111 : f32 to vector<8x1xf32>
    %273 = arith.divf %271, %272 : vector<8x1xf32>
    %cst_112 = arith.constant 9.99999974E-6 : f32
    %274 = vector.broadcast %cst_112 : f32 to vector<8x1xf32>
    %275 = arith.addf %273, %274 : vector<8x1xf32>
    %276 = math.rsqrt %275 : vector<8x1xf32>
    %277 = vector.broadcast %276 : vector<8x1xf32> to vector<8x32xf32>
    %278 = arith.mulf %268, %277 : vector<8x32xf32>
    %279 = vector.broadcast %260 : vector<1x32xf32> to vector<8x32xf32>
    %280 = arith.mulf %278, %279 : vector<8x32xf32>
    %281 = vector.broadcast %261 : vector<1x32xf32> to vector<8x32xf32>
    %282 = arith.addf %280, %281 : vector<8x32xf32>
    %c0_113 = arith.constant 0 : index
    %c0_114 = arith.constant 0 : index
    %c0_115 = arith.constant 0 : index
    %283 = vector.load %arg24[%c0_113, %c0_114, %c0_115] : memref<1x8x32xf32, #tpu.memory_space<vmem>>, vector<1x8x32xf32>
    %284 = vector.shape_cast %283 : vector<1x8x32xf32> to vector<8x32xf32>
    %285 = vector.shape_cast %282 : vector<8x32xf32> to vector<1x8x32xf32>
    tpu.vector_store %arg24[%c0_113, %c0_114, %c0_115], %285 {strides = array<i32>} : memref<1x8x32xf32, #tpu.memory_space<vmem>>, vector<1x8x32xf32>,
    return
  }
  func.func @transform_0(%arg0: i32) -> (i32, i32, i32) {
    %c0_i32 = arith.constant 0 : i32
    %c0_i32_0 = arith.constant 0 : i32
    %c0_i32_1 = arith.constant 0 : i32
    return %arg0, %c0_i32, %c0_i32_0 : i32, i32, i32
  }
  func.func @transform_1(%arg0: i32) -> (i32, i32, i32) {
    %c0_i32 = arith.constant 0 : i32
    %c0_i32_0 = arith.constant 0 : i32
    %c0_i32_1 = arith.constant 0 : i32
    return %arg0, %c0_i32, %c0_i32_0 : i32, i32, i32
  }
  func.func @transform_2(%arg0: i32) -> (i32, i32, i32) {
    %c0_i32 = arith.constant 0 : i32
    %c0_i32_0 = arith.constant 0 : i32
    %c0_i32_1 = arith.constant 0 : i32
    return %arg0, %c0_i32, %c0_i32_0 : i32, i32, i32
  }
  func.func @transform_3(%arg0: i32) -> (i32, i32) {
    %c0_i32 = arith.constant 0 : i32
    %c0_i32_0 = arith.constant 0 : i32
    %c0_i32_1 = arith.constant 0 : i32
    return %c0_i32, %c0_i32_0 : i32, i32
  }
  func.func @transform_4(%arg0: i32) -> (i32, i32) {
    %c0_i32 = arith.constant 0 : i32
    %c0_i32_0 = arith.constant 0 : i32
    %c0_i32_1 = arith.constant 0 : i32
    return %c0_i32, %c0_i32_0 : i32, i32
  }
  func.func @transform_5(%arg0: i32) -> (i32, i32) {
    %c0_i32 = arith.constant 0 : i32
    %c0_i32_0 = arith.constant 0 : i32
    %c0_i32_1 = arith.constant 0 : i32
    return %c0_i32, %c0_i32_0 : i32, i32
  }
  func.func @transform_6(%arg0: i32) -> (i32, i32) {
    %c0_i32 = arith.constant 0 : i32
    %c0_i32_0 = arith.constant 0 : i32
    %c0_i32_1 = arith.constant 0 : i32
    return %c0_i32, %c0_i32_0 : i32, i32
  }
  func.func @transform_7(%arg0: i32) -> (i32, i32) {
    %c0_i32 = arith.constant 0 : i32
    %c0_i32_0 = arith.constant 0 : i32
    %c0_i32_1 = arith.constant 0 : i32
    return %c0_i32, %c0_i32_0 : i32, i32
  }
  func.func @transform_8(%arg0: i32) -> (i32, i32) {
    %c0_i32 = arith.constant 0 : i32
    %c0_i32_0 = arith.constant 0 : i32
    %c0_i32_1 = arith.constant 0 : i32
    return %c0_i32, %c0_i32_0 : i32, i32
  }
  func.func @transform_9(%arg0: i32) -> (i32, i32) {
    %c0_i32 = arith.constant 0 : i32
    %c0_i32_0 = arith.constant 0 : i32
    %c0_i32_1 = arith.constant 0 : i32
    return %c0_i32, %c0_i32_0 : i32, i32
  }
  func.func @transform_10(%arg0: i32) -> (i32, i32) {
    %c0_i32 = arith.constant 0 : i32
    %c0_i32_0 = arith.constant 0 : i32
    %c0_i32_1 = arith.constant 0 : i32
    return %c0_i32, %c0_i32_0 : i32, i32
  }
  func.func @transform_11(%arg0: i32) -> (i32, i32) {
    %c0_i32 = arith.constant 0 : i32
    %c0_i32_0 = arith.constant 0 : i32
    %c0_i32_1 = arith.constant 0 : i32
    return %c0_i32, %c0_i32_0 : i32, i32
  }
  func.func @transform_12(%arg0: i32) -> (i32, i32) {
    %c0_i32 = arith.constant 0 : i32
    %c0_i32_0 = arith.constant 0 : i32
    %c0_i32_1 = arith.constant 0 : i32
    return %c0_i32, %c0_i32_0 : i32, i32
  }
  func.func @transform_13(%arg0: i32) -> (i32, i32) {
    %c0_i32 = arith.constant 0 : i32
    %c0_i32_0 = arith.constant 0 : i32
    %c0_i32_1 = arith.constant 0 : i32
    return %c0_i32, %c0_i32_0 : i32, i32
  }
  func.func @transform_14(%arg0: i32) -> (i32, i32) {
    %c0_i32 = arith.constant 0 : i32
    %c0_i32_0 = arith.constant 0 : i32
    %c0_i32_1 = arith.constant 0 : i32
    return %c0_i32, %c0_i32_0 : i32, i32
  }
  func.func @transform_15(%arg0: i32) -> (i32, i32) {
    %c0_i32 = arith.constant 0 : i32
    %c0_i32_0 = arith.constant 0 : i32
    %c0_i32_1 = arith.constant 0 : i32
    return %c0_i32, %c0_i32_0 : i32, i32
  }
  func.func @transform_16(%arg0: i32) -> (i32, i32) {
    %c0_i32 = arith.constant 0 : i32
    %c0_i32_0 = arith.constant 0 : i32
    %c0_i32_1 = arith.constant 0 : i32
    return %c0_i32, %c0_i32_0 : i32, i32
  }
  func.func @transform_17(%arg0: i32) -> (i32, i32) {
    %c0_i32 = arith.constant 0 : i32
    %c0_i32_0 = arith.constant 0 : i32
    %c0_i32_1 = arith.constant 0 : i32
    return %c0_i32, %c0_i32_0 : i32, i32
  }
  func.func @transform_18(%arg0: i32) -> (i32, i32) {
    %c0_i32 = arith.constant 0 : i32
    %c0_i32_0 = arith.constant 0 : i32
    %c0_i32_1 = arith.constant 0 : i32
    return %c0_i32, %c0_i32_0 : i32, i32
  }
  func.func @transform_19(%arg0: i32) -> (i32, i32) {
    %c0_i32 = arith.constant 0 : i32
    %c0_i32_0 = arith.constant 0 : i32
    %c0_i32_1 = arith.constant 0 : i32
    return %c0_i32, %c0_i32_0 : i32, i32
  }
  func.func @transform_20(%arg0: i32) -> (i32, i32) {
    %c0_i32 = arith.constant 0 : i32
    %c0_i32_0 = arith.constant 0 : i32
    %c0_i32_1 = arith.constant 0 : i32
    return %c0_i32, %c0_i32_0 : i32, i32
  }
  func.func @transform_21(%arg0: i32) -> (i32, i32) {
    %c0_i32 = arith.constant 0 : i32
    %c0_i32_0 = arith.constant 0 : i32
    %c0_i32_1 = arith.constant 0 : i32
    return %c0_i32, %c0_i32_0 : i32, i32
  }
  func.func @transform_22(%arg0: i32) -> (i32, i32) {
    %c0_i32 = arith.constant 0 : i32
    %c0_i32_0 = arith.constant 0 : i32
    %c0_i32_1 = arith.constant 0 : i32
    return %c0_i32, %c0_i32_0 : i32, i32
  }
  func.func @transform_23(%arg0: i32) -> (i32, i32, i32) {
    %c0_i32 = arith.constant 0 : i32
    %c0_i32_0 = arith.constant 0 : i32
    %c0_i32_1 = arith.constant 0 : i32
    return %arg0, %c0_i32, %c0_i32_0 : i32, i32, i32
  }
}

module attributes {stable_mosaic.version = 11 : i64} {
  func.func @_decoder_block_kernel(%arg0: i32, %arg1: memref<1x8x32xf32, #tpu.memory_space<vmem>>, %arg2: memref<1x8x32xf32, #tpu.memory_space<vmem>>, %arg3: memref<1x8x32xf32, #tpu.memory_space<vmem>>, %arg4: memref<32x32xbf16, #tpu.memory_space<vmem>>, %arg5: memref<32x32xbf16, #tpu.memory_space<vmem>>, %arg6: memref<32x32xbf16, #tpu.memory_space<vmem>>, %arg7: memref<32x32xbf16, #tpu.memory_space<vmem>>, %arg8: memref<1x32xf32, #tpu.memory_space<vmem>>, %arg9: memref<1x32xf32, #tpu.memory_space<vmem>>, %arg10: memref<1x32xf32, #tpu.memory_space<vmem>>, %arg11: memref<32x32xbf16, #tpu.memory_space<vmem>>, %arg12: memref<32x32xbf16, #tpu.memory_space<vmem>>, %arg13: memref<32x32xbf16, #tpu.memory_space<vmem>>, %arg14: memref<32x32xbf16, #tpu.memory_space<vmem>>, %arg15: memref<1x32xf32, #tpu.memory_space<vmem>>, %arg16: memref<1x32xf32, #tpu.memory_space<vmem>>, %arg17: memref<1x32xf32, #tpu.memory_space<vmem>>, %arg18: memref<32x128xbf16, #tpu.memory_space<vmem>>, %arg19: memref<1x128xf32, #tpu.memory_space<vmem>>, %arg20: memref<128x32xbf16, #tpu.memory_space<vmem>>, %arg21: memref<1x32xf32, #tpu.memory_space<vmem>>, %arg22: memref<1x32xf32, #tpu.memory_space<vmem>>, %arg23: memref<1x32xf32, #tpu.memory_space<vmem>>, %arg24: memref<1x8x32xf32, #tpu.memory_space<vmem>>) attributes {dimension_semantics = [#tpu.dimension_semantics<parallel>], iteration_bounds = array<i64: 2>, scalar_prefetch = 0 : i64, scratch_operands = 0 : i64, tpu.core_type = #tpu.core_type<tc>, window_params = [{transform_indices = @transform_0, window_bounds = array<i64: 1, 8, 32>}, {transform_indices = @transform_1, window_bounds = array<i64: 1, 8, 32>}, {transform_indices = @transform_2, window_bounds = array<i64: 1, 8, 32>}, {pipeline_mode = #tpu.pipeline_mode<synchronous>, transform_indices = @transform_3, window_bounds = array<i64: 32, 32>}, {pipeline_mode = #tpu.pipeline_mode<synchronous>, transform_indices = @transform_4, window_bounds = array<i64: 32, 32>}, {pipeline_mode = #tpu.pipeline_mode<synchronous>, transform_indices = @transform_5, window_bounds = array<i64: 32, 32>}, {pipeline_mode = #tpu.pipeline_mode<synchronous>, transform_indices = @transform_6, window_bounds = array<i64: 32, 32>}, {pipeline_mode = #tpu.pipeline_mode<synchronous>, transform_indices = @transform_7, window_bounds = array<i64: 1, 32>}, {pipeline_mode = #tpu.pipeline_mode<synchronous>, transform_indices = @transform_8, window_bounds = array<i64: 1, 32>}, {pipeline_mode = #tpu.pipeline_mode<synchronous>, transform_indices = @transform_9, window_bounds = array<i64: 1, 32>}, {pipeline_mode = #tpu.pipeline_mode<synchronous>, transform_indices = @transform_10, window_bounds = array<i64: 32, 32>}, {pipeline_mode = #tpu.pipeline_mode<synchronous>, transform_indices = @transform_11, window_bounds = array<i64: 32, 32>}, {pipeline_mode = #tpu.pipeline_mode<synchronous>, transform_indices = @transform_12, window_bounds = array<i64: 32, 32>}, {pipeline_mode = #tpu.pipeline_mode<synchronous>, transform_indices = @transform_13, window_bounds = array<i64: 32, 32>}, {pipeline_mode = #tpu.pipeline_mode<synchronous>, transform_indices = @transform_14, window_bounds = array<i64: 1, 32>}, {pipeline_mode = #tpu.pipeline_mode<synchronous>, transform_indices = @transform_15, window_bounds = array<i64: 1, 32>}, {pipeline_mode = #tpu.pipeline_mode<synchronous>, transform_indices = @transform_16, window_bounds = array<i64: 1, 32>}, {pipeline_mode = #tpu.pipeline_mode<synchronous>, transform_indices = @transform_17, window_bounds = array<i64: 32, 128>}, {pipeline_mode = #tpu.pipeline_mode<synchronous>, transform_indices = @transform_18, window_bounds = array<i64: 1, 128>}, {pipeline_mode = #tpu.pipeline_mode<synchronous>, transform_indices = @transform_19, window_bounds = array<i64: 128, 32>}, {pipeline_mode = #tpu.pipeline_mode<synchronous>, transform_indices = @transform_20, window_bounds = array<i64: 1, 32>}, {pipeline_mode = #tpu.pipeline_mode<synchronous>, transform_indices = @transform_21, window_bounds = array<i64: 1, 32>}, {pipeline_mode = #tpu.pipeline_mode<synchronous>, transform_indices = @transform_22, window_bounds = array<i64: 1, 32>}, {transform_indices = @transform_23, window_bounds = array<i64: 1, 8, 32>}]} {
    %c0 = arith.constant 0 : index
    %c0_0 = arith.constant 0 : index
    %c0_1 = arith.constant 0 : index
    %0 = vector.load %arg1[%c0, %c0_0, %c0_1] : memref<1x8x32xf32, #tpu.memory_space<vmem>>, vector<1x8x32xf32>
    %1 = vector.shape_cast %0 : vector<1x8x32xf32> to vector<8x32xf32>
    %c0_2 = arith.constant 0 : index
    %c0_3 = arith.constant 0 : index
    %c0_4 = arith.constant 0 : index
    %2 = vector.load %arg2[%c0_2, %c0_3, %c0_4] : memref<1x8x32xf32, #tpu.memory_space<vmem>>, vector<1x8x32xf32>
    %3 = vector.shape_cast %2 : vector<1x8x32xf32> to vector<8x32xf32>
    %c0_5 = arith.constant 0 : index
    %c0_6 = arith.constant 0 : index
    %c0_7 = arith.constant 0 : index
    %4 = vector.load %arg3[%c0_5, %c0_6, %c0_7] : memref<1x8x32xf32, #tpu.memory_space<vmem>>, vector<1x8x32xf32>
    %5 = vector.shape_cast %4 : vector<1x8x32xf32> to vector<8x32xf32>
    %c0_8 = arith.constant 0 : index
    %c0_9 = arith.constant 0 : index
    %6 = vector.load %arg4[%c0_8, %c0_9] : memref<32x32xbf16, #tpu.memory_space<vmem>>, vector<32x32xbf16>
    %c0_10 = arith.constant 0 : index
    %c0_11 = arith.constant 0 : index
    %7 = vector.load %arg5[%c0_10, %c0_11] : memref<32x32xbf16, #tpu.memory_space<vmem>>, vector<32x32xbf16>
    %c0_12 = arith.constant 0 : index
    %c0_13 = arith.constant 0 : index
    %8 = vector.load %arg6[%c0_12, %c0_13] : memref<32x32xbf16, #tpu.memory_space<vmem>>, vector<32x32xbf16>
    %c0_14 = arith.constant 0 : index
    %c0_15 = arith.constant 0 : index
    %9 = vector.load %arg7[%c0_14, %c0_15] : memref<32x32xbf16, #tpu.memory_space<vmem>>, vector<32x32xbf16>
    %c0_16 = arith.constant 0 : index
    %c0_17 = arith.constant 0 : index
    %10 = vector.load %arg8[%c0_16, %c0_17] : memref<1x32xf32, #tpu.memory_space<vmem>>, vector<1x32xf32>
    %11 = arith.truncf %5 : vector<8x32xf32> to vector<8x32xbf16>
    %cst = arith.constant dense<0.000000e+00> : vector<8x32xf32>
    %12 = tpu.matmul %11, %6, %cst {dimension_numbers = #tpu.dot_dimension_numbers<[1], [0], [0], [1], [0, 0, 1, 1], [], []>} : vector<8x32xbf16>, vector<32x32xbf16>, vector<8x32xf32> -> vector<8x32xf32>
    %13 = arith.truncf %5 : vector<8x32xf32> to vector<8x32xbf16>
    %cst_18 = arith.constant dense<0.000000e+00> : vector<8x32xf32>
    %14 = tpu.matmul %13, %7, %cst_18 {dimension_numbers = #tpu.dot_dimension_numbers<[1], [0], [0], [1], [0, 0, 1, 1], [], []>} : vector<8x32xbf16>, vector<32x32xbf16>, vector<8x32xf32> -> vector<8x32xf32>
    %15 = arith.truncf %5 : vector<8x32xf32> to vector<8x32xbf16>
    %cst_19 = arith.constant dense<0.000000e+00> : vector<8x32xf32>
    %16 = tpu.matmul %15, %8, %cst_19 {dimension_numbers = #tpu.dot_dimension_numbers<[1], [0], [0], [1], [0, 0, 1, 1], [], []>} : vector<8x32xbf16>, vector<32x32xbf16>, vector<8x32xf32> -> vector<8x32xf32>
    %17 = arith.truncf %12 : vector<8x32xf32> to vector<8x32xbf16>
    %18 = arith.truncf %14 : vector<8x32xf32> to vector<8x32xbf16>
    %19 = arith.truncf %16 : vector<8x32xf32> to vector<8x32xbf16>
    %cst_20 = arith.constant 0.000000e+00 : f32
    %20 = vector.broadcast %cst_20 : f32 to vector<8x32xf32>
    %21 = vector.extract_strided_slice %18 {offsets = [0, 0], sizes = [8, 8], strides = [1, 1]} : vector<8x32xbf16> to vector<8x8xbf16>
    %22 = vector.extract_strided_slice %17 {offsets = [0, 0], sizes = [8, 8], strides = [1, 1]} : vector<8x32xbf16> to vector<8x8xbf16>
    "tpu.trace_start"() <{level = 10 : i32, message = "qd,kd->qk"}> : () -> ()
    %cst_21 = arith.constant dense<0.000000e+00> : vector<8x8xf32>
    %23 = tpu.matmul %21, %22, %cst_21 {dimension_numbers = #tpu.dot_dimension_numbers<[1], [1], [0], [0], [0, 0, 1, 0], [], []>} : vector<8x8xbf16>, vector<8x8xbf16>, vector<8x8xf32> -> vector<8x8xf32>
    "tpu.trace_stop"() : () -> ()
    %cst_22 = arith.constant dense<0xFF800000> : vector<8xf32>
    %24 = vector.multi_reduction <maximumf>, %23, %cst_22 [1] : vector<8x8xf32> to vector<8xf32>
    %25 = vector.shape_cast %24 : vector<8xf32> to vector<8x1xf32>
    %26 = vector.broadcast %25 : vector<8x1xf32> to vector<8x8xf32>
    %27 = arith.subf %23, %26 : vector<8x8xf32>
    %28 = math.exp %27 : vector<8x8xf32>
    %cst_23 = arith.constant dense<0.000000e+00> : vector<8xf32>
    %29 = vector.multi_reduction <add>, %28, %cst_23 [1] : vector<8x8xf32> to vector<8xf32>
    %30 = vector.shape_cast %29 : vector<8xf32> to vector<8x1xf32>
    %31 = tpu.reciprocal %30 {approx = true} : vector<8x1xf32> -> vector<8x1xf32>
    %32 = vector.broadcast %31 : vector<8x1xf32> to vector<8x8xf32>
    %33 = arith.mulf %28, %32 : vector<8x8xf32>
    %34 = arith.truncf %33 : vector<8x8xf32> to vector<8x8xbf16>
    %35 = vector.extract_strided_slice %19 {offsets = [0, 0], sizes = [8, 8], strides = [1, 1]} : vector<8x32xbf16> to vector<8x8xbf16>
    %cst_24 = arith.constant dense<0.000000e+00> : vector<8x8xf32>
    %36 = tpu.matmul %34, %35, %cst_24 {dimension_numbers = #tpu.dot_dimension_numbers<[1], [0], [0], [1], [0, 0, 1, 1], [], []>} : vector<8x8xbf16>, vector<8x8xbf16>, vector<8x8xf32> -> vector<8x8xf32>
    %37 = arith.truncf %36 : vector<8x8xf32> to vector<8x8xbf16>
    %38 = vector.extract_strided_slice %9 {offsets = [0, 0], sizes = [8, 32], strides = [1, 1]} : vector<32x32xbf16> to vector<8x32xbf16>
    %cst_25 = arith.constant dense<0.000000e+00> : vector<8x32xf32>
    %39 = tpu.matmul %37, %38, %cst_25 {dimension_numbers = #tpu.dot_dimension_numbers<[1], [0], [0], [1], [0, 0, 1, 1], [], []>} : vector<8x8xbf16>, vector<8x32xbf16>, vector<8x32xf32> -> vector<8x32xf32>
    %40 = arith.addf %20, %39 : vector<8x32xf32>
    %41 = vector.extract_strided_slice %18 {offsets = [0, 8], sizes = [8, 8], strides = [1, 1]} : vector<8x32xbf16> to vector<8x8xbf16>
    %42 = vector.extract_strided_slice %17 {offsets = [0, 8], sizes = [8, 8], strides = [1, 1]} : vector<8x32xbf16> to vector<8x8xbf16>
    "tpu.trace_start"() <{level = 10 : i32, message = "qd,kd->qk"}> : () -> ()
    %cst_26 = arith.constant dense<0.000000e+00> : vector<8x8xf32>
    %43 = tpu.matmul %41, %42, %cst_26 {dimension_numbers = #tpu.dot_dimension_numbers<[1], [1], [0], [0], [0, 0, 1, 0], [], []>} : vector<8x8xbf16>, vector<8x8xbf16>, vector<8x8xf32> -> vector<8x8xf32>
    "tpu.trace_stop"() : () -> ()
    %cst_27 = arith.constant dense<0xFF800000> : vector<8xf32>
    %44 = vector.multi_reduction <maximumf>, %43, %cst_27 [1] : vector<8x8xf32> to vector<8xf32>
    %45 = vector.shape_cast %44 : vector<8xf32> to vector<8x1xf32>
    %46 = vector.broadcast %45 : vector<8x1xf32> to vector<8x8xf32>
    %47 = arith.subf %43, %46 : vector<8x8xf32>
    %48 = math.exp %47 : vector<8x8xf32>
    %cst_28 = arith.constant dense<0.000000e+00> : vector<8xf32>
    %49 = vector.multi_reduction <add>, %48, %cst_28 [1] : vector<8x8xf32> to vector<8xf32>
    %50 = vector.shape_cast %49 : vector<8xf32> to vector<8x1xf32>
    %51 = tpu.reciprocal %50 {approx = true} : vector<8x1xf32> -> vector<8x1xf32>
    %52 = vector.broadcast %51 : vector<8x1xf32> to vector<8x8xf32>
    %53 = arith.mulf %48, %52 : vector<8x8xf32>
    %54 = arith.truncf %53 : vector<8x8xf32> to vector<8x8xbf16>
    %55 = vector.extract_strided_slice %19 {offsets = [0, 8], sizes = [8, 8], strides = [1, 1]} : vector<8x32xbf16> to vector<8x8xbf16>
    %cst_29 = arith.constant dense<0.000000e+00> : vector<8x8xf32>
    %56 = tpu.matmul %54, %55, %cst_29 {dimension_numbers = #tpu.dot_dimension_numbers<[1], [0], [0], [1], [0, 0, 1, 1], [], []>} : vector<8x8xbf16>, vector<8x8xbf16>, vector<8x8xf32> -> vector<8x8xf32>
    %57 = arith.truncf %56 : vector<8x8xf32> to vector<8x8xbf16>
    %58 = vector.extract_strided_slice %9 {offsets = [8, 0], sizes = [8, 32], strides = [1, 1]} : vector<32x32xbf16> to vector<8x32xbf16>
    %cst_30 = arith.constant dense<0.000000e+00> : vector<8x32xf32>
    %59 = tpu.matmul %57, %58, %cst_30 {dimension_numbers = #tpu.dot_dimension_numbers<[1], [0], [0], [1], [0, 0, 1, 1], [], []>} : vector<8x8xbf16>, vector<8x32xbf16>, vector<8x32xf32> -> vector<8x32xf32>
    %60 = arith.addf %40, %59 : vector<8x32xf32>
    %61 = vector.extract_strided_slice %18 {offsets = [0, 16], sizes = [8, 8], strides = [1, 1]} : vector<8x32xbf16> to vector<8x8xbf16>
    %62 = vector.extract_strided_slice %17 {offsets = [0, 16], sizes = [8, 8], strides = [1, 1]} : vector<8x32xbf16> to vector<8x8xbf16>
    "tpu.trace_start"() <{level = 10 : i32, message = "qd,kd->qk"}> : () -> ()
    %cst_31 = arith.constant dense<0.000000e+00> : vector<8x8xf32>
    %63 = tpu.matmul %61, %62, %cst_31 {dimension_numbers = #tpu.dot_dimension_numbers<[1], [1], [0], [0], [0, 0, 1, 0], [], []>} : vector<8x8xbf16>, vector<8x8xbf16>, vector<8x8xf32> -> vector<8x8xf32>
    "tpu.trace_stop"() : () -> ()
    %cst_32 = arith.constant dense<0xFF800000> : vector<8xf32>
    %64 = vector.multi_reduction <maximumf>, %63, %cst_32 [1] : vector<8x8xf32> to vector<8xf32>
    %65 = vector.shape_cast %64 : vector<8xf32> to vector<8x1xf32>
    %66 = vector.broadcast %65 : vector<8x1xf32> to vector<8x8xf32>
    %67 = arith.subf %63, %66 : vector<8x8xf32>
    %68 = math.exp %67 : vector<8x8xf32>
    %cst_33 = arith.constant dense<0.000000e+00> : vector<8xf32>
    %69 = vector.multi_reduction <add>, %68, %cst_33 [1] : vector<8x8xf32> to vector<8xf32>
    %70 = vector.shape_cast %69 : vector<8xf32> to vector<8x1xf32>
    %71 = tpu.reciprocal %70 {approx = true} : vector<8x1xf32> -> vector<8x1xf32>
    %72 = vector.broadcast %71 : vector<8x1xf32> to vector<8x8xf32>
    %73 = arith.mulf %68, %72 : vector<8x8xf32>
    %74 = arith.truncf %73 : vector<8x8xf32> to vector<8x8xbf16>
    %75 = vector.extract_strided_slice %19 {offsets = [0, 16], sizes = [8, 8], strides = [1, 1]} : vector<8x32xbf16> to vector<8x8xbf16>
    %cst_34 = arith.constant dense<0.000000e+00> : vector<8x8xf32>
    %76 = tpu.matmul %74, %75, %cst_34 {dimension_numbers = #tpu.dot_dimension_numbers<[1], [0], [0], [1], [0, 0, 1, 1], [], []>} : vector<8x8xbf16>, vector<8x8xbf16>, vector<8x8xf32> -> vector<8x8xf32>
    %77 = arith.truncf %76 : vector<8x8xf32> to vector<8x8xbf16>
    %78 = vector.extract_strided_slice %9 {offsets = [16, 0], sizes = [8, 32], strides = [1, 1]} : vector<32x32xbf16> to vector<8x32xbf16>
    %cst_35 = arith.constant dense<0.000000e+00> : vector<8x32xf32>
    %79 = tpu.matmul %77, %78, %cst_35 {dimension_numbers = #tpu.dot_dimension_numbers<[1], [0], [0], [1], [0, 0, 1, 1], [], []>} : vector<8x8xbf16>, vector<8x32xbf16>, vector<8x32xf32> -> vector<8x32xf32>
    %80 = arith.addf %60, %79 : vector<8x32xf32>
    %81 = vector.extract_strided_slice %18 {offsets = [0, 24], sizes = [8, 8], strides = [1, 1]} : vector<8x32xbf16> to vector<8x8xbf16>
    %82 = vector.extract_strided_slice %17 {offsets = [0, 24], sizes = [8, 8], strides = [1, 1]} : vector<8x32xbf16> to vector<8x8xbf16>
    "tpu.trace_start"() <{level = 10 : i32, message = "qd,kd->qk"}> : () -> ()
    %cst_36 = arith.constant dense<0.000000e+00> : vector<8x8xf32>
    %83 = tpu.matmul %81, %82, %cst_36 {dimension_numbers = #tpu.dot_dimension_numbers<[1], [1], [0], [0], [0, 0, 1, 0], [], []>} : vector<8x8xbf16>, vector<8x8xbf16>, vector<8x8xf32> -> vector<8x8xf32>
    "tpu.trace_stop"() : () -> ()
    %cst_37 = arith.constant dense<0xFF800000> : vector<8xf32>
    %84 = vector.multi_reduction <maximumf>, %83, %cst_37 [1] : vector<8x8xf32> to vector<8xf32>
    %85 = vector.shape_cast %84 : vector<8xf32> to vector<8x1xf32>
    %86 = vector.broadcast %85 : vector<8x1xf32> to vector<8x8xf32>
    %87 = arith.subf %83, %86 : vector<8x8xf32>
    %88 = math.exp %87 : vector<8x8xf32>
    %cst_38 = arith.constant dense<0.000000e+00> : vector<8xf32>
    %89 = vector.multi_reduction <add>, %88, %cst_38 [1] : vector<8x8xf32> to vector<8xf32>
    %90 = vector.shape_cast %89 : vector<8xf32> to vector<8x1xf32>
    %91 = tpu.reciprocal %90 {approx = true} : vector<8x1xf32> -> vector<8x1xf32>
    %92 = vector.broadcast %91 : vector<8x1xf32> to vector<8x8xf32>
    %93 = arith.mulf %88, %92 : vector<8x8xf32>
    %94 = arith.truncf %93 : vector<8x8xf32> to vector<8x8xbf16>
    %95 = vector.extract_strided_slice %19 {offsets = [0, 24], sizes = [8, 8], strides = [1, 1]} : vector<8x32xbf16> to vector<8x8xbf16>
    %cst_39 = arith.constant dense<0.000000e+00> : vector<8x8xf32>
    %96 = tpu.matmul %94, %95, %cst_39 {dimension_numbers = #tpu.dot_dimension_numbers<[1], [0], [0], [1], [0, 0, 1, 1], [], []>} : vector<8x8xbf16>, vector<8x8xbf16>, vector<8x8xf32> -> vector<8x8xf32>
    %97 = arith.truncf %96 : vector<8x8xf32> to vector<8x8xbf16>
    %98 = vector.extract_strided_slice %9 {offsets = [24, 0], sizes = [8, 32], strides = [1, 1]} : vector<32x32xbf16> to vector<8x32xbf16>
    %cst_40 = arith.constant dense<0.000000e+00> : vector<8x32xf32>
    %99 = tpu.matmul %97, %98, %cst_40 {dimension_numbers = #tpu.dot_dimension_numbers<[1], [0], [0], [1], [0, 0, 1, 1], [], []>} : vector<8x8xbf16>, vector<8x32xbf16>, vector<8x32xf32> -> vector<8x32xf32>
    %100 = arith.addf %80, %99 : vector<8x32xf32>
    %101 = vector.broadcast %10 : vector<1x32xf32> to vector<8x32xf32>
    %102 = arith.addf %100, %101 : vector<8x32xf32>
    %c0_41 = arith.constant 0 : index
    %c0_42 = arith.constant 0 : index
    %103 = vector.load %arg9[%c0_41, %c0_42] : memref<1x32xf32, #tpu.memory_space<vmem>>, vector<1x32xf32>
    %c0_43 = arith.constant 0 : index
    %c0_44 = arith.constant 0 : index
    %104 = vector.load %arg10[%c0_43, %c0_44] : memref<1x32xf32, #tpu.memory_space<vmem>>, vector<1x32xf32>
    %105 = arith.addf %102, %5 : vector<8x32xf32>
    %cst_45 = arith.constant dense<0.000000e+00> : vector<8xf32>
    %106 = vector.multi_reduction <add>, %105, %cst_45 [1] : vector<8x32xf32> to vector<8xf32>
    %107 = vector.shape_cast %106 : vector<8xf32> to vector<8x1xf32>
    %cst_46 = arith.constant 3.200000e+01 : f32
    %108 = vector.broadcast %cst_46 : f32 to vector<8x1xf32>
    %109 = arith.divf %107, %108 : vector<8x1xf32>
    %110 = vector.broadcast %109 : vector<8x1xf32> to vector<8x32xf32>
    %111 = arith.subf %105, %110 : vector<8x32xf32>
    %112 = arith.mulf %111, %111 : vector<8x32xf32>
    %cst_47 = arith.constant dense<0.000000e+00> : vector<8xf32>
    %113 = vector.multi_reduction <add>, %112, %cst_47 [1] : vector<8x32xf32> to vector<8xf32>
    %114 = vector.shape_cast %113 : vector<8xf32> to vector<8x1xf32>
    %cst_48 = arith.constant 3.200000e+01 : f32
    %115 = vector.broadcast %cst_48 : f32 to vector<8x1xf32>
    %116 = arith.divf %114, %115 : vector<8x1xf32>
    %cst_49 = arith.constant 9.99999974E-6 : f32
    %117 = vector.broadcast %cst_49 : f32 to vector<8x1xf32>
    %118 = arith.addf %116, %117 : vector<8x1xf32>
    %119 = math.rsqrt %118 : vector<8x1xf32>
    %120 = vector.broadcast %119 : vector<8x1xf32> to vector<8x32xf32>
    %121 = arith.mulf %111, %120 : vector<8x32xf32>
    %122 = vector.broadcast %103 : vector<1x32xf32> to vector<8x32xf32>
    %123 = arith.mulf %121, %122 : vector<8x32xf32>
    %124 = vector.broadcast %104 : vector<1x32xf32> to vector<8x32xf32>
    %125 = arith.addf %123, %124 : vector<8x32xf32>
    %c0_50 = arith.constant 0 : index
    %c0_51 = arith.constant 0 : index
    %126 = vector.load %arg11[%c0_50, %c0_51] : memref<32x32xbf16, #tpu.memory_space<vmem>>, vector<32x32xbf16>
    %c0_52 = arith.constant 0 : index
    %c0_53 = arith.constant 0 : index
    %127 = vector.load %arg12[%c0_52, %c0_53] : memref<32x32xbf16, #tpu.memory_space<vmem>>, vector<32x32xbf16>
    %c0_54 = arith.constant 0 : index
    %c0_55 = arith.constant 0 : index
    %128 = vector.load %arg13[%c0_54, %c0_55] : memref<32x32xbf16, #tpu.memory_space<vmem>>, vector<32x32xbf16>
    %c0_56 = arith.constant 0 : index
    %c0_57 = arith.constant 0 : index
    %129 = vector.load %arg14[%c0_56, %c0_57] : memref<32x32xbf16, #tpu.memory_space<vmem>>, vector<32x32xbf16>
    %c0_58 = arith.constant 0 : index
    %c0_59 = arith.constant 0 : index
    %130 = vector.load %arg15[%c0_58, %c0_59] : memref<1x32xf32, #tpu.memory_space<vmem>>, vector<1x32xf32>
    %131 = arith.truncf %1 : vector<8x32xf32> to vector<8x32xbf16>
    %cst_60 = arith.constant dense<0.000000e+00> : vector<8x32xf32>
    %132 = tpu.matmul %131, %126, %cst_60 {dimension_numbers = #tpu.dot_dimension_numbers<[1], [0], [0], [1], [0, 0, 1, 1], [], []>} : vector<8x32xbf16>, vector<32x32xbf16>, vector<8x32xf32> -> vector<8x32xf32>
    %133 = arith.truncf %3 : vector<8x32xf32> to vector<8x32xbf16>
    %cst_61 = arith.constant dense<0.000000e+00> : vector<8x32xf32>
    %134 = tpu.matmul %133, %127, %cst_61 {dimension_numbers = #tpu.dot_dimension_numbers<[1], [0], [0], [1], [0, 0, 1, 1], [], []>} : vector<8x32xbf16>, vector<32x32xbf16>, vector<8x32xf32> -> vector<8x32xf32>
    %135 = arith.truncf %125 : vector<8x32xf32> to vector<8x32xbf16>
    %cst_62 = arith.constant dense<0.000000e+00> : vector<8x32xf32>
    %136 = tpu.matmul %135, %128, %cst_62 {dimension_numbers = #tpu.dot_dimension_numbers<[1], [0], [0], [1], [0, 0, 1, 1], [], []>} : vector<8x32xbf16>, vector<32x32xbf16>, vector<8x32xf32> -> vector<8x32xf32>
    %137 = arith.truncf %132 : vector<8x32xf32> to vector<8x32xbf16>
    %138 = arith.truncf %134 : vector<8x32xf32> to vector<8x32xbf16>
    %139 = arith.truncf %136 : vector<8x32xf32> to vector<8x32xbf16>
    %cst_63 = arith.constant 0.000000e+00 : f32
    %140 = vector.broadcast %cst_63 : f32 to vector<8x32xf32>
    %141 = vector.extract_strided_slice %138 {offsets = [0, 0], sizes = [8, 8], strides = [1, 1]} : vector<8x32xbf16> to vector<8x8xbf16>
    %142 = vector.extract_strided_slice %137 {offsets = [0, 0], sizes = [8, 8], strides = [1, 1]} : vector<8x32xbf16> to vector<8x8xbf16>
    "tpu.trace_start"() <{level = 10 : i32, message = "qd,kd->qk"}> : () -> ()
    %cst_64 = arith.constant dense<0.000000e+00> : vector<8x8xf32>
    %143 = tpu.matmul %141, %142, %cst_64 {dimension_numbers = #tpu.dot_dimension_numbers<[1], [1], [0], [0], [0, 0, 1, 0], [], []>} : vector<8x8xbf16>, vector<8x8xbf16>, vector<8x8xf32> -> vector<8x8xf32>
    "tpu.trace_stop"() : () -> ()
    %cst_65 = arith.constant dense<0xFF800000> : vector<8xf32>
    %144 = vector.multi_reduction <maximumf>, %143, %cst_65 [1] : vector<8x8xf32> to vector<8xf32>
    %145 = vector.shape_cast %144 : vector<8xf32> to vector<8x1xf32>
    %146 = vector.broadcast %145 : vector<8x1xf32> to vector<8x8xf32>
    %147 = arith.subf %143, %146 : vector<8x8xf32>
    %148 = math.exp %147 : vector<8x8xf32>
    %cst_66 = arith.constant dense<0.000000e+00> : vector<8xf32>
    %149 = vector.multi_reduction <add>, %148, %cst_66 [1] : vector<8x8xf32> to vector<8xf32>
    %150 = vector.shape_cast %149 : vector<8xf32> to vector<8x1xf32>
    %151 = tpu.reciprocal %150 {approx = true} : vector<8x1xf32> -> vector<8x1xf32>
    %152 = vector.broadcast %151 : vector<8x1xf32> to vector<8x8xf32>
    %153 = arith.mulf %148, %152 : vector<8x8xf32>
    %154 = arith.truncf %153 : vector<8x8xf32> to vector<8x8xbf16>
    %155 = vector.extract_strided_slice %139 {offsets = [0, 0], sizes = [8, 8], strides = [1, 1]} : vector<8x32xbf16> to vector<8x8xbf16>
    %cst_67 = arith.constant dense<0.000000e+00> : vector<8x8xf32>
    %156 = tpu.matmul %154, %155, %cst_67 {dimension_numbers = #tpu.dot_dimension_numbers<[1], [0], [0], [1], [0, 0, 1, 1], [], []>} : vector<8x8xbf16>, vector<8x8xbf16>, vector<8x8xf32> -> vector<8x8xf32>
    %157 = arith.truncf %156 : vector<8x8xf32> to vector<8x8xbf16>
    %158 = vector.extract_strided_slice %129 {offsets = [0, 0], sizes = [8, 32], strides = [1, 1]} : vector<32x32xbf16> to vector<8x32xbf16>
    %cst_68 = arith.constant dense<0.000000e+00> : vector<8x32xf32>
    %159 = tpu.matmul %157, %158, %cst_68 {dimension_numbers = #tpu.dot_dimension_numbers<[1], [0], [0], [1], [0, 0, 1, 1], [], []>} : vector<8x8xbf16>, vector<8x32xbf16>, vector<8x32xf32> -> vector<8x32xf32>
    %160 = arith.addf %140, %159 : vector<8x32xf32>
    %161 = vector.extract_strided_slice %138 {offsets = [0, 8], sizes = [8, 8], strides = [1, 1]} : vector<8x32xbf16> to vector<8x8xbf16>
    %162 = vector.extract_strided_slice %137 {offsets = [0, 8], sizes = [8, 8], strides = [1, 1]} : vector<8x32xbf16> to vector<8x8xbf16>
    "tpu.trace_start"() <{level = 10 : i32, message = "qd,kd->qk"}> : () -> ()
    %cst_69 = arith.constant dense<0.000000e+00> : vector<8x8xf32>
    %163 = tpu.matmul %161, %162, %cst_69 {dimension_numbers = #tpu.dot_dimension_numbers<[1], [1], [0], [0], [0, 0, 1, 0], [], []>} : vector<8x8xbf16>, vector<8x8xbf16>, vector<8x8xf32> -> vector<8x8xf32>
    "tpu.trace_stop"() : () -> ()
    %cst_70 = arith.constant dense<0xFF800000> : vector<8xf32>
    %164 = vector.multi_reduction <maximumf>, %163, %cst_70 [1] : vector<8x8xf32> to vector<8xf32>
    %165 = vector.shape_cast %164 : vector<8xf32> to vector<8x1xf32>
    %166 = vector.broadcast %165 : vector<8x1xf32> to vector<8x8xf32>
    %167 = arith.subf %163, %166 : vector<8x8xf32>
    %168 = math.exp %167 : vector<8x8xf32>
    %cst_71 = arith.constant dense<0.000000e+00> : vector<8xf32>
    %169 = vector.multi_reduction <add>, %168, %cst_71 [1] : vector<8x8xf32> to vector<8xf32>
    %170 = vector.shape_cast %169 : vector<8xf32> to vector<8x1xf32>
    %171 = tpu.reciprocal %170 {approx = true} : vector<8x1xf32> -> vector<8x1xf32>
    %172 = vector.broadcast %171 : vector<8x1xf32> to vector<8x8xf32>
    %173 = arith.mulf %168, %172 : vector<8x8xf32>
    %174 = arith.truncf %173 : vector<8x8xf32> to vector<8x8xbf16>
    %175 = vector.extract_strided_slice %139 {offsets = [0, 8], sizes = [8, 8], strides = [1, 1]} : vector<8x32xbf16> to vector<8x8xbf16>
    %cst_72 = arith.constant dense<0.000000e+00> : vector<8x8xf32>
    %176 = tpu.matmul %174, %175, %cst_72 {dimension_numbers = #tpu.dot_dimension_numbers<[1], [0], [0], [1], [0, 0, 1, 1], [], []>} : vector<8x8xbf16>, vector<8x8xbf16>, vector<8x8xf32> -> vector<8x8xf32>
    %177 = arith.truncf %176 : vector<8x8xf32> to vector<8x8xbf16>
    %178 = vector.extract_strided_slice %129 {offsets = [8, 0], sizes = [8, 32], strides = [1, 1]} : vector<32x32xbf16> to vector<8x32xbf16>
    %cst_73 = arith.constant dense<0.000000e+00> : vector<8x32xf32>
    %179 = tpu.matmul %177, %178, %cst_73 {dimension_numbers = #tpu.dot_dimension_numbers<[1], [0], [0], [1], [0, 0, 1, 1], [], []>} : vector<8x8xbf16>, vector<8x32xbf16>, vector<8x32xf32> -> vector<8x32xf32>
    %180 = arith.addf %160, %179 : vector<8x32xf32>
    %181 = vector.extract_strided_slice %138 {offsets = [0, 16], sizes = [8, 8], strides = [1, 1]} : vector<8x32xbf16> to vector<8x8xbf16>
    %182 = vector.extract_strided_slice %137 {offsets = [0, 16], sizes = [8, 8], strides = [1, 1]} : vector<8x32xbf16> to vector<8x8xbf16>
    "tpu.trace_start"() <{level = 10 : i32, message = "qd,kd->qk"}> : () -> ()
    %cst_74 = arith.constant dense<0.000000e+00> : vector<8x8xf32>
    %183 = tpu.matmul %181, %182, %cst_74 {dimension_numbers = #tpu.dot_dimension_numbers<[1], [1], [0], [0], [0, 0, 1, 0], [], []>} : vector<8x8xbf16>, vector<8x8xbf16>, vector<8x8xf32> -> vector<8x8xf32>
    "tpu.trace_stop"() : () -> ()
    %cst_75 = arith.constant dense<0xFF800000> : vector<8xf32>
    %184 = vector.multi_reduction <maximumf>, %183, %cst_75 [1] : vector<8x8xf32> to vector<8xf32>
    %185 = vector.shape_cast %184 : vector<8xf32> to vector<8x1xf32>
    %186 = vector.broadcast %185 : vector<8x1xf32> to vector<8x8xf32>
    %187 = arith.subf %183, %186 : vector<8x8xf32>
    %188 = math.exp %187 : vector<8x8xf32>
    %cst_76 = arith.constant dense<0.000000e+00> : vector<8xf32>
    %189 = vector.multi_reduction <add>, %188, %cst_76 [1] : vector<8x8xf32> to vector<8xf32>
    %190 = vector.shape_cast %189 : vector<8xf32> to vector<8x1xf32>
    %191 = tpu.reciprocal %190 {approx = true} : vector<8x1xf32> -> vector<8x1xf32>
    %192 = vector.broadcast %191 : vector<8x1xf32> to vector<8x8xf32>
    %193 = arith.mulf %188, %192 : vector<8x8xf32>
    %194 = arith.truncf %193 : vector<8x8xf32> to vector<8x8xbf16>
    %195 = vector.extract_strided_slice %139 {offsets = [0, 16], sizes = [8, 8], strides = [1, 1]} : vector<8x32xbf16> to vector<8x8xbf16>
    %cst_77 = arith.constant dense<0.000000e+00> : vector<8x8xf32>
    %196 = tpu.matmul %194, %195, %cst_77 {dimension_numbers = #tpu.dot_dimension_numbers<[1], [0], [0], [1], [0, 0, 1, 1], [], []>} : vector<8x8xbf16>, vector<8x8xbf16>, vector<8x8xf32> -> vector<8x8xf32>
    %197 = arith.truncf %196 : vector<8x8xf32> to vector<8x8xbf16>
    %198 = vector.extract_strided_slice %129 {offsets = [16, 0], sizes = [8, 32], strides = [1, 1]} : vector<32x32xbf16> to vector<8x32xbf16>
    %cst_78 = arith.constant dense<0.000000e+00> : vector<8x32xf32>
    %199 = tpu.matmul %197, %198, %cst_78 {dimension_numbers = #tpu.dot_dimension_numbers<[1], [0], [0], [1], [0, 0, 1, 1], [], []>} : vector<8x8xbf16>, vector<8x32xbf16>, vector<8x32xf32> -> vector<8x32xf32>
    %200 = arith.addf %180, %199 : vector<8x32xf32>
    %201 = vector.extract_strided_slice %138 {offsets = [0, 24], sizes = [8, 8], strides = [1, 1]} : vector<8x32xbf16> to vector<8x8xbf16>
    %202 = vector.extract_strided_slice %137 {offsets = [0, 24], sizes = [8, 8], strides = [1, 1]} : vector<8x32xbf16> to vector<8x8xbf16>
    "tpu.trace_start"() <{level = 10 : i32, message = "qd,kd->qk"}> : () -> ()
    %cst_79 = arith.constant dense<0.000000e+00> : vector<8x8xf32>
    %203 = tpu.matmul %201, %202, %cst_79 {dimension_numbers = #tpu.dot_dimension_numbers<[1], [1], [0], [0], [0, 0, 1, 0], [], []>} : vector<8x8xbf16>, vector<8x8xbf16>, vector<8x8xf32> -> vector<8x8xf32>
    "tpu.trace_stop"() : () -> ()
    %cst_80 = arith.constant dense<0xFF800000> : vector<8xf32>
    %204 = vector.multi_reduction <maximumf>, %203, %cst_80 [1] : vector<8x8xf32> to vector<8xf32>
    %205 = vector.shape_cast %204 : vector<8xf32> to vector<8x1xf32>
    %206 = vector.broadcast %205 : vector<8x1xf32> to vector<8x8xf32>
    %207 = arith.subf %203, %206 : vector<8x8xf32>
    %208 = math.exp %207 : vector<8x8xf32>
    %cst_81 = arith.constant dense<0.000000e+00> : vector<8xf32>
    %209 = vector.multi_reduction <add>, %208, %cst_81 [1] : vector<8x8xf32> to vector<8xf32>
    %210 = vector.shape_cast %209 : vector<8xf32> to vector<8x1xf32>
    %211 = tpu.reciprocal %210 {approx = true} : vector<8x1xf32> -> vector<8x1xf32>
    %212 = vector.broadcast %211 : vector<8x1xf32> to vector<8x8xf32>
    %213 = arith.mulf %208, %212 : vector<8x8xf32>
    %214 = arith.truncf %213 : vector<8x8xf32> to vector<8x8xbf16>
    %215 = vector.extract_strided_slice %139 {offsets = [0, 24], sizes = [8, 8], strides = [1, 1]} : vector<8x32xbf16> to vector<8x8xbf16>
    %cst_82 = arith.constant dense<0.000000e+00> : vector<8x8xf32>
    %216 = tpu.matmul %214, %215, %cst_82 {dimension_numbers = #tpu.dot_dimension_numbers<[1], [0], [0], [1], [0, 0, 1, 1], [], []>} : vector<8x8xbf16>, vector<8x8xbf16>, vector<8x8xf32> -> vector<8x8xf32>
    %217 = arith.truncf %216 : vector<8x8xf32> to vector<8x8xbf16>
    %218 = vector.extract_strided_slice %129 {offsets = [24, 0], sizes = [8, 32], strides = [1, 1]} : vector<32x32xbf16> to vector<8x32xbf16>
    %cst_83 = arith.constant dense<0.000000e+00> : vector<8x32xf32>
    %219 = tpu.matmul %217, %218, %cst_83 {dimension_numbers = #tpu.dot_dimension_numbers<[1], [0], [0], [1], [0, 0, 1, 1], [], []>} : vector<8x8xbf16>, vector<8x32xbf16>, vector<8x32xf32> -> vector<8x32xf32>
    %220 = arith.addf %200, %219 : vector<8x32xf32>
    %221 = vector.broadcast %130 : vector<1x32xf32> to vector<8x32xf32>
    %222 = arith.addf %220, %221 : vector<8x32xf32>
    %c0_84 = arith.constant 0 : index
    %c0_85 = arith.constant 0 : index
    %223 = vector.load %arg16[%c0_84, %c0_85] : memref<1x32xf32, #tpu.memory_space<vmem>>, vector<1x32xf32>
    %c0_86 = arith.constant 0 : index
    %c0_87 = arith.constant 0 : index
    %224 = vector.load %arg17[%c0_86, %c0_87] : memref<1x32xf32, #tpu.memory_space<vmem>>, vector<1x32xf32>
    %225 = arith.addf %222, %125 : vector<8x32xf32>
    %cst_88 = arith.constant dense<0.000000e+00> : vector<8xf32>
    %226 = vector.multi_reduction <add>, %225, %cst_88 [1] : vector<8x32xf32> to vector<8xf32>
    %227 = vector.shape_cast %226 : vector<8xf32> to vector<8x1xf32>
    %cst_89 = arith.constant 3.200000e+01 : f32
    %228 = vector.broadcast %cst_89 : f32 to vector<8x1xf32>
    %229 = arith.divf %227, %228 : vector<8x1xf32>
    %230 = vector.broadcast %229 : vector<8x1xf32> to vector<8x32xf32>
    %231 = arith.subf %225, %230 : vector<8x32xf32>
    %232 = arith.mulf %231, %231 : vector<8x32xf32>
    %cst_90 = arith.constant dense<0.000000e+00> : vector<8xf32>
    %233 = vector.multi_reduction <add>, %232, %cst_90 [1] : vector<8x32xf32> to vector<8xf32>
    %234 = vector.shape_cast %233 : vector<8xf32> to vector<8x1xf32>
    %cst_91 = arith.constant 3.200000e+01 : f32
    %235 = vector.broadcast %cst_91 : f32 to vector<8x1xf32>
    %236 = arith.divf %234, %235 : vector<8x1xf32>
    %cst_92 = arith.constant 9.99999974E-6 : f32
    %237 = vector.broadcast %cst_92 : f32 to vector<8x1xf32>
    %238 = arith.addf %236, %237 : vector<8x1xf32>
    %239 = math.rsqrt %238 : vector<8x1xf32>
    %240 = vector.broadcast %239 : vector<8x1xf32> to vector<8x32xf32>
    %241 = arith.mulf %231, %240 : vector<8x32xf32>
    %242 = vector.broadcast %223 : vector<1x32xf32> to vector<8x32xf32>
    %243 = arith.mulf %241, %242 : vector<8x32xf32>
    %244 = vector.broadcast %224 : vector<1x32xf32> to vector<8x32xf32>
    %245 = arith.addf %243, %244 : vector<8x32xf32>
    %c0_93 = arith.constant 0 : index
    %c0_94 = arith.constant 0 : index
    %246 = vector.load %arg18[%c0_93, %c0_94] : memref<32x128xbf16, #tpu.memory_space<vmem>>, vector<32x128xbf16>
    %c0_95 = arith.constant 0 : index
    %c0_96 = arith.constant 0 : index
    %247 = vector.load %arg19[%c0_95, %c0_96] : memref<1x128xf32, #tpu.memory_space<vmem>>, vector<1x128xf32>
    %c0_97 = arith.constant 0 : index
    %c0_98 = arith.constant 0 : index
    %248 = vector.load %arg20[%c0_97, %c0_98] : memref<128x32xbf16, #tpu.memory_space<vmem>>, vector<128x32xbf16>
    %c0_99 = arith.constant 0 : index
    %c0_100 = arith.constant 0 : index
    %249 = vector.load %arg21[%c0_99, %c0_100] : memref<1x32xf32, #tpu.memory_space<vmem>>, vector<1x32xf32>
    %250 = arith.truncf %245 : vector<8x32xf32> to vector<8x32xbf16>
    %cst_101 = arith.constant dense<0.000000e+00> : vector<8x128xf32>
    %251 = tpu.matmul %250, %246, %cst_101 {dimension_numbers = #tpu.dot_dimension_numbers<[1], [0], [0], [1], [0, 0, 1, 1], [], []>} : vector<8x32xbf16>, vector<32x128xbf16>, vector<8x128xf32> -> vector<8x128xf32>
    %252 = vector.broadcast %247 : vector<1x128xf32> to vector<8x128xf32>
    %253 = arith.addf %251, %252 : vector<8x128xf32>
    %cst_102 = arith.constant 0.000000e+00 : f32
    %254 = vector.broadcast %cst_102 : f32 to vector<8x128xf32>
    %255 = arith.maximumf %253, %254 : vector<8x128xf32>
    %256 = arith.truncf %255 : vector<8x128xf32> to vector<8x128xbf16>
    %cst_103 = arith.constant dense<0.000000e+00> : vector<8x32xf32>
    %257 = tpu.matmul %256, %248, %cst_103 {dimension_numbers = #tpu.dot_dimension_numbers<[1], [0], [0], [1], [0, 0, 1, 1], [], []>} : vector<8x128xbf16>, vector<128x32xbf16>, vector<8x32xf32> -> vector<8x32xf32>
    %258 = vector.broadcast %249 : vector<1x32xf32> to vector<8x32xf32>
    %259 = arith.addf %257, %258 : vector<8x32xf32>
    %c0_104 = arith.constant 0 : index
    %c0_105 = arith.constant 0 : index
    %260 = vector.load %arg22[%c0_104, %c0_105] : memref<1x32xf32, #tpu.memory_space<vmem>>, vector<1x32xf32>
    %c0_106 = arith.constant 0 : index
    %c0_107 = arith.constant 0 : index
    %261 = vector.load %arg23[%c0_106, %c0_107] : memref<1x32xf32, #tpu.memory_space<vmem>>, vector<1x32xf32>
    %262 = arith.addf %259, %245 : vector<8x32xf32>
    %cst_108 = arith.constant dense<0.000000e+00> : vector<8xf32>
    %263 = vector.multi_reduction <add>, %262, %cst_108 [1] : vector<8x32xf32> to vector<8xf32>
    %264 = vector.shape_cast %263 : vector<8xf32> to vector<8x1xf32>
    %cst_109 = arith.constant 3.200000e+01 : f32
    %265 = vector.broadcast %cst_109 : f32 to vector<8x1xf32>
    %266 = arith.divf %264, %265 : vector<8x1xf32>
    %267 = vector.broadcast %266 : vector<8x1xf32> to vector<8x32xf32>
    %268 = arith.subf %262, %267 : vector<8x32xf32>
    %269 = arith.mulf %268, %268 : vector<8x32xf32>
    %cst_110 = arith.constant dense<0.000000e+00> : vector<8xf32>
    %270 = vector.multi_reduction <add>, %269, %cst_110 [1] : vector<8x32xf32> to vector<8xf32>
    %271 = vector.shape_cast %270 : vector<8xf32> to vector<8x1xf32>
    %cst_111 = arith.constant 3.200000e+01 : f32
    %272 = vector.broadcast %cst_111 : f32 to vector<8x1xf32>
    %273 = arith.divf %271, %272 : vector<8x1xf32>
    %cst_112 = arith.constant 9.99999974E-6 : f32
    %274 = vector.broadcast %cst_112 : f32 to vector<8x1xf32>
    %275 = arith.addf %273, %274 : vector<8x1xf32>
    %276 = math.rsqrt %275 : vector<8x1xf32>
    %277 = vector.broadcast %276 : vector<8x1xf32> to vector<8x32xf32>
    %278 = arith.mulf %268, %277 : vector<8x32xf32>
    %279 = vector.broadcast %260 : vector<1x32xf32> to vector<8x32xf32>
    %280 = arith.mulf %278, %279 : vector<8x32xf32>
    %281 = vector.broadcast %261 : vector<1x32xf32> to vector<8x32xf32>
    %282 = arith.addf %280, %281 : vector<8x32xf32>
    %c0_113 = arith.constant 0 : index
    %c0_114 = arith.constant 0 : index
    %c0_115 = arith.constant 0 : index
    %283 = vector.load %arg24[%c0_113, %c0_114, %c0_115] : memref<1x8x32xf32, #tpu.memory_space<vmem>>, vector<1x8x32xf32>
    %284 = vector.shape_cast %283 : vector<1x8x32xf32> to vector<8x32xf32>
    %285 = vector.shape_cast %282 : vector<8x32xf32> to vector<1x8x32xf32>
    tpu.vector_store %arg24[%c0_113, %c0_114, %c0_115], %285 {strides = array<i32>} : memref<1x8x32xf32, #tpu.memory_space<vmem>>, vector<1x8x32xf32>,
    return
  }
  func.func @transform_0(%arg0: i32) -> (i32, i32, i32) {
    %c0_i32 = arith.constant 0 : i32
    %c0_i32_0 = arith.constant 0 : i32
    %c0_i32_1 = arith.constant 0 : i32
    return %arg0, %c0_i32, %c0_i32_0 : i32, i32, i32
  }
  func.func @transform_1(%arg0: i32) -> (i32, i32, i32) {
    %c0_i32 = arith.constant 0 : i32
    %c0_i32_0 = arith.constant 0 : i32
    %c0_i32_1 = arith.constant 0 : i32
    return %arg0, %c0_i32, %c0_i32_0 : i32, i32, i32
  }
  func.func @transform_2(%arg0: i32) -> (i32, i32, i32) {
    %c0_i32 = arith.constant 0 : i32
    %c0_i32_0 = arith.constant 0 : i32
    %c0_i32_1 = arith.constant 0 : i32
    return %arg0, %c0_i32, %c0_i32_0 : i32, i32, i32
  }
  func.func @transform_3(%arg0: i32) -> (i32, i32) {
    %c0_i32 = arith.constant 0 : i32
    %c0_i32_0 = arith.constant 0 : i32
    %c0_i32_1 = arith.constant 0 : i32
    return %c0_i32, %c0_i32_0 : i32, i32
  }
  func.func @transform_4(%arg0: i32) -> (i32, i32) {
    %c0_i32 = arith.constant 0 : i32
    %c0_i32_0 = arith.constant 0 : i32
    %c0_i32_1 = arith.constant 0 : i32
    return %c0_i32, %c0_i32_0 : i32, i32
  }
  func.func @transform_5(%arg0: i32) -> (i32, i32) {
    %c0_i32 = arith.constant 0 : i32
    %c0_i32_0 = arith.constant 0 : i32
    %c0_i32_1 = arith.constant 0 : i32
    return %c0_i32, %c0_i32_0 : i32, i32
  }
  func.func @transform_6(%arg0: i32) -> (i32, i32) {
    %c0_i32 = arith.constant 0 : i32
    %c0_i32_0 = arith.constant 0 : i32
    %c0_i32_1 = arith.constant 0 : i32
    return %c0_i32, %c0_i32_0 : i32, i32
  }
  func.func @transform_7(%arg0: i32) -> (i32, i32) {
    %c0_i32 = arith.constant 0 : i32
    %c0_i32_0 = arith.constant 0 : i32
    %c0_i32_1 = arith.constant 0 : i32
    return %c0_i32, %c0_i32_0 : i32, i32
  }
  func.func @transform_8(%arg0: i32) -> (i32, i32) {
    %c0_i32 = arith.constant 0 : i32
    %c0_i32_0 = arith.constant 0 : i32
    %c0_i32_1 = arith.constant 0 : i32
    return %c0_i32, %c0_i32_0 : i32, i32
  }
  func.func @transform_9(%arg0: i32) -> (i32, i32) {
    %c0_i32 = arith.constant 0 : i32
    %c0_i32_0 = arith.constant 0 : i32
    %c0_i32_1 = arith.constant 0 : i32
    return %c0_i32, %c0_i32_0 : i32, i32
  }
  func.func @transform_10(%arg0: i32) -> (i32, i32) {
    %c0_i32 = arith.constant 0 : i32
    %c0_i32_0 = arith.constant 0 : i32
    %c0_i32_1 = arith.constant 0 : i32
    return %c0_i32, %c0_i32_0 : i32, i32
  }
  func.func @transform_11(%arg0: i32) -> (i32, i32) {
    %c0_i32 = arith.constant 0 : i32
    %c0_i32_0 = arith.constant 0 : i32
    %c0_i32_1 = arith.constant 0 : i32
    return %c0_i32, %c0_i32_0 : i32, i32
  }
  func.func @transform_12(%arg0: i32) -> (i32, i32) {
    %c0_i32 = arith.constant 0 : i32
    %c0_i32_0 = arith.constant 0 : i32
    %c0_i32_1 = arith.constant 0 : i32
    return %c0_i32, %c0_i32_0 : i32, i32
  }
  func.func @transform_13(%arg0: i32) -> (i32, i32) {
    %c0_i32 = arith.constant 0 : i32
    %c0_i32_0 = arith.constant 0 : i32
    %c0_i32_1 = arith.constant 0 : i32
    return %c0_i32, %c0_i32_0 : i32, i32
  }
  func.func @transform_14(%arg0: i32) -> (i32, i32) {
    %c0_i32 = arith.constant 0 : i32
    %c0_i32_0 = arith.constant 0 : i32
    %c0_i32_1 = arith.constant 0 : i32
    return %c0_i32, %c0_i32_0 : i32, i32
  }
  func.func @transform_15(%arg0: i32) -> (i32, i32) {
    %c0_i32 = arith.constant 0 : i32
    %c0_i32_0 = arith.constant 0 : i32
    %c0_i32_1 = arith.constant 0 : i32
    return %c0_i32, %c0_i32_0 : i32, i32
  }
  func.func @transform_16(%arg0: i32) -> (i32, i32) {
    %c0_i32 = arith.constant 0 : i32
    %c0_i32_0 = arith.constant 0 : i32
    %c0_i32_1 = arith.constant 0 : i32
    return %c0_i32, %c0_i32_0 : i32, i32
  }
  func.func @transform_17(%arg0: i32) -> (i32, i32) {
    %c0_i32 = arith.constant 0 : i32
    %c0_i32_0 = arith.constant 0 : i32
    %c0_i32_1 = arith.constant 0 : i32
    return %c0_i32, %c0_i32_0 : i32, i32
  }
  func.func @transform_18(%arg0: i32) -> (i32, i32) {
    %c0_i32 = arith.constant 0 : i32
    %c0_i32_0 = arith.constant 0 : i32
    %c0_i32_1 = arith.constant 0 : i32
    return %c0_i32, %c0_i32_0 : i32, i32
  }
  func.func @transform_19(%arg0: i32) -> (i32, i32) {
    %c0_i32 = arith.constant 0 : i32
    %c0_i32_0 = arith.constant 0 : i32
    %c0_i32_1 = arith.constant 0 : i32
    return %c0_i32, %c0_i32_0 : i32, i32
  }
  func.func @transform_20(%arg0: i32) -> (i32, i32) {
    %c0_i32 = arith.constant 0 : i32
    %c0_i32_0 = arith.constant 0 : i32
    %c0_i32_1 = arith.constant 0 : i32
    return %c0_i32, %c0_i32_0 : i32, i32
  }
  func.func @transform_21(%arg0: i32) -> (i32, i32) {
    %c0_i32 = arith.constant 0 : i32
    %c0_i32_0 = arith.constant 0 : i32
    %c0_i32_1 = arith.constant 0 : i32
    return %c0_i32, %c0_i32_0 : i32, i32
  }
  func.func @transform_22(%arg0: i32) -> (i32, i32) {
    %c0_i32 = arith.constant 0 : i32
    %c0_i32_0 = arith.constant 0 : i32
    %c0_i32_1 = arith.constant 0 : i32
    return %c0_i32, %c0_i32_0 : i32, i32
  }
  func.func @transform_23(%arg0: i32) -> (i32, i32, i32) {
    %c0_i32 = arith.constant 0 : i32
    %c0_i32_0 = arith.constant 0 : i32
    %c0_i32_1 = arith.constant 0 : i32
    return %arg0, %c0_i32, %c0_i32_0 : i32, i32, i32
  }
}

</mosaic_0001>

<bundles_post_ra>
// kernel: decoder_forward.3
= control target key start
LH: loop header
LB: loop body
LE: loop exit
PB: predicated region body
PF: predicated region fallthrough
CT: control target
= control target key end

     0   :  { %s3896_s0 = inlined_call_operand.vmem [shape: f32[2,8,32], index: 0, kind: input, shape index: {}, may-alias: {0,2}]   ;;  %s3897_s1 = inlined_call_operand.vmem [shape: f32[2,8,32], index: 1, kind: input, shape index: {}]   ;;  %s3898_s2 = inlined_call_operand.vmem [shape: f32[2,8,32], index: 2, kind: input, shape index: {}, may-alias: {0,2}]   ;;  %s3899_s3 = inlined_call_operand.vmem [shape: bf16[32,32], index: 3, kind: input, shape index: {}]   ;;  %s3900_s4 = inlined_call_operand.vmem [shape: bf16[32,32], index: 4, kind: input, shape index: {}]   ;;  %s3901_s5 = inlined_call_operand.vmem [shape: bf16[32,32], index: 5, kind: input, shape index: {}]   ;;  %s3902_s6 = inlined_call_operand.vmem [shape: bf16[32,32], index: 6, kind: input, shape index: {}]   ;;  %s3903_s7 = inlined_call_operand.vmem [shape: f32[1,32], index: 7, kind: input, shape index: {}]   ;;  %s3904_s8 = inlined_call_operand.vmem [shape: f32[1,32], index: 8, kind: input, shape index: {}]   ;;  %s3905_s9 = inlined_call_operand.vmem [shape: f32[1,32], index: 9, kind: input, shape index: {}]   ;;  %s3906_s10 = inlined_call_operand.vmem [shape: bf16[32,32], index: 10, kind: input, shape index: {}]   ;;  %s3907_s11 = inlined_call_operand.vmem [shape: bf16[32,32], index: 11, kind: input, shape index: {}]   ;;  %s3908_s12 = inlined_call_operand.vmem [shape: bf16[32,32], index: 12, kind: input, shape index: {}]   ;;  %s3909_s13 = inlined_call_operand.vmem [shape: bf16[32,32], index: 13, kind: input, shape index: {}]   ;;  %s3910_s14 = inlined_call_operand.vmem [shape: f32[1,32], index: 14, kind: input, shape index: {}]   ;;  %s3911_s15 = inlined_call_operand.vmem [shape: f32[1,32], index: 15, kind: input, shape index: {}]   ;;  %s3912_s16 = inlined_call_operand.vmem [shape: f32[1,32], index: 16, kind: input, shape index: {}]   ;;  %s3913_s17 = inlined_call_operand.vmem [shape: bf16[32,128], index: 17, kind: input, shape index: {}]   ;;  %s3914_s18 = inlined_call_operand.vmem [shape: f32[1,128], index: 18, kind: input, shape index: {}]   ;;  %s3915_s19 = inlined_call_operand.vmem [shape: bf16[128,32], index: 19, kind: input, shape index: {}]   ;;  %s3916_s20 = inlined_call_operand.vmem [shape: f32[1,32], index: 20, kind: input, shape index: {}]   ;;  %s3917_s21 = inlined_call_operand.vmem [shape: f32[1,32], index: 21, kind: input, shape index: {}]   ;;  %s3918_s22 = inlined_call_operand.vmem [shape: f32[1,32], index: 22, kind: input, shape index: {}]   ;;  %s3919_s23 = inlined_call_operand.hbm [shape: f32[2,8,32], index: 23, kind: output, shape index: {}]  }
   0x1   :  { %3937 = sst [smem:[#allocation10_spill]] %s3896_s0 }
   0x2   :  { %3938 = sst [smem:[#allocation11_spill]] %s3897_s1 }
   0x3   :  { %3939 = sst [smem:[#allocation12_spill]] %s3898_s2 }
   0x4   :  { %3940 = sst [smem:[#allocation13_spill]] %s3899_s3 }
   0x5   :  { %3941 = sst [smem:[#allocation14_spill]] %s3900_s4 }
   0x6   :  { %3942 = sst [smem:[#allocation15_spill]] %s3901_s5 }
   0x7   :  { %3943 = sst [smem:[#allocation16_spill]] %s3902_s6 }
   0x8   :  { %3944 = sst [smem:[#allocation17_spill]] %s3903_s7 }
   0x9   :  { %3945 = sst [smem:[#allocation18_spill]] %s3904_s8 }
   0xa   :  { %3946 = sst [smem:[#allocation19_spill]] %s3905_s9 }
   0xb   :  { %3947 = sst [smem:[#allocation20_spill]] %s3906_s10 }
   0xc   :  { %3948 = sst [smem:[#allocation21_spill]] %s3907_s11 }
   0xd   :  { %28 = vsyncpa [#allocation3], 0 }
   0xe   :  { %30 = vsyncpa [#allocation3 + $0x1], 0  ;;  %s3417_s4 = smov 0   ;;  %s3419_s30 = smov 0  }
   0xf   :  { %s3421_s24 = smov 0   ;;  %s3423_s25 = smov 0  }
  0x10 LB: > { %3949 = sst [smem:[#allocation5_spill]] %s3277_s4  ;;  %s3438_s5 = sadd.s32 4294967295, %s3289_s25   ;;  %s3289_s25 = sphi %s3423_s25, %s3975_s25   ;;  %s3285_s24 = sphi %s3421_s24, %s3977_s24   ;;  %s3281_s30 = sphi %s3419_s30, %s3979_s30   ;;  %s3277_s4 = sphi %s3417_s4, %s3978_s4  }
  0x11   : > { %3950 = sst [smem:[#allocation6_spill]] %s3285_s24  ;;  %s2752_s1 = sadd.s32 4294967294, %s3289_s25  }
  0x12   : > { %s3442_s26 = sadd.s32 1, %s3289_s25   ;;  %s541_s2 = sadd.s32 1, %s3285_s24 }
  0x13   : > { %3951 = sst [smem:[#allocation7_spill]] %s3442_s26  ;;  %s538_s6 = ssub.s32 %s3289_s25, %s3442_s26 }
  0x14   : > { %p551_p0 = scmp.ne.s32.totalorder %s3285_s24, %s3281_s30  ;;  %p539_p1 = scmp.eq.s32.totalorder %s538_s6, 0 }
  0x15   : > { %p552_p2 = scmp.eq.s32.totalorder %s3438_s5, 1  ;;  %p557_p3 = scmp.ne.s32.totalorder %s3281_s30, %s3277_s4 }
  0x16   : > { %p558_p4 = scmp.eq.s32.totalorder %s2752_s1, 1  ;;  %p2755_p7 = scmp.ge.s32.totalorder %s3289_s25, 1 }
  0x17   : > { %s3453_s27 = scalar_select %p539_p1, %s3285_s24, %s541_s2  }
  0x18   : > { %p3455_p5 = por %p552_p2, %p551_p0  ;;  %p3459_p6 = por %p558_p4, %p557_p3 }
  0x19   : > { %3952 = sst [smem:[#allocation8_spill]] %s3453_s27  ;;  %p657_p8 = scmp.lt.s32.totalorder %s3289_s25, 3 }
  0x1a   : > { %s3954_s28 = scalar_select %p3459_p6, 1, 0 }
  0x1b   : > { %p658_p9 = pnand %p2755_p7, %p657_p8 }
  0x1c   : > { %3955 = sst [smem:[#allocation9_spill]] %s3954_s28  ;;  %p728_p10 = scmp.lt.s32.totalorder (!%p658_p9), %s3438_s5, 1 }
  0x1d   : > { %661 = sbr.rel (%p658_p9) target bundleno = 5761 (0x1681), region = 112  ;;  %s3956_s0 = sld [smem:[#allocation13_spill]] (!%p658_p9) }
  0x1e   : > { %s3957_s24 = sld [smem:[#allocation14_spill]] (!%p658_p9)  ;;  %s3934_s4 = smov (!%p658_p9), 120  }
  0x1f   : > { %s3932_s1 = smov (!%p658_p9), 112   ;;  %s3930_s2 = smov (!%p658_p9), 104  }
  0x20   : > { %s3963_s10 = sld [smem:[#allocation20_spill]] (!%p658_p9)  ;;  %s725_s3 = sand.u32 (!%p658_p9), 1, %s3281_s30  }
  0x21   : > { %s3965_s11 = sld [smem:[#allocation21_spill]] (!%p658_p9) }
  0x22   : > { %v3291_v1 = vmov 0.0   ;;  %vm3292_vm0 = vmmov 0   ;;  %s729_s6 = scalar_select %p728_p10, %s3438_s5, 1  ;;  %vm774_vm1 = vcmask 261120   ;;  %vm925_vm2 = vcmask 64512  }
  0x23   : > { %v3169_v0 = vld [vmem:[%s3956_s0 + $0x8] sm:$0xff]   ;;  %2905 = vmatprep.subr.bf16.mxu0 %v3291_v1  ;;  %2929 = vmatprep.subr.bf16.mxu1 %v3291_v1  ;;  %v3170_v2 = vld [vmem:[%s3956_s0] sm:$0xff]   ;;  %s3959_s0 = sld [smem:[#allocation12_spill]]  ;;  %vm987_vm3 = vcmask 1043456  }
  0x24   : > { %2906 = vmatpush3.bf16.msra.mxu0 %v3169_v0  ;;  %2909 = vmatprep.mubr.msk.bf16.mxu0 %vm3292_vm0, %v3291_v1  ;;  %s3480_s29 = sshll.u32 %s729_s6, 3  ;;  %s3958_s26 = smov %s3957_s24  ;;  %v3171_v3 = vld [vmem:[%s3957_s24 + $0x8] sm:$0xff]  }
  0x25   : > { %2907 = vmatprep.subr.bf16.mxu0 %v3291_v1  ;;  %2931 = vmatprep.mubr.msk.bf16.mxu1 %vm3292_vm0, %v3291_v1  ;;  %v3172_v6 = vld [vmem:[%s3958_s26] sm:$0xff]   ;;  %s3961_s24 = sld [smem:[#allocation16_spill]]  ;;  %s3296_s6 = smov [#allocation2]  }
  0x26   : > { %s3968_s26 = sld [smem:[#allocation17_spill]] }
  0x27   : > { %s3970_s8 = sld [smem:[#allocation18_spill]] }
  0x28   : > { %2908 = vmatpush3.bf16.msra.mxu0 %v3170_v2  ;;  %s3971_s9 = sld [smem:[#allocation19_spill]] }
  0x29   : > { %s739_s28 = scalar_lea.vmem %s3959_s0, %s3480_s29  ;;  %2913 = vmatprep.subr.bf16.mxu0 %v3291_v1 }
  0x2a   : > { %v3490_v4 = vld [vmem:[%s739_s28] sm:$0xff]  ;;  %s3960_s28 = sld [smem:[#allocation15_spill]] }
  0x2b   : > { %v761_v5 = vpack.c.bf16 %v3490_v4, %v3490_v4  ;;  %s3962_s27 = smov %s3961_s24  ;;  %v757_v53 = vld [vmem:[%s3961_s24 + $0x4] sm:$0xf] }
  0x2c   : > { %v1150_v54 = vsel %vm987_vm3, %v757_v53, 0  ;;  %v756_v59 = vld [vmem:[%s3962_s27] sm:$0xf] }
  0x2d   : > { %2910 = vmatmul.mubr.msk.bf16.vlgmr.msra.gmra.mxu0 %vm774_vm1, %v761_v5  ;;  %v1196_v62 = vsel %vm987_vm3, %v756_v59, 0 }
  0x2e   : > { %2914 = vmatpush3.bf16.msra.mxu0 %v3171_v3  ;;  %2917 = vmatprep.mubr.msk.bf16.mxu0 %vm3292_vm0, %v3291_v1 }
  0x2f   : > { %2915 = vmatprep.subr.bf16.mxu0 %v3291_v1 }
  0x30   : > { %v3173_v18 = vld [vmem:[%s3960_s28 + $0x8] sm:$0xff]   ;;  %v3174_v19 = vld [vmem:[%s3960_s28] sm:$0xff]  }
  0x32   : > { %2916 = vmatpush3.bf16.msra.mxu0 %v3172_v6 }
  0x33   : > { %2921 = vmatprep.subr.bf16.mxu0 %v3291_v1 }
  0x35   : > { %2918 = vmatmul.mubr.msk.bf16.vlgmr.msra.gmra.mxu0 %vm774_vm1, %v761_v5 }
  0x36   : > { %2925 = vmatprep.mubr.msk.bf16.mxu0 %vm3292_vm0, %v3291_v1  ;;  %2922 = vmatpush3.bf16.msra.mxu0 %v3173_v18 }
  0x37   : > { %2923 = vmatprep.subr.bf16.mxu0 %v3291_v1 }
  0x3a   : > { %2924 = vmatpush3.bf16.msra.mxu0 %v3174_v19 }
  0x3b   : > { %2935 = vmatprep.subr.bf16.mxu0 %v3291_v1 }
  0x3d   : > { %2926 = vmatmul.mubr.msk.bf16.vlgmr.msra.gmra.mxu0 %vm774_vm1, %v761_v5 }
  0x3e   : > { %2937 = vmatprep.mubr.msk.bf16.mxu0 %vm3292_vm0, %v3291_v1 }
  0xed   : > { %v812_v7 = vpop.f32.mrf.mxu0 }
  0xee   : > { %v3505_v8 = vpack.c.bf16 %v812_v7, %v812_v7 }
  0xef   : > { %v2911_v9 = vpop.f32.mrf.mxu0 }
  0xf0   : > { %1036 = vrot.lane.b32.xlu0 %v3505_v8, %s3934_s4  ;;  %v930_v10 = vsel %vm925_vm2, %v3505_v8, 0 }
  0xf1   : > { %v815_v11 = vpop.f32.mrf.mxu0  ;;  %2930 = vmatpush3.bf16.xpose.msra.mxu1 %v930_v10 }
  0xf2   : > { %2941 = vmatprep.subr.bf16.mxu1 %v3291_v1 }
  0xf3   : > { %v2912_v12 = vpop.f32.mrf.mxu0 }
  0xf5   : > { %v864_v13 = vpop.f32.mrf.mxu0 }
  0xf6   : > { %v3512_v14 = vpack.c.bf16 %v864_v13, %v864_v13 }
  0xf7   : > { %v2919_v15 = vpop.f32.mrf.mxu0 }
  0xf8   : > { %1033 = vrot.lane.b32.xlu0 %v3512_v14, %s3934_s4  ;;  %2932 = vmatmul.mubr.msk.bf16.vlgmr.msra.gmra.mxu1 %vm925_vm2, %v3512_v14 }
  0xf9   : > { %v867_v16 = vpop.f32.mrf.mxu0  ;;  %2943 = vmatprep.mubr.msk.bf16.mxu1 %vm3292_vm0, %v3291_v1 }
  0xfb   : > { %v2920_v17 = vpop.f32.mrf.mxu0 }
  0xfd   : > { %v916_v36 = vpop.f32.mrf.mxu0 }
  0xfe   : > { %v3539_v42 = vpack.c.bf16 %v916_v36, %v916_v36 }
  0xff   : > { %v2927_v37 = vpop.f32.mrf.mxu0 }
 0x100   : > { %v989_v43 = vsel %vm987_vm3, %v3539_v42, 0 }
 0x101   : > { %v919_v38 = vpop.f32.mrf.mxu0  ;;  %2936 = vmatpush3.bf16.msra.mxu0 %v989_v43 }
 0x102   : > { %2947 = vmatprep.subr.bf16.mxu0 %v3291_v1 }
 0x103   : > { %v2928_v39 = vpop.f32.mrf.mxu0 }
 0x162   : > { %v1037_v20 = vpop.permute.xlu0 %1036 }
 0x163   : > { %v1042_v21 = vsel %vm925_vm2, %v1037_v20, 0 }
 0x164   : > { %2942 = vmatpush3.bf16.xpose.msra.mxu1 %v1042_v21 }
 0x165   : > { %2953 = vmatprep.subr.bf16.mxu1 %v3291_v1 }
 0x16a   : > { %v1034_v22 = vpop.permute.xlu0 %1033 }
 0x16b   : > { %2944 = vmatmul.mubr.msk.bf16.vlgmr.msra.gmra.mxu1 %vm925_vm2, %v1034_v22 }
 0x16c   : > { %2955 = vmatprep.mubr.msk.bf16.mxu1 %vm3292_vm0, %v3291_v1  ;;  %2954 = vmatpush3.bf16.msra.mxu1 %v1150_v54 }
 0x16d   : > { %2965 = vmatprep.subr.bf16.mxu1 %v3291_v1 }
 0x1b8   : > { %v966_v23 = vpop.f32.mrf.mxu1 }
 0x1b9   : > { %v972_v24 = vsel %vm925_vm2, %v966_v23, -inf }
 0x1ba   : > { %973 = vmax.xlane.f32.xlu1 %v972_v24  ;;  %v2933_v25 = vpop.f32.mrf.mxu1 }
 0x1bc   : > { %v969_v26 = vpop.f32.mrf.mxu1 }
 0x1be   : > { %v2934_v27 = vpop.f32.mrf.mxu1 }
 0x22b   : > { %v1078_v28 = vpop.f32.mrf.mxu1 }
 0x22c   : > { %v1084_v29 = vsel %vm925_vm2, %v1078_v28, -inf }
 0x22d   : > { %1085 = vmax.xlane.f32.xlu1 %v1084_v29  ;;  %v2945_v30 = vpop.f32.mrf.mxu1 }
 0x22f   : > { %v1081_v31 = vpop.f32.mrf.mxu1 }
 0x231   : > { %v2946_v32 = vpop.f32.mrf.mxu1 }
 0x243   : > { %v974_v33 = vpop.xlane.xlu1 %973 }
 0x244   : > { %v975_v34 = vsub.f32 %v966_v23, %v974_v33 }
 0x246   : > { %v976_v35 = vmul.f32 1.442695, %v975_v34 }
 0x248   : > { %3191 = vpow2.f32 %v976_v35 }
 0x255   : > { %v3192_v40 = vpop.eup %3191 }
 0x256   : > { %v978_v41 = vsel %vm925_vm2, %v3192_v40, 0.0 }
 0x257   : > { %979 = vadd.xlane.f32.xlu0 %v978_v41 }
 0x26d   : > { %1300 = vrot.lane.b32.xlu0 %v3539_v42, %s3932_s1 }
 0x2b6   : > { %v1086_v44 = vpop.xlane.xlu1 %1085 }
 0x2b7   : > { %v1087_v45 = vsub.f32 %v1078_v28, %v1086_v44 }
 0x2b9   : > { %v1088_v46 = vmul.f32 1.442695, %v1087_v45 }
 0x2bb   : > { %3193 = vpow2.f32 %v1088_v46 }
 0x2c8   : > { %v3194_v47 = vpop.eup %3193 }
 0x2c9   : > { %v1090_v48 = vsel %vm925_vm2, %v3194_v47, 0.0 }
 0x2ca   : > { %1091 = vadd.xlane.f32.xlu1 %v1090_v48 }
 0x2db   : > { %1097 = vrot.lane.b32.xlu1 %v3539_v42, %s3934_s4  ;;  %s3969_s4 = smov 112  }
 0x2df   : > { %1240 = vrot.lane.b32.xlu1 %v3505_v8, %s3932_s1 }
 0x2e0   : > { %v980_v49 = vpop.xlane.xlu0 %979 }
 0x2e1   : > { %3195 = vrcp.f32 %v980_v49 }
 0x2e3   : > { %1238 = vrot.lane.b32.xlu1 %v3512_v14, %s3932_s1 }
 0x2e4   : > { %v1301_v63 = vpop.permute.xlu0 %1300 }
 0x2e5   : > { %v1306_v5 = vsel %vm987_vm3, %v1301_v63, 0 }
 0x2ee   : > { %v3196_v50 = vpop.eup %3195 }
 0x2ef   : > { %v982_v51 = vmul.f32 %v3196_v50, %v3192_v40 }
 0x2f1   : > { %v983_v52 = vpack.c.bf16 %v982_v51, %v982_v51 }
 0x2f3   : > { %2938 = vmatmul.mubr.msk.bf16.vlgmr.msra.gmra.mxu0 %vm925_vm2, %v983_v52 }
 0x2f4   : > { %2949 = vmatprep.mubr.msk.bf16.mxu0 %vm3292_vm0, %v3291_v1 }
 0x353   : > { %v1092_v55 = vpop.xlane.xlu1 %1091 }
 0x354   : > { %3197 = vrcp.f32 %v1092_v55 }
 0x357   : > { %v1098_v56 = vpop.permute.xlu1 %1097 }
 0x358   : > { %v1103_v57 = vsel %vm987_vm3, %v1098_v56, 0 }
 0x359   : > { %2948 = vmatpush3.bf16.msra.mxu0 %v1103_v57 }
 0x35a   : > { %2959 = vmatprep.subr.bf16.mxu0 %v3291_v1 }
 0x35b   : > { %v1241_v9 = vpop.permute.xlu1 %1240 }
 0x35c   : > { %v1246_v13 = vsel %vm925_vm2, %v1241_v9, 0 }
 0x35f   : > { %v1239_v17 = vpop.permute.xlu1 %1238 }
 0x361   : > { %v3198_v58 = vpop.eup %3197 }
 0x362   : > { %v1094_v60 = vmul.f32 %v3198_v58, %v3194_v47 }
 0x364   : > { %v1095_v61 = vpack.c.bf16 %v1094_v60, %v1094_v60 }
 0x366   : > { %2950 = vmatmul.mubr.msk.bf16.vlgmr.msra.gmra.mxu0 %vm925_vm2, %v1095_v61 }
 0x367   : > { %2960 = vmatpush3.bf16.msra.mxu0 %v1196_v62  ;;  %2961 = vmatprep.mubr.msk.bf16.mxu0 %vm3292_vm0, %v3291_v1 }
 0x368   : > { %2971 = vmatprep.subr.bf16.mxu0 %v3291_v1 }
 0x3b3   : > { %v1025_v0 = vpop.f32.mrf.mxu0 }
 0x3b4   : > { %v1031_v2 = vpack.c.bf16 %v1025_v0, %v1025_v0 }
 0x3b5   : > { %v2939_v3 = vpop.f32.mrf.mxu0 }
 0x3b6   : > { %2962 = vmatmul.mubr.msk.bf16.vlgmr.msra.gmra.mxu0 %vm925_vm2, %v1031_v2  ;;  %v759_v2 = vld [vmem:[%s3962_s27 + $0xc] sm:$0xf] }
 0x3b7   : > { %2972 = vmatpush3.bf16.msra.mxu0 %v1306_v5  ;;  %v1028_v6 = vpop.f32.mrf.mxu0  ;;  %2973 = vmatprep.mubr.msk.bf16.mxu0 %vm3292_vm0, %v3291_v1  ;;  %v1511_v3 = vsel %vm987_vm3, %v759_v2, 0 }
 0x3b8   : > { %2983 = vmatprep.subr.bf16.mxu0 %v3291_v1 }
 0x3b9   : > { %v2940_v7 = vpop.f32.mrf.mxu0 }
 0x426   : > { %v1139_v10 = vpop.f32.mrf.mxu0 }
 0x427   : > { %v1145_v11 = vpack.c.bf16 %v1139_v10, %v1139_v10  ;;  %v3175_v10 = vld [vmem:[%s3963_s10 + $0x8] sm:$0xff]  }
 0x428   : > { %v2951_v12 = vpop.f32.mrf.mxu0 }
 0x429   : > { %2956 = vmatmul.mubr.msk.bf16.vlgmr.msra.gmra.mxu1 %vm925_vm2, %v1145_v11  ;;  %v3176_v12 = vld [vmem:[%s3963_s10] sm:$0xff]  }
 0x42a   : > { %2966 = vmatpush3.bf16.xpose.msra.mxu1 %v1246_v13  ;;  %v1142_v15 = vpop.f32.mrf.mxu0  ;;  %2967 = vmatprep.mubr.msk.bf16.mxu1 %vm3292_vm0, %v3291_v1 }
 0x42b   : > { %2977 = vmatprep.subr.bf16.mxu1 %v3291_v1 }
 0x42c   : > { %v2952_v16 = vpop.f32.mrf.mxu0 }
 0x431   : > { %2968 = vmatmul.mubr.msk.bf16.vlgmr.msra.gmra.mxu1 %vm925_vm2, %v1239_v17  ;;  %v3177_v17 = vld [vmem:[%s3965_s11 + $0x8] sm:$0xff]  }
 0x432   : > { %2979 = vmatprep.mubr.msk.bf16.mxu1 %vm3292_vm0, %v3291_v1 }
 0x476   : > { %v3584_v18 = vpop.f32.mrf.mxu0 }
 0x478   : > { %v2963_v19 = vpop.f32.mrf.mxu0 }
 0x47a   : > { %v1235_v20 = vpop.f32.mrf.mxu0 }
 0x47c   : > { %v2964_v21 = vpop.f32.mrf.mxu0 }
 0x47d   : > { %v3178_v21 = vld [vmem:[%s3965_s11] sm:$0xff]   ;;  %s2656_s11 = scalar_lea.sflag [#allocation3], %s725_s3 }
 0x4e9   : > { %v1186_v22 = vpop.f32.mrf.mxu1 }
 0x4ea   : > { %v1233_v59 = vadd.f32 %v3584_v18, %v1186_v22 }
 0x4eb   : > { %v2957_v23 = vpop.f32.mrf.mxu1 }
 0x4ed   : > { %v1189_v24 = vpop.f32.mrf.mxu1 }
 0x4ef   : > { %v2958_v25 = vpop.f32.mrf.mxu1 }
 0x4f1   : > { %v1282_v26 = vpop.f32.mrf.mxu1 }
 0x4f2   : > { %v1288_v27 = vsel %vm925_vm2, %v1282_v26, -inf }
 0x4f3   : > { %1289 = vmax.xlane.f32.xlu1 %v1288_v27  ;;  %v2969_v28 = vpop.f32.mrf.mxu1 }
 0x4f5   : > { %v1285_v29 = vpop.f32.mrf.mxu1 }
 0x4f7   : > { %v2970_v30 = vpop.f32.mrf.mxu1 }
 0x57c   : > { %v1290_v31 = vpop.xlane.xlu1 %1289 }
 0x57d   : > { %v1291_v32 = vsub.f32 %v1282_v26, %v1290_v31  ;;  %v2781_v31 = vld [vmem:[%s3968_s26] ss:$0 sm:$0xff]  ;;  %s3233_s26 = sshll.u32 %s3296_s6, 4  ;;  %s3234_s26 = int_to_ptr.vmem [resolvable:$false] %s3233_s26 }
 0x57f   : > { %v1292_v33 = vmul.f32 1.442695, %v1291_v32 }
 0x581   : > { %3199 = vpow2.f32 %v1292_v33 }
 0x58e   : > { %v3200_v34 = vpop.eup %3199 }
 0x58f   : > { %v1294_v35 = vsel %vm925_vm2, %v3200_v34, 0.0 }
 0x590   : > { %1295 = vadd.xlane.f32.xlu0 %v1294_v35 }
 0x5a6   : > { %1398 = vrot.lane.b32.xlu0 %v3505_v8, %s3930_s2 }
 0x5aa   : > { %1396 = vrot.lane.b32.xlu0 %v3512_v14, %s3930_s2  ;;  %v758_v14 = vld [vmem:[%s3962_s27 + $0x8] sm:$0xf] }
 0x5ab   : > { %v1353_v43 = vsel %vm987_vm3, %v758_v14, 0 }
 0x5ac   : > { %2978 = vmatpush3.bf16.msra.mxu1 %v1353_v43 }
 0x5ad   : > { %2989 = vmatprep.subr.bf16.mxu1 %v3291_v1 }
 0x619   : > { %v1296_v36 = vpop.xlane.xlu0 %1295 }
 0x61a   : > { %3201 = vrcp.f32 %v1296_v36 }
 0x61d   : > { %v1399_v39 = vpop.permute.xlu0 %1398 }
 0x61e   : > { %v1404_v41 = vsel %vm925_vm2, %v1399_v39, 0 }
 0x621   : > { %v1397_v8 = vpop.permute.xlu0 %1396 }
 0x627   : > { %v3202_v37 = vpop.eup %3201 }
 0x628   : > { %v1298_v38 = vmul.f32 %v3202_v37, %v3200_v34 }
 0x62a   : > { %v1299_v40 = vpack.c.bf16 %v1298_v38, %v1298_v38 }
 0x62c   : > { %2974 = vmatmul.mubr.msk.bf16.vlgmr.msra.gmra.mxu0 %vm925_vm2, %v1299_v40 }
 0x62d   : > { %2984 = vmatpush3.bf16.xpose.msra.mxu0 %v1404_v41  ;;  %2985 = vmatprep.mubr.msk.bf16.mxu0 %vm3292_vm0, %v3291_v1 }
 0x62e   : > { %2995 = vmatprep.subr.bf16.mxu0 %v3291_v1 }
 0x634   : > { %2986 = vmatmul.mubr.msk.bf16.vlgmr.msra.gmra.mxu0 %vm925_vm2, %v1397_v8 }
 0x635   : > { %2997 = vmatprep.mubr.msk.bf16.mxu0 %vm3292_vm0, %v3291_v1  ;;  %2996 = vmatpush3.bf16.msra.mxu0 %v1511_v3 }
 0x636   : > { %3009 = vmatprep.subr.bf16.mxu0 %v3291_v1 }
 0x6ec   : > { %v1342_v44 = vpop.f32.mrf.mxu0 }
 0x6ed   : > { %v1348_v45 = vpack.c.bf16 %v1342_v44, %v1342_v44 }
 0x6ee   : > { %v2975_v46 = vpop.f32.mrf.mxu0 }
 0x6ef   : > { %2980 = vmatmul.mubr.msk.bf16.vlgmr.msra.gmra.mxu1 %vm925_vm2, %v1348_v45 }
 0x6f0   : > { %v1345_v47 = vpop.f32.mrf.mxu0  ;;  %2991 = vmatprep.mubr.msk.bf16.mxu1 %vm3292_vm0, %v3291_v1 }
 0x6f2   : > { %v2976_v48 = vpop.f32.mrf.mxu0 }
 0x6f4   : > { %v1440_v49 = vpop.f32.mrf.mxu0 }
 0x6f5   : > { %v1446_v50 = vsel %vm925_vm2, %v1440_v49, -inf }
 0x6f6   : > { %1447 = vmax.xlane.f32.xlu0 %v1446_v50  ;;  %v2987_v51 = vpop.f32.mrf.mxu0 }
 0x6f7   : > { %v3179_v51 = vld [vmem:[%s3908_s12 + $0x8] sm:$0xff]  }
 0x6f8   : > { %v1443_v52 = vpop.f32.mrf.mxu0 }
 0x6f9   : > { %v3180_v52 = vld [vmem:[%s3908_s12] sm:$0xff]  }
 0x6fa   : > { %v2988_v53 = vpop.f32.mrf.mxu0 }
 0x77f   : > { %v1448_v54 = vpop.xlane.xlu0 %1447 }
 0x780   : > { %v1449_v55 = vsub.f32 %v1440_v49, %v1448_v54 }
 0x782   : > { %v1450_v56 = vmul.f32 1.442695, %v1449_v55 }
 0x784   : > { %3203 = vpow2.f32 %v1450_v56 }
 0x791   : > { %v3204_v57 = vpop.eup %3203 }
 0x792   : > { %v1452_v58 = vsel %vm925_vm2, %v3204_v57, 0.0 }
 0x793   : > { %1453 = vadd.xlane.f32.xlu1 %v1452_v58 }
 0x7a4   : > { %1458 = vrot.lane.b32.xlu1 %v3539_v42, %s3930_s2  ;;  %s3964_s2 = sld [smem:[#allocation10_spill]] }
 0x7aa   : > { %s731_s1 = scalar_lea.vmem %s3964_s2, %s3480_s29  ;;  %s3972_s2 = smov 104  }
 0x7ab   : > { %v741_v13 = vld [vmem:[%s731_s1] sm:$0xff]  ;;  %s3966_s1 = sld [smem:[#allocation11_spill]] }
 0x7ac   : > { %v1609_v15 = vpack.c.bf16 %v741_v13, %v741_v13 }
 0x7af   : > { %v1389_v60 = vpop.f32.mrf.mxu1 }
 0x7b0   : > { %v1395_v61 = vadd.f32 %v1389_v60, %v1233_v59 }
 0x7b1   : > { %v2981_v62 = vpop.f32.mrf.mxu1  ;;  %s735_s24 = scalar_lea.vmem %s3966_s1, %s3480_s29  ;;  %s3967_s29 = smov 120  }
 0x7b2   : > { %v742_v22 = vld [vmem:[%s735_s24] sm:$0xff] }
 0x7b3   : > { %v1392_v63 = vpop.f32.mrf.mxu1  ;;  %v1665_v24 = vpack.c.bf16 %v742_v22, %v742_v22  ;;  %v2782_v62 = vld [vmem:[%s3970_s8] ss:$0 sm:$0xff] }
 0x7b5   : > { %v2982_v0 = vpop.f32.mrf.mxu1 }
 0x7b6   : > { %v2783_v0 = vld [vmem:[%s3971_s9] ss:$0 sm:$0xff] }
 0x81c   : > { %v1454_v5 = vpop.xlane.xlu1 %1453 }
 0x81d   : > { %3205 = vrcp.f32 %v1454_v5 }
 0x820   : > { %v1459_v42 = vpop.permute.xlu1 %1458 }
 0x821   : > { %v1464_v6 = vsel %vm987_vm3, %v1459_v42, 0 }
 0x822   : > { %2990 = vmatpush3.bf16.msra.mxu1 %v1464_v6 }
 0x823   : > { %3001 = vmatprep.subr.bf16.mxu1 %v3291_v1 }
 0x82a   : > { %v3206_v7 = vpop.eup %3205 }
 0x82b   : > { %v1456_v9 = vmul.f32 %v3206_v7, %v3204_v57 }
 0x82d   : > { %v1457_v11 = vpack.c.bf16 %v1456_v9, %v1456_v9 }
 0x82f   : > { %2992 = vmatmul.mubr.msk.bf16.vlgmr.msra.gmra.mxu1 %vm925_vm2, %v1457_v11 }
 0x830   : > { %3002 = vmatpush3.bf16.msra.mxu1 %v3175_v10  ;;  %3005 = vmatprep.mubr.msk.bf16.mxu1 %vm3292_vm0, %v3291_v1 }
 0x831   : > { %3003 = vmatprep.subr.bf16.mxu1 %v3291_v1 }
 0x834   : > { %3004 = vmatpush3.bf16.msra.mxu1 %v3176_v12 }
 0x835   : > { %3017 = vmatprep.subr.bf16.mxu1 %v3291_v1 }
 0x837   : > { %3006 = vmatmul.mubr.msk.bf16.vlgmr.msra.gmra.mxu1 %vm774_vm1, %v1609_v15 }
 0x838   : > { %3021 = vmatprep.mubr.msk.bf16.mxu1 %vm3292_vm0, %v3291_v1  ;;  %3018 = vmatpush3.bf16.msra.mxu1 %v3179_v51 }
 0x839   : > { %3019 = vmatprep.subr.bf16.mxu1 %v3291_v1 }
 0x83c   : > { %3020 = vmatpush3.bf16.msra.mxu1 %v3180_v52 }
 0x83d   : > { %3031 = vmatprep.subr.bf16.mxu1 %v3291_v1 }
 0x8ef   : > { %v1500_v16 = vpop.f32.mrf.mxu1 }
 0x8f0   : > { %v1506_v18 = vpack.c.bf16 %v1500_v16, %v1500_v16 }
 0x8f1   : > { %v2993_v19 = vpop.f32.mrf.mxu1 }
 0x8f2   : > { %2998 = vmatmul.mubr.msk.bf16.vlgmr.msra.gmra.mxu0 %vm925_vm2, %v1506_v18 }
 0x8f3   : > { %v1503_v20 = vpop.f32.mrf.mxu1  ;;  %3010 = vmatpush3.bf16.msra.mxu0 %v3177_v17  ;;  %3013 = vmatprep.mubr.msk.bf16.mxu0 %vm3292_vm0, %v3291_v1 }
 0x8f4   : > { %3011 = vmatprep.subr.bf16.mxu0 %v3291_v1 }
 0x8f5   : > { %v2994_v23 = vpop.f32.mrf.mxu1 }
 0x8f7   : > { %3012 = vmatpush3.bf16.msra.mxu0 %v3178_v21  ;;  %v1659_v25 = vpop.f32.mrf.mxu1 }
 0x8f8   : > { %v3652_v26 = vpack.c.bf16 %v1659_v25, %v1659_v25  ;;  %3025 = vmatprep.subr.bf16.mxu0 %v3291_v1 }
 0x8f9   : > { %v3007_v27 = vpop.f32.mrf.mxu1 }
 0x8fa   : > { %3014 = vmatmul.mubr.msk.bf16.vlgmr.msra.gmra.mxu0 %vm774_vm1, %v1665_v24  ;;  %1889 = vrot.lane.b32.xlu1 %v3652_v26, %s3967_s29  ;;  %v1784_v28 = vsel %vm925_vm2, %v3652_v26, 0 }
 0x8fb   : > { %v1662_v29 = vpop.f32.mrf.mxu1  ;;  %3026 = vmatpush3.bf16.xpose.msra.mxu0 %v1784_v28  ;;  %3027 = vmatprep.mubr.msk.bf16.mxu0 %vm3292_vm0, %v3291_v1 }
 0x8fc   : > { %3037 = vmatprep.subr.bf16.mxu0 %v3291_v1 }
 0x8fd   : > { %v3008_v30 = vpop.f32.mrf.mxu1 }
 0x96c   : > { %v1890_v39 = vpop.permute.xlu1 %1889 }
 0x96d   : > { %v1895_v14 = vsel %vm925_vm2, %v1890_v39, 0  ;;  %v1604_v39 = vld [vmem:[%s3909_s13] sm:$0xf] }
 0x9b2   : > { %v1547_v32 = vpop.f32.mrf.mxu0 }
 0x9b3   : > { %v1553_v33 = vadd.f32 %v1547_v32, %v1395_v61 }
 0x9b4   : > { %v2999_v34 = vpop.f32.mrf.mxu0 }
 0x9b5   : > { %v1560_v35 = vadd.f32 %v2781_v31, %v1553_v33  ;;  %v1605_v33 = vld [vmem:[%s3909_s13 + $0x4] sm:$0xf] }
 0x9b6   : > { %v1550_v36 = vpop.f32.mrf.mxu0  ;;  %v2003_v34 = vsel %vm987_vm3, %v1605_v33, 0 }
 0x9b7   : > { %v1563_v37 = vadd.f32 %v1560_v35, %v3490_v4 }
 0x9b8   : > { %v3000_v38 = vpop.f32.mrf.mxu0 }
 0x9b9   : > { %v1564_v40 = vsel %vm774_vm1, %v1563_v37, 0.0 }
 0x9ba   : > { %v1715_v41 = vpop.f32.mrf.mxu0  ;;  %1565 = vadd.xlane.f32.xlu1 %v1564_v40 }
 0x9bb   : > { %v3668_v8 = vpack.c.bf16 %v1715_v41, %v1715_v41 }
 0x9bc   : > { %v3015_v43 = vpop.f32.mrf.mxu0 }
 0x9bd   : > { %1886 = vrot.lane.b32.xlu0 %v3668_v8, %s3967_s29  ;;  %3028 = vmatmul.mubr.msk.bf16.vlgmr.msra.gmra.mxu0 %vm925_vm2, %v3668_v8 }
 0x9be   : > { %v1718_v44 = vpop.f32.mrf.mxu0  ;;  %3038 = vmatpush3.bf16.xpose.msra.mxu0 %v1895_v14  ;;  %3039 = vmatprep.mubr.msk.bf16.mxu0 %vm3292_vm0, %v3291_v1  ;;  %v2049_v14 = vsel %vm987_vm3, %v1604_v39, 0 }
 0x9bf   : > { %3049 = vmatprep.subr.bf16.mxu0 %v3291_v1 }
 0x9c0   : > { %v3016_v4 = vpop.f32.mrf.mxu0 }
 0xa2f   : > { %v1887_v45 = vpop.permute.xlu0 %1886 }
 0xa30   : > { %3040 = vmatmul.mubr.msk.bf16.vlgmr.msra.gmra.mxu0 %vm925_vm2, %v1887_v45 }
 0xa31   : > { %3051 = vmatprep.mubr.msk.bf16.mxu0 %vm3292_vm0, %v3291_v1  ;;  %3050 = vmatpush3.bf16.msra.mxu0 %v2003_v34 }
 0xa32   : > { %3061 = vmatprep.subr.bf16.mxu0 %v3291_v1 }
 0xa43   : > { %v1566_v46 = vpop.xlane.xlu1 %1565 }
 0xa44   : > { %v1568_v47 = vmul.f32 0.03125, %v1566_v46 }
 0xa46   : > { %v1569_v48 = vsub.f32 %v1563_v37, %v1568_v47 }
 0xa48   : > { %v1570_v49 = vmul.f32 %v1569_v48, %v1569_v48 }
 0xa4a   : > { %v1571_v50 = vsel %vm774_vm1, %v1570_v49, 0.0 }
 0xa4b   : > { %1572 = vadd.xlane.f32.xlu0 %v1571_v50 }
 0xa61   : > { %2093 = vrot.lane.b32.xlu0 %v3652_v26, %s3969_s4 }
 0xa7d   : > { %v1820_v53 = vpop.f32.mrf.mxu0 }
 0xa7e   : > { %v1826_v54 = vsel %vm925_vm2, %v1820_v53, -inf }
 0xa7f   : > { %1827 = vmax.xlane.f32.xlu1 %v1826_v54  ;;  %v3029_v55 = vpop.f32.mrf.mxu0 }
 0xa81   : > { %v1823_v56 = vpop.f32.mrf.mxu0 }
 0xa83   : > { %v3030_v57 = vpop.f32.mrf.mxu0 }
 0xad4   : > { %v1573_v58 = vpop.xlane.xlu0 %1572 }
 0xad5   : > { %v1574_v59 = vmul.f32 0.03125, %v1573_v58 }
 0xad7   : > { %v1575_v60 = vadd.f32 1e-05, %v1574_v59 }
 0xad8   : > { %v2094_v47 = vpop.permute.xlu0 %2093 }
 0xad9   : > { %3207 = vrsqrt.f32 %v1575_v60  ;;  %v2099_v51 = vsel %vm925_vm2, %v2094_v47, 0 }
 0xae6   : > { %v3208_v61 = vpop.eup %3207 }
 0xae7   : > { %v1577_v63 = vmul.f32 %v3208_v61, %v1569_v48 }
 0xae9   : > { %v1584_v2 = vmul.f32 %v2782_v62, %v1577_v63 }
 0xaeb   : > { %v3699_v3 = vadd.f32 %v2783_v0, %v1584_v2 }
 0xaed   : > { %v1721_v5 = vpack.c.bf16 %v3699_v3, %v3699_v3 }
 0xaef   : > { %3022 = vmatmul.mubr.msk.bf16.vlgmr.msra.gmra.mxu1 %vm774_vm1, %v1721_v5 }
 0xaf0   : > { %v1931_v42 = vpop.f32.mrf.mxu0  ;;  %3033 = vmatprep.mubr.msk.bf16.mxu1 %vm3292_vm0, %v3291_v1 }
 0xaf1   : > { %v1937_v6 = vsel %vm925_vm2, %v1931_v42, -inf }
 0xaf2   : > { %1938 = vmax.xlane.f32.xlu1 %v1937_v6  ;;  %v3041_v7 = vpop.f32.mrf.mxu0 }
 0xaf4   : > { %v1934_v9 = vpop.f32.mrf.mxu0 }
 0xaf6   : > { %v3042_v10 = vpop.f32.mrf.mxu0 }
 0xb08   : > { %v1828_v11 = vpop.xlane.xlu1 %1827 }
 0xb09   : > { %v1829_v12 = vsub.f32 %v1820_v53, %v1828_v11 }
 0xb0b   : > { %v1830_v13 = vmul.f32 1.442695, %v1829_v12 }
 0xb0d   : > { %3209 = vpow2.f32 %v1830_v13 }
 0xb1a   : > { %v3210_v15 = vpop.eup %3209 }
 0xb1b   : > { %v1832_v16 = vsel %vm925_vm2, %v3210_v15, 0.0 }
 0xb1c   : > { %1833 = vadd.xlane.f32.xlu1 %v1832_v16 }
 0xb7b   : > { %v1939_v17 = vpop.xlane.xlu1 %1938 }
 0xb7c   : > { %v1940_v18 = vsub.f32 %v1931_v42, %v1939_v17 }
 0xb7e   : > { %v1941_v19 = vmul.f32 1.442695, %v1940_v18 }
 0xb80   : > { %3211 = vpow2.f32 %v1941_v19 }
 0xb8d   : > { %v3212_v20 = vpop.eup %3211 }
 0xb8e   : > { %v1943_v21 = vsel %vm925_vm2, %v3212_v20, 0.0 }
 0xb8f   : > { %1944 = vadd.xlane.f32.xlu1 %v1943_v21 }
 0xba5   : > { %v1834_v22 = vpop.xlane.xlu1 %1833 }
 0xba6   : > { %3213 = vrcp.f32 %v1834_v22 }
 0xbaf   : > { %v1771_v23 = vpop.f32.mrf.mxu1 }
 0xbb0   : > { %v3709_v24 = vpack.c.bf16 %v1771_v23, %v1771_v23 }
 0xbb1   : > { %v3023_v25 = vpop.f32.mrf.mxu1 }
 0xbb2   : > { %1950 = vrot.lane.b32.xlu1 %v3709_v24, %s3967_s29  ;;  %v1842_v27 = vsel %vm987_vm3, %v3709_v24, 0  ;;  %s2824_s29 = sshll.u32 %s3438_s5, 7  ;;  %s3235_s5 = scalar_lea.vmem %s3234_s26, 256 }
 0xbb3   : > { %v3214_v28 = vpop.eup %3213  ;;  %v1774_v29 = vpop.f32.mrf.mxu1  ;;  %3032 = vmatpush3.bf16.msra.mxu1 %v1842_v27  ;;  %s2667_s10 = scalar_lea.hbm %s3919_s23, %s2824_s29 }
 0xbb4   : > { %v1836_v30 = vmul.f32 %v3214_v28, %v3210_v15  ;;  %3043 = vmatprep.subr.bf16.mxu1 %v3291_v1 }
 0xbb5   : > { %v3024_v31 = vpop.f32.mrf.mxu1 }
 0xbb6   : > { %2091 = vrot.lane.b32.xlu1 %v3668_v8, %s3969_s4  ;;  %v1837_v32 = vpack.c.bf16 %v1836_v30, %v1836_v30 }
 0xbb8   : > { %3034 = vmatmul.mubr.msk.bf16.vlgmr.msra.gmra.mxu1 %vm925_vm2, %v1837_v32 }
 0xbb9   : > { %3045 = vmatprep.mubr.msk.bf16.mxu1 %vm3292_vm0, %v3291_v1 }
 0xc18   : > { %v1945_v35 = vpop.xlane.xlu1 %1944 }
 0xc19   : > { %3215 = vrcp.f32 %v1945_v35 }
 0xc24   : > { %v1951_v36 = vpop.permute.xlu1 %1950 }
 0xc25   : > { %v1956_v37 = vsel %vm987_vm3, %v1951_v36, 0 }
 0xc26   : > { %v3216_v38 = vpop.eup %3215  ;;  %3044 = vmatpush3.bf16.msra.mxu1 %v1956_v37 }
 0xc27   : > { %v1947_v40 = vmul.f32 %v3216_v38, %v3212_v20  ;;  %3055 = vmatprep.subr.bf16.mxu1 %v3291_v1 }
 0xc28   : > { %v2092_v54 = vpop.permute.xlu1 %2091 }
 0xc29   : > { %v1948_v41 = vpack.c.bf16 %v1947_v40, %v1947_v40 }
 0xc2b   : > { %3046 = vmatmul.mubr.msk.bf16.vlgmr.msra.gmra.mxu1 %vm925_vm2, %v1948_v41  ;;  %v1607_v41 = vld [vmem:[%s3909_s13 + $0xc] sm:$0xf] }
 0xc2c   : > { %3056 = vmatpush3.bf16.msra.mxu1 %v2049_v14  ;;  %3057 = vmatprep.mubr.msk.bf16.mxu1 %vm3292_vm0, %v3291_v1 }
 0xc2d   : > { %3067 = vmatprep.subr.bf16.mxu1 %v3291_v1 }
 0xc78   : > { %v1878_v43 = vpop.f32.mrf.mxu1 }
 0xc79   : > { %v1884_v44 = vpack.c.bf16 %v1878_v43, %v1878_v43  ;;  %v2364_v43 = vsel %vm987_vm3, %v1607_v41, 0 }
 0xc7a   : > { %v3035_v4 = vpop.f32.mrf.mxu1 }
 0xc7b   : > { %3058 = vmatmul.mubr.msk.bf16.vlgmr.msra.gmra.mxu1 %vm925_vm2, %v1884_v44 }
 0xc7c   : > { %v1881_v45 = vpop.f32.mrf.mxu1  ;;  %3069 = vmatprep.mubr.msk.bf16.mxu1 %vm3292_vm0, %v3291_v1 }
 0xc7e   : > { %v3036_v46 = vpop.f32.mrf.mxu1 }
 0xceb   : > { %v1992_v48 = vpop.f32.mrf.mxu1 }
 0xcec   : > { %v1998_v49 = vpack.c.bf16 %v1992_v48, %v1992_v48 }
 0xced   : > { %v3047_v50 = vpop.f32.mrf.mxu1 }
 0xcee   : > { %3052 = vmatmul.mubr.msk.bf16.vlgmr.msra.gmra.mxu0 %vm925_vm2, %v1998_v49 }
 0xcef   : > { %3062 = vmatpush3.bf16.xpose.msra.mxu0 %v2099_v51  ;;  %v1995_v52 = vpop.f32.mrf.mxu1  ;;  %3063 = vmatprep.mubr.msk.bf16.mxu0 %vm3292_vm0, %v3291_v1 }
 0xcf0   : > { %3073 = vmatprep.subr.bf16.mxu0 %v3291_v1 }
 0xcf1   : > { %v3048_v53 = vpop.f32.mrf.mxu1 }
 0xcf6   : > { %3064 = vmatmul.mubr.msk.bf16.vlgmr.msra.gmra.mxu0 %vm925_vm2, %v2092_v54 }
 0xcf7   : > { %3075 = vmatprep.mubr.msk.bf16.mxu0 %vm3292_vm0, %v3291_v1 }
 0xd3b   : > { %v3747_v55 = vpop.f32.mrf.mxu1 }
 0xd3d   : > { %v3059_v56 = vpop.f32.mrf.mxu1 }
 0xd3e   : > { %v2805_v56 = vld [vmem:[%s3910_s14] ss:$0 sm:$0xff] }
 0xd3f   : > { %v2088_v57 = vpop.f32.mrf.mxu1 }
 0xd41   : > { %v3060_v58 = vpop.f32.mrf.mxu1 }
 0xdae   : > { %v3749_v59 = vpop.f32.mrf.mxu0 }
 0xdaf   : > { %v2086_v39 = vadd.f32 %v3747_v55, %v3749_v59 }
 0xdb0   : > { %v3053_v60 = vpop.f32.mrf.mxu0 }
 0xdb2   : > { %v2042_v61 = vpop.f32.mrf.mxu0 }
 0xdb4   : > { %v3054_v62 = vpop.f32.mrf.mxu0 }
 0xdb6   : > { %v2135_v63 = vpop.f32.mrf.mxu0 }
 0xdb7   : > { %v2141_v0 = vsel %vm925_vm2, %v2135_v63, -inf }
 0xdb8   : > { %2142 = vmax.xlane.f32.xlu1 %v2141_v0  ;;  %v3065_v2 = vpop.f32.mrf.mxu0 }
 0xdba   : > { %v2138_v5 = vpop.f32.mrf.mxu0 }
 0xdbc   : > { %v3066_v42 = vpop.f32.mrf.mxu0 }
 0xdc9   : > { %2153 = vrot.lane.b32.xlu1 %v3709_v24, %s3969_s4 }
 0xdcd   : > { %2249 = vrot.lane.b32.xlu1 %v3668_v8, %s3972_s2 }
 0xe41   : > { %v2143_v6 = vpop.xlane.xlu1 %2142 }
 0xe42   : > { %v2144_v7 = vsub.f32 %v2135_v63, %v2143_v6 }
 0xe44   : > { %v2145_v9 = vmul.f32 1.442695, %v2144_v7 }
 0xe45   : > { %v2154_v10 = vpop.permute.xlu1 %2153 }
 0xe46   : > { %3217 = vpow2.f32 %v2145_v9  ;;  %v2159_v11 = vsel %vm987_vm3, %v2154_v10, 0  ;;  %v3181_v9 = vld [vmem:[%s3913_s17 + $0x8] sm:$0xff]   ;;  %v3183_v10 = vld [vmem:[%s3915_s19 + $0x38] sm:$0xff]  }
 0xe47   : > { %3068 = vmatpush3.bf16.msra.mxu1 %v2159_v11  ;;  %v3184_v11 = vld [vmem:[%s3915_s19 + $0x30] sm:$0xff]  }
 0xe48   : > { %3079 = vmatprep.subr.bf16.mxu1 %v3291_v1 }
 0xe49   : > { %v2250_v20 = vpop.permute.xlu1 %2249 }
 0xe53   : > { %v3218_v12 = vpop.eup %3217 }
 0xe54   : > { %v2147_v13 = vsel %vm925_vm2, %v3218_v12, 0.0 }
 0xe55   : > { %2148 = vadd.xlane.f32.xlu0 %v2147_v13  ;;  %v3186_v13 = vld [vmem:[%s3915_s19 + $0x20] sm:$0xff]  }
 0xe6b   : > { %2251 = vrot.lane.b32.xlu0 %v3652_v26, %s3972_s2  ;;  %v1606_v26 = vld [vmem:[%s3909_s13 + $0x8] sm:$0xf] }
 0xe6c   : > { %v2206_v21 = vsel %vm987_vm3, %v1606_v26, 0 }
 0xe6d   : > { %3074 = vmatpush3.bf16.msra.mxu0 %v2206_v21  ;;  %v2807_v21 = vld [vmem:[%s3912_s16] ss:$0 sm:$0xff] }
 0xe6e   : > { %3085 = vmatprep.subr.bf16.mxu0 %v3291_v1 }
 0xede   : > { %v2149_v15 = vpop.xlane.xlu0 %2148 }
 0xedf   : > { %3219 = vrcp.f32 %v2149_v15  ;;  %v3187_v15 = vld [vmem:[%s3915_s19 + $0x18] sm:$0xff]  }
 0xee2   : > { %v2252_v17 = vpop.permute.xlu0 %2251 }
 0xee3   : > { %v2257_v19 = vsel %vm925_vm2, %v2252_v17, 0 }
 0xeec   : > { %v3220_v8 = vpop.eup %3219 }
 0xeed   : > { %v2151_v16 = vmul.f32 %v3220_v8, %v3218_v12  ;;  %v3185_v12 = vld [vmem:[%s3915_s19 + $0x28] sm:$0xff]   ;;  %v3188_v8 = vld [vmem:[%s3915_s19 + $0x10] sm:$0xff]  }
 0xeef   : > { %v2152_v18 = vpack.c.bf16 %v2151_v16, %v2151_v16 }
 0xef1   : > { %3070 = vmatmul.mubr.msk.bf16.vlgmr.msra.gmra.mxu1 %vm925_vm2, %v2152_v18 }
 0xef2   : > { %3080 = vmatpush3.bf16.xpose.msra.mxu1 %v2257_v19  ;;  %3081 = vmatprep.mubr.msk.bf16.mxu1 %vm3292_vm0, %v3291_v1 }
 0xef3   : > { %3091 = vmatprep.subr.bf16.mxu1 %v3291_v1 }
 0xef9   : > { %3082 = vmatmul.mubr.msk.bf16.vlgmr.msra.gmra.mxu1 %vm925_vm2, %v2250_v20  ;;  %v2806_v20 = vld [vmem:[%s3911_s15] ss:$0 sm:$0xff] }
 0xefa   : > { %3093 = vmatprep.mubr.msk.bf16.mxu1 %vm3292_vm0, %v3291_v1  ;;  %3092 = vmatpush3.bf16.msra.mxu1 %v2364_v43 }
 0xefb   : > { %3105 = vmatprep.subr.bf16.mxu1 %v3291_v1 }
 0xfb1   : > { %v2195_v22 = vpop.f32.mrf.mxu1 }
 0xfb2   : > { %v2201_v23 = vpack.c.bf16 %v2195_v22, %v2195_v22 }
 0xfb3   : > { %v3071_v25 = vpop.f32.mrf.mxu1 }
 0xfb4   : > { %3076 = vmatmul.mubr.msk.bf16.vlgmr.msra.gmra.mxu0 %vm925_vm2, %v2201_v23 }
 0xfb5   : > { %v2198_v27 = vpop.f32.mrf.mxu1  ;;  %3087 = vmatprep.mubr.msk.bf16.mxu0 %vm3292_vm0, %v3291_v1 }
 0xfb6   : > { %v3189_v27 = vld [vmem:[%s3915_s19 + $0x8] sm:$0xff]  }
 0xfb7   : > { %v3072_v28 = vpop.f32.mrf.mxu1 }
 0xfb8   : > { %v3190_v28 = vld [vmem:[%s3915_s19] sm:$0xff]  }
 0xfb9   : > { %v2293_v29 = vpop.f32.mrf.mxu1 }
 0xfba   : > { %v2299_v30 = vsel %vm925_vm2, %v2293_v29, -inf }
 0xfbb   : > { %2300 = vmax.xlane.f32.xlu1 %v2299_v30  ;;  %v3083_v31 = vpop.f32.mrf.mxu1 }
 0xfbd   : > { %v2296_v32 = vpop.f32.mrf.mxu1 }
 0xfbf   : > { %v3084_v33 = vpop.f32.mrf.mxu1 }
0x1044   : > { %v2301_v34 = vpop.xlane.xlu1 %2300 }
0x1045   : > { %v2302_v35 = vsub.f32 %v2293_v29, %v2301_v34  ;;  %v2808_v29 = vld [vmem:[%s3914_s18] ss:$0 sm:$0xff] }
0x1047   : > { %v2303_v36 = vmul.f32 1.442695, %v2302_v35 }
0x1049   : > { %3221 = vpow2.f32 %v2303_v36 }
0x1056   : > { %v3222_v37 = vpop.eup %3221 }
0x1057   : > { %v2305_v38 = vsel %vm925_vm2, %v3222_v37, 0.0 }
0x1058   : > { %2306 = vadd.xlane.f32.xlu0 %v2305_v38 }
0x106e   : > { %2311 = vrot.lane.b32.xlu0 %v3709_v24, %s3972_s2  ;;  %s2756_s2 = sshll.u32 %s725_s3, 3 }
0x106f   : > { %s727_s24 = scalar_lea.vmem [#allocation2], %s2756_s2 }
0x1070   : > { %s2669_s0 = sshll.u32 %s727_s24, 4  ;;  %s2670_s0 = int_to_ptr.vmem [resolvable:$true] %s2669_s0 }
0x1071   : > { %s3229_s4 = scalar_lea.vmem %s2670_s0, 128  ;;  %p3236_p0 = scmp.lt.s32.totalorder %s2670_s0, %s3234_s26 }
0x1072   : > { %p3230_p11 = scmp.ne.s32.totalorder %s2670_s0, %s3229_s4  ;;  %p3237_p1 = scmp.lt.s32.totalorder %s3235_s5, %s3229_s4 }
0x1074   : > { %v2242_v40 = vpop.f32.mrf.mxu0  ;;  %p3231_p12 = pnand %p3230_p11, %p3455_p5  ;;  %p3238_p2 = por %p3237_p1, %p3236_p0 }
0x1075   : > { %v2248_v14 = vadd.f32 %v2242_v40, %v2086_v39 }
0x1076   : > { %v3077_v44 = vpop.f32.mrf.mxu0  ;;  %p3232_p13 = pneg %p3231_p12 }
0x1078   : > { %v2245_v4 = vpop.f32.mrf.mxu0  ;;  %p3239_p3 = pnand %p3238_p2, %p3232_p13 }
0x107a   : > { %v3078_v45 = vpop.f32.mrf.mxu0 }
0x10e1   : > { %v2307_v46 = vpop.xlane.xlu0 %2306 }
0x10e2   : > { %3223 = vrcp.f32 %v2307_v46 }
0x10e5   : > { %v2312_v24 = vpop.permute.xlu0 %2311 }
0x10e6   : > { %v2317_v47 = vsel %vm987_vm3, %v2312_v24, 0 }
0x10e7   : > { %3086 = vmatpush3.bf16.msra.mxu0 %v2317_v47 }
0x10e8   : > { %3097 = vmatprep.subr.bf16.mxu0 %v3291_v1 }
0x10ef   : > { %v3224_v48 = vpop.eup %3223 }
0x10f0   : > { %v2309_v49 = vmul.f32 %v3224_v48, %v3222_v37 }
0x10f2   : > { %v2310_v50 = vpack.c.bf16 %v2309_v49, %v2309_v49 }
0x10f4   : > { %3088 = vmatmul.mubr.msk.bf16.vlgmr.msra.gmra.mxu0 %vm925_vm2, %v2310_v50 }
0x10f5   : > { %3101 = vmatprep.mubr.msk.bf16.mxu0 %vm3292_vm0, %v3291_v1  ;;  %3098 = vmatpush3.bf16.msra.mxu0 %v3181_v9 }
0x10f6   : > { %3099 = vmatprep.subr.bf16.mxu0 %v3291_v1 }
0x11b4   : > { %v2353_v51 = vpop.f32.mrf.mxu0 }
0x11b5   : > { %v2359_v52 = vpack.c.bf16 %v2353_v51, %v2353_v51  ;;  %v2821_v51 = vld [vmem:[%s3917_s21] ss:$0 sm:$0xff] }
0x11b6   : > { %v3089_v53 = vpop.f32.mrf.mxu0 }
0x11b7   : > { %3094 = vmatmul.mubr.msk.bf16.vlgmr.msra.gmra.mxu1 %vm925_vm2, %v2359_v52  ;;  %v2822_v53 = vld [vmem:[%s3918_s22] ss:$0 sm:$0xff] }
0x11b8   : > { %v2356_v54 = vpop.f32.mrf.mxu0  ;;  %3121 = vmatprep.mubr.msk.bf16.mxu1 %vm3292_vm0, %v3291_v1  ;;  %3106 = vmatpush3.bf16.msra.mxu1 %v3183_v10 }
0x11b9   : > { %3107 = vmatprep.subr.bf16.mxu1 %v3291_v1 }
0x11ba   : > { %v3090_v55 = vpop.f32.mrf.mxu0 }
0x11bc   : > { %3108 = vmatpush3.bf16.msra.mxu1 %v3184_v11 }
0x11bd   : > { %3109 = vmatprep.subr.bf16.mxu1 %v3291_v1 }
0x11c0   : > { %3110 = vmatpush3.bf16.msra.mxu1 %v3185_v12 }
0x11c1   : > { %3111 = vmatprep.subr.bf16.mxu1 %v3291_v1 }
0x11c4   : > { %3112 = vmatpush3.bf16.msra.mxu1 %v3186_v13 }
0x11c5   : > { %3113 = vmatprep.subr.bf16.mxu1 %v3291_v1 }
0x11c8   : > { %3114 = vmatpush3.bf16.msra.mxu1 %v3187_v15 }
0x11c9   : > { %3115 = vmatprep.subr.bf16.mxu1 %v3291_v1 }
0x11cc   : > { %3116 = vmatpush3.bf16.msra.mxu1 %v3188_v8 }
0x11cd   : > { %3117 = vmatprep.subr.bf16.mxu1 %v3291_v1 }
0x11d0   : > { %3118 = vmatpush3.bf16.msra.mxu1 %v3189_v27 }
0x11d1   : > { %3119 = vmatprep.subr.bf16.mxu1 %v3291_v1  ;;  %v2812_v1 = vld [vmem:[%s3916_s20] ss:$0 sm:$0xff] }
0x11d4   : > { %3120 = vmatpush3.bf16.msra.mxu1 %v3190_v28 }
0x1277   : > { %v2400_v57 = vpop.f32.mrf.mxu1 }
0x1278   : > { %v2406_v58 = vadd.f32 %v2400_v57, %v2248_v14 }
0x1279   : > { %v3095_v59 = vpop.f32.mrf.mxu1 }
0x127a   : > { %v2413_v60 = vadd.f32 %v2805_v56, %v2406_v58 }
0x127b   : > { %v2403_v61 = vpop.f32.mrf.mxu1 }
0x127c   : > { %v2416_v62 = vadd.f32 %v2413_v60, %v3699_v3  ;;  %v3182_v3 = vld [vmem:[%s3913_s17] sm:$0xff]  }
0x127d   : > { %v3096_v63 = vpop.f32.mrf.mxu1  ;;  %3100 = vmatpush3.bf16.msra.mxu0 %v3182_v3 }
0x127e   : > { %v2417_v0 = vsel %vm774_vm1, %v2416_v62, 0.0 }
0x127f   : > { %2418 = vadd.xlane.f32.xlu1 %v2417_v0 }
0x1308   : > { %v2419_v2 = vpop.xlane.xlu1 %2418 }
0x1309   : > { %v2420_v5 = vmul.f32 0.03125, %v2419_v2 }
0x130b   : > { %v2421_v42 = vsub.f32 %v2416_v62, %v2420_v5 }
0x130d   : > { %v2422_v6 = vmul.f32 %v2421_v42, %v2421_v42 }
0x130f   : > { %v2423_v7 = vsel %vm774_vm1, %v2422_v6, 0.0 }
0x1310   : > { %2424 = vadd.xlane.f32.xlu1 %v2423_v7 }
0x1399   : > { %v2425_v16 = vpop.xlane.xlu1 %2424 }
0x139a   : > { %v2426_v17 = vmul.f32 0.03125, %v2425_v16 }
0x139c   : > { %v2427_v18 = vadd.f32 1e-05, %v2426_v17 }
0x139e   : > { %3225 = vrsqrt.f32 %v2427_v18 }
0x13ab   : > { %v3226_v19 = vpop.eup %3225 }
0x13ac   : > { %v2429_v26 = vmul.f32 %v3226_v19, %v2421_v42 }
0x13ae   : > { %v2436_v22 = vmul.f32 %v2806_v20, %v2429_v26 }
0x13b0   : > { %v2443_v23 = vadd.f32 %v2807_v21, %v2436_v22 }
0x13b2   : > { %v2466_v25 = vpack.c.bf16 %v2443_v23, %v2443_v23 }
0x13b4   : > { %3102 = vmatmul.mubr.msk.bf16.vlgmr.msra.gmra.mxu0 %vm774_vm1, %v2466_v25 }
0x1474   : > { %v2522_v30 = vpop.f32.mrf.mxu0 }
0x1475   : > { %v2523_v31 = vadd.f32 %v2808_v29, %v2522_v30 }
0x1476   : > { %v3103_v32 = vpop.f32.mrf.mxu0 }
0x1477   : > { %v2528_v33 = vmax.f32 %v2523_v31, 0.0 }
0x1478   : > { %v2525_v34 = vpop.f32.mrf.mxu0 }
0x1479   : > { %v2529_v35 = vpack.c.bf16 %v2528_v33, %v2528_v33 }
0x147a   : > { %v3104_v36 = vpop.f32.mrf.mxu0 }
0x147b   : > { %3122 = vmatmul.mubr.bf16.vlgmr.msra.gmra.mxu1 %v2529_v35 }
0x153b   : > { %v2618_v37 = vpop.f32.mrf.mxu1 }
0x153c   : > { %v2619_v38 = vadd.f32 %v2812_v1, %v2618_v37 }
0x153d   : > { %v3123_v39 = vpop.f32.mrf.mxu1 }
0x153e   : > { %v2626_v40 = vadd.f32 %v2619_v38, %v2443_v23 }
0x153f   : > { %v2621_v41 = vpop.f32.mrf.mxu1 }
0x1540   : > { %v2627_v14 = vsel %vm774_vm1, %v2626_v40, 0.0 }
0x1541   : > { %2628 = vadd.xlane.f32.xlu1 %v2627_v14  ;;  %v3124_v43 = vpop.f32.mrf.mxu1 }
0x15ca   : > { %v2629_v44 = vpop.xlane.xlu1 %2628 }
0x15cb   : > { %v2630_v4 = vmul.f32 0.03125, %v2629_v44 }
0x15cd   : > { %v2631_v45 = vsub.f32 %v2626_v40, %v2630_v4 }
0x15cf   : > { %v2632_v46 = vmul.f32 %v2631_v45, %v2631_v45 }
0x15d1   : > { %v2633_v24 = vsel %vm774_vm1, %v2632_v46, 0.0 }
0x15d2   : > { %2634 = vadd.xlane.f32.xlu1 %v2633_v24 }
0x165b   : > { %v2635_v47 = vpop.xlane.xlu1 %2634 }
0x165c   : > { %v2636_v48 = vmul.f32 0.03125, %v2635_v47 }
0x165e   : > { %v2637_v49 = vadd.f32 1e-05, %v2636_v48 }
0x1660   : > { %3227 = vrsqrt.f32 %v2637_v49 }
0x166d   : > { %v3228_v50 = vpop.eup %3227 }
0x166e   : > { %v2639_v52 = vmul.f32 %v3228_v50, %v2631_v45 }
0x1670   : > { %v2646_v54 = vmul.f32 %v2821_v51, %v2639_v52 }
0x1672   : > { %v2653_v55 = vadd.f32 %v2822_v53, %v2646_v54 }
0x1674   : > { %2654 = vst.msk [vmem:[%s727_s24] sm:$0xff] %vm774_vm1, %v2653_v55 }
0x1675   : > { %3242 = shalt.err (!%p3239_p3)
}
0x1676   : > { %s3243_s8 = scalar_lea.hbm %s2667_s10, 128  ;;  %s3247_s2 = scalar_lea.hbm %s3919_s23, 256 }
0x1677   : > { %p3244_p4 = scmp.ne.s32.totalorder %s2667_s10, %s3243_s8  ;;  %p3248_p9 = scmp.lt.s32.totalorder %s2667_s10, %s3919_s23 }
0x1678   : > { %p3249_p10 = scmp.lt.s32.totalorder %s3247_s2, %s3243_s8 }
0x1679   : > { %p3245_p7 = pnand %p3244_p4, %p3455_p5 }
0x167a   : > { %p3250_p11 = por %p3249_p10, %p3248_p9 }
0x167b   : > { %p3246_p8 = pneg %p3245_p7 }
0x167d   : > { %p3251_p12 = pnand %p3250_p11, %p3246_p8 }
0x167f   : > { %3254 = shalt.err (!%p3251_p12)
}
0x1680   : > { %3125 = dma.vmem_to_hbm [thread:$0]  (%p3455_p5), %s2670_s0, 128, %s2667_s10, %s2656_s11  }
0x1681 PF: > { %s3973_s24 = sld [smem:[#allocation5_spill]]  ;;  %p3131_p13 = scmp.ge.s32.totalorder %s3289_s25, 2 }
0x1683   : > { %p3128_p0 = pnand %p3131_p13, %p3459_p6 }
0x1685   : > { %p3129_p1 = pneg %p3128_p0 }
0x1687   : > { %s2681_s6 = sand.u32 1, %s3973_s24  }
0x1688   : > { %s2682_s26 = scalar_lea.sflag [#allocation3], %s2681_s6 }
0x1689   : > { %3272 = dma.done.wait (%p3129_p1), %s2682_s26, 128  }
0x168a   : > { %3274 = vsyncadd (%p3129_p1), %s2682_s26, 4294967168  ;;  %s3975_s25 = sld [smem:[#allocation7_spill]]  ;;  %s3978_s4 = smov %s3281_s30 }
0x168b   : > { %s3976_s5 = sld [smem:[#allocation6_spill]] }
0x168c   : > { %s3977_s24 = sld [smem:[#allocation8_spill]] }
0x1690   : > { %p33_p2 = scmp.ge.s32.totalorder %s3975_s25, 4  }
0x1691   : > { %s3979_s30 = smov %s3976_s5 }
0x1692   :  { %35 = sbr.rel (!%p33_p2) target bundleno = 16 (0x10), region = 153 }
0x1697   :  { %2687 = vsyncpa [#allocation3], 1 }
0x1698   :  { %2689 = vsyncpa [#allocation3 + $0x1], 1 }

// kernel: decoder_forward.2
= control target key start
LH: loop header
LB: loop body
LE: loop exit
PB: predicated region body
PF: predicated region fallthrough
CT: control target
= control target key end

     0   :  { %s3720_s0 = inlined_call_operand.vmem [shape: f32[2,8,32], index: 0, kind: input, shape index: {}, may-alias: {0,2}]   ;;  %s3721_s1 = inlined_call_operand.vmem [shape: f32[2,8,32], index: 1, kind: input, shape index: {}]   ;;  %s3722_s2 = inlined_call_operand.vmem [shape: f32[2,8,32], index: 2, kind: input, shape index: {}, may-alias: {0,2}]   ;;  %s3723_s3 = inlined_call_operand.vmem [shape: bf16[32,32], index: 3, kind: input, shape index: {}]   ;;  %s3724_s4 = inlined_call_operand.vmem [shape: bf16[32,32], index: 4, kind: input, shape index: {}]   ;;  %s3725_s5 = inlined_call_operand.vmem [shape: bf16[32,32], index: 5, kind: input, shape index: {}]   ;;  %s3726_s6 = inlined_call_operand.vmem [shape: bf16[32,32], index: 6, kind: input, shape index: {}]   ;;  %s3727_s7 = inlined_call_operand.vmem [shape: f32[1,32], index: 7, kind: input, shape index: {}]   ;;  %s3728_s8 = inlined_call_operand.vmem [shape: f32[1,32], index: 8, kind: input, shape index: {}]   ;;  %s3729_s9 = inlined_call_operand.vmem [shape: f32[1,32], index: 9, kind: input, shape index: {}]   ;;  %s3730_s10 = inlined_call_operand.vmem [shape: bf16[32,32], index: 10, kind: input, shape index: {}]   ;;  %s3731_s11 = inlined_call_operand.vmem [shape: bf16[32,32], index: 11, kind: input, shape index: {}]   ;;  %s3732_s12 = inlined_call_operand.vmem [shape: bf16[32,32], index: 12, kind: input, shape index: {}]   ;;  %s3733_s13 = inlined_call_operand.vmem [shape: bf16[32,32], index: 13, kind: input, shape index: {}]   ;;  %s3734_s14 = inlined_call_operand.vmem [shape: f32[1,32], index: 14, kind: input, shape index: {}]   ;;  %s3735_s15 = inlined_call_operand.vmem [shape: f32[1,32], index: 15, kind: input, shape index: {}]   ;;  %s3736_s16 = inlined_call_operand.vmem [shape: f32[1,32], index: 16, kind: input, shape index: {}]   ;;  %s3737_s17 = inlined_call_operand.vmem [shape: bf16[32,128], index: 17, kind: input, shape index: {}]   ;;  %s3738_s18 = inlined_call_operand.vmem [shape: f32[1,128], index: 18, kind: input, shape index: {}]   ;;  %s3739_s19 = inlined_call_operand.vmem [shape: bf16[128,32], index: 19, kind: input, shape index: {}]   ;;  %s3740_s20 = inlined_call_operand.vmem [shape: f32[1,32], index: 20, kind: input, shape index: {}]   ;;  %s3741_s21 = inlined_call_operand.vmem [shape: f32[1,32], index: 21, kind: input, shape index: {}]   ;;  %s3742_s22 = inlined_call_operand.vmem [shape: f32[1,32], index: 22, kind: input, shape index: {}]   ;;  %s3743_s23 = inlined_call_operand.vmem [shape: f32[2,8,32], index: 23, kind: output, shape index: {}]  }
   0x1   :  { %3752 = sst [smem:[#allocation2_spill]] %s3720_s0 }
   0x2   :  { %3753 = sst [smem:[#allocation3_spill]] %s3721_s1 }
   0x3   :  { %3754 = sst [smem:[#allocation4_spill]] %s3722_s2 }
   0x4   :  { %3755 = sst [smem:[#allocation5_spill]] %s3723_s3 }
   0x5   :  { %3756 = sst [smem:[#allocation6_spill]] %s3724_s4  ;;  %s3310_s4 = smov 0  }
   0x6   :  { %3757 = sst [smem:[#allocation7_spill]] %s3725_s5 }
   0x7   :  { %3758 = sst [smem:[#allocation8_spill]] %s3726_s6 }
   0x8   :  { %3759 = sst [smem:[#allocation9_spill]] %s3727_s7 }
   0x9 LB: > { %s2732_s30 = sadd.s32 4294967295, %s3183_s4   ;;  %p2736_p0 = scmp.ge.s32.totalorder %s3183_s4, 1  ;;  %s3183_s4 = sphi %s3310_s4, %s33_s4  }
   0xa   : > { %p654_p1 = scmp.lt.s32.totalorder %s3183_s4, 3 }
   0xc   : > { %p655_p2 = pnand %p2736_p0, %p654_p1 }
   0xd   : > { %s3760_s5 = sld [smem:[#allocation5_spill]] (!%p655_p2)  ;;  %p724_p3 = scmp.lt.s32.totalorder (!%p655_p2), %s2732_s30, 1 }
   0xe   : > { %658 = sbr.rel (%p655_p2) target bundleno = 5732 (0x1664), region = 112  ;;  %s3761_s7 = sld [smem:[#allocation6_spill]] (!%p655_p2) }
   0xf   : > { %s3762_s3 = sld [smem:[#allocation4_spill]] (!%p655_p2)  ;;  %s3187_s25 = smov (!%p655_p2), 120  }
  0x10   : > { %s3763_s6 = sld [smem:[#allocation7_spill]] (!%p655_p2)  ;;  %s3750_s29 = smov (!%p655_p2), 112  }
  0x11   : > { %s3764_s24 = sld [smem:[#allocation8_spill]] (!%p655_p2)  ;;  %s3748_s26 = smov (!%p655_p2), 104  }
  0x12   : > { %s3766_s27 = sld [smem:[#allocation3_spill]] (!%p655_p2) }
  0x13   : > { %v3117_v0 = vld [vmem:[%s3760_s5 + $0x8] sm:$0xff]   ;;  %v3185_v1 = vmov 0.0   ;;  %v3118_v2 = vld [vmem:[%s3760_s5] sm:$0xff]   ;;  %vm3186_vm0 = vmmov 0   ;;  %s3771_s30 = smov (!%p724_p3, %s2732_s30), 1  ;;  %vm774_vm1 = vcmask 261120  }
  0x14   : > { %2884 = vmatprep.subr.bf16.mxu0 %v3185_v1  ;;  %2908 = vmatprep.subr.bf16.mxu1 %v3185_v1  ;;  %s3331_s2 = sshll.u32 %s3771_s30, 3  ;;  %v3119_v3 = vld [vmem:[%s3761_s7 + $0x8] sm:$0xff]   ;;  %v3120_v6 = vld [vmem:[%s3761_s7] sm:$0xff]   ;;  %vm925_vm2 = vcmask 64512   ;;  %vm987_vm3 = vcmask 1043456   ;;  %s3769_s30 = smov 104  }
  0x15   : > { %2885 = vmatpush3.bf16.msra.mxu0 %v3117_v0  ;;  %2888 = vmatprep.mubr.msk.bf16.mxu0 %vm3186_vm0, %v3185_v1  ;;  %s735_s0 = scalar_lea.vmem %s3762_s3, %s3331_s2  ;;  %s3765_s3 = sld [smem:[#allocation2_spill]] }
  0x16   : > { %2886 = vmatprep.subr.bf16.mxu0 %v3185_v1  ;;  %2910 = vmatprep.mubr.msk.bf16.mxu1 %vm3186_vm0, %v3185_v1  ;;  %v3341_v4 = vld [vmem:[%s735_s0] sm:$0xff]  ;;  %v3121_v18 = vld [vmem:[%s3763_s6 + $0x8] sm:$0xff]  }
  0x17   : > { %v761_v5 = vpack.c.bf16 %v3341_v4, %v3341_v4  ;;  %v3122_v19 = vld [vmem:[%s3763_s6] sm:$0xff]  }
  0x18   : > { %v757_v53 = vld [vmem:[%s3764_s24 + $0x4] sm:$0xf]  ;;  %v756_v59 = vld [vmem:[%s3764_s24] sm:$0xf]  ;;  %s731_s28 = scalar_lea.vmem %s3766_s27, %s3331_s2 }
  0x19   : > { %2887 = vmatpush3.bf16.msra.mxu0 %v3118_v2  ;;  %v1150_v54 = vsel %vm987_vm3, %v757_v53, 0  ;;  %v1196_v62 = vsel %vm987_vm3, %v756_v59, 0 }
  0x1a   : > { %2892 = vmatprep.subr.bf16.mxu0 %v3185_v1 }
  0x1b   : > { %s727_s0 = scalar_lea.vmem %s3765_s3, %s3331_s2 }
  0x1c   : > { %2889 = vmatmul.mubr.msk.bf16.vlgmr.msra.gmra.mxu0 %vm774_vm1, %v761_v5 }
  0x1d   : > { %2893 = vmatpush3.bf16.msra.mxu0 %v3119_v3  ;;  %2896 = vmatprep.mubr.msk.bf16.mxu0 %vm3186_vm0, %v3185_v1 }
  0x1e   : > { %2894 = vmatprep.subr.bf16.mxu0 %v3185_v1 }
  0x21   : > { %2895 = vmatpush3.bf16.msra.mxu0 %v3120_v6 }
  0x22   : > { %2900 = vmatprep.subr.bf16.mxu0 %v3185_v1 }
  0x24   : > { %2897 = vmatmul.mubr.msk.bf16.vlgmr.msra.gmra.mxu0 %vm774_vm1, %v761_v5 }
  0x25   : > { %2904 = vmatprep.mubr.msk.bf16.mxu0 %vm3186_vm0, %v3185_v1  ;;  %2901 = vmatpush3.bf16.msra.mxu0 %v3121_v18 }
  0x26   : > { %2902 = vmatprep.subr.bf16.mxu0 %v3185_v1 }
  0x29   : > { %2903 = vmatpush3.bf16.msra.mxu0 %v3122_v19 }
  0x2a   : > { %2914 = vmatprep.subr.bf16.mxu0 %v3185_v1 }
  0x2c   : > { %2905 = vmatmul.mubr.msk.bf16.vlgmr.msra.gmra.mxu0 %vm774_vm1, %v761_v5 }
  0x2d   : > { %2916 = vmatprep.mubr.msk.bf16.mxu0 %vm3186_vm0, %v3185_v1 }
  0xdc   : > { %v812_v7 = vpop.f32.mrf.mxu0 }
  0xdd   : > { %v3356_v8 = vpack.c.bf16 %v812_v7, %v812_v7 }
  0xde   : > { %v2890_v9 = vpop.f32.mrf.mxu0 }
  0xdf   : > { %1036 = vrot.lane.b32.xlu0 %v3356_v8, %s3187_s25  ;;  %v930_v10 = vsel %vm925_vm2, %v3356_v8, 0 }
  0xe0   : > { %v815_v11 = vpop.f32.mrf.mxu0  ;;  %2909 = vmatpush3.bf16.xpose.msra.mxu1 %v930_v10 }
  0xe1   : > { %2920 = vmatprep.subr.bf16.mxu1 %v3185_v1 }
  0xe2   : > { %v2891_v12 = vpop.f32.mrf.mxu0 }
  0xe4   : > { %v864_v13 = vpop.f32.mrf.mxu0 }
  0xe5   : > { %v3363_v14 = vpack.c.bf16 %v864_v13, %v864_v13 }
  0xe6   : > { %v2898_v15 = vpop.f32.mrf.mxu0 }
  0xe7   : > { %1033 = vrot.lane.b32.xlu0 %v3363_v14, %s3187_s25  ;;  %2911 = vmatmul.mubr.msk.bf16.vlgmr.msra.gmra.mxu1 %vm925_vm2, %v3363_v14 }
  0xe8   : > { %v867_v16 = vpop.f32.mrf.mxu0  ;;  %2922 = vmatprep.mubr.msk.bf16.mxu1 %vm3186_vm0, %v3185_v1 }
  0xea   : > { %v2899_v17 = vpop.f32.mrf.mxu0 }
  0xec   : > { %v916_v36 = vpop.f32.mrf.mxu0 }
  0xed   : > { %v3390_v42 = vpack.c.bf16 %v916_v36, %v916_v36 }
  0xee   : > { %v2906_v37 = vpop.f32.mrf.mxu0 }
  0xef   : > { %v989_v43 = vsel %vm987_vm3, %v3390_v42, 0 }
  0xf0   : > { %v919_v38 = vpop.f32.mrf.mxu0  ;;  %2915 = vmatpush3.bf16.msra.mxu0 %v989_v43 }
  0xf1   : > { %2926 = vmatprep.subr.bf16.mxu0 %v3185_v1 }
  0xf2   : > { %v2907_v39 = vpop.f32.mrf.mxu0 }
 0x151   : > { %v1037_v20 = vpop.permute.xlu0 %1036 }
 0x152   : > { %v1042_v21 = vsel %vm925_vm2, %v1037_v20, 0 }
 0x153   : > { %2921 = vmatpush3.bf16.xpose.msra.mxu1 %v1042_v21 }
 0x154   : > { %2932 = vmatprep.subr.bf16.mxu1 %v3185_v1 }
 0x159   : > { %v1034_v22 = vpop.permute.xlu0 %1033 }
 0x15a   : > { %2923 = vmatmul.mubr.msk.bf16.vlgmr.msra.gmra.mxu1 %vm925_vm2, %v1034_v22 }
 0x15b   : > { %2934 = vmatprep.mubr.msk.bf16.mxu1 %vm3186_vm0, %v3185_v1  ;;  %2933 = vmatpush3.bf16.msra.mxu1 %v1150_v54 }
 0x15c   : > { %2944 = vmatprep.subr.bf16.mxu1 %v3185_v1 }
 0x1a7   : > { %v966_v23 = vpop.f32.mrf.mxu1 }
 0x1a8   : > { %v972_v24 = vsel %vm925_vm2, %v966_v23, -inf }
 0x1a9   : > { %973 = vmax.xlane.f32.xlu1 %v972_v24  ;;  %v2912_v25 = vpop.f32.mrf.mxu1 }
 0x1ab   : > { %v969_v26 = vpop.f32.mrf.mxu1 }
 0x1ad   : > { %v2913_v27 = vpop.f32.mrf.mxu1 }
 0x21a   : > { %v1078_v28 = vpop.f32.mrf.mxu1 }
 0x21b   : > { %v1084_v29 = vsel %vm925_vm2, %v1078_v28, -inf }
 0x21c   : > { %1085 = vmax.xlane.f32.xlu1 %v1084_v29  ;;  %v2924_v30 = vpop.f32.mrf.mxu1 }
 0x21e   : > { %v1081_v31 = vpop.f32.mrf.mxu1 }
 0x220   : > { %v2925_v32 = vpop.f32.mrf.mxu1 }
 0x232   : > { %v974_v33 = vpop.xlane.xlu1 %973 }
 0x233   : > { %v975_v34 = vsub.f32 %v966_v23, %v974_v33 }
 0x235   : > { %v976_v35 = vmul.f32 1.442695, %v975_v34 }
 0x237   : > { %3139 = vpow2.f32 %v976_v35 }
 0x244   : > { %v3140_v40 = vpop.eup %3139 }
 0x245   : > { %v978_v41 = vsel %vm925_vm2, %v3140_v40, 0.0 }
 0x246   : > { %979 = vadd.xlane.f32.xlu0 %v978_v41 }
 0x25c   : > { %1300 = vrot.lane.b32.xlu0 %v3390_v42, %s3750_s29 }
 0x2a5   : > { %v1086_v44 = vpop.xlane.xlu1 %1085 }
 0x2a6   : > { %v1087_v45 = vsub.f32 %v1078_v28, %v1086_v44 }
 0x2a8   : > { %v1088_v46 = vmul.f32 1.442695, %v1087_v45 }
 0x2aa   : > { %3141 = vpow2.f32 %v1088_v46 }
 0x2b7   : > { %v3142_v47 = vpop.eup %3141 }
 0x2b8   : > { %v1090_v48 = vsel %vm925_vm2, %v3142_v47, 0.0 }
 0x2b9   : > { %1091 = vadd.xlane.f32.xlu1 %v1090_v48 }
 0x2ca   : > { %1097 = vrot.lane.b32.xlu1 %v3390_v42, %s3187_s25 }
 0x2ce   : > { %1240 = vrot.lane.b32.xlu1 %v3356_v8, %s3750_s29 }
 0x2cf   : > { %v980_v49 = vpop.xlane.xlu0 %979 }
 0x2d0   : > { %3143 = vrcp.f32 %v980_v49 }
 0x2d2   : > { %1238 = vrot.lane.b32.xlu1 %v3363_v14, %s3750_s29  ;;  %s3767_s29 = sld [smem:[#allocation9_spill]] }
 0x2d3   : > { %v1301_v63 = vpop.permute.xlu0 %1300 }
 0x2d4   : > { %v1306_v5 = vsel %vm987_vm3, %v1301_v63, 0 }
 0x2dd   : > { %v3144_v50 = vpop.eup %3143 }
 0x2de   : > { %v982_v51 = vmul.f32 %v3144_v50, %v3140_v40 }
 0x2e0   : > { %v983_v52 = vpack.c.bf16 %v982_v51, %v982_v51 }
 0x2e2   : > { %2917 = vmatmul.mubr.msk.bf16.vlgmr.msra.gmra.mxu0 %vm925_vm2, %v983_v52 }
 0x2e3   : > { %2928 = vmatprep.mubr.msk.bf16.mxu0 %vm3186_vm0, %v3185_v1 }
 0x342   : > { %v1092_v55 = vpop.xlane.xlu1 %1091 }
 0x343   : > { %3145 = vrcp.f32 %v1092_v55 }
 0x346   : > { %v1098_v56 = vpop.permute.xlu1 %1097 }
 0x347   : > { %v1103_v57 = vsel %vm987_vm3, %v1098_v56, 0 }
 0x348   : > { %2927 = vmatpush3.bf16.msra.mxu0 %v1103_v57 }
 0x349   : > { %2938 = vmatprep.subr.bf16.mxu0 %v3185_v1 }
 0x34a   : > { %v1241_v9 = vpop.permute.xlu1 %1240 }
 0x34b   : > { %v1246_v13 = vsel %vm925_vm2, %v1241_v9, 0 }
 0x34e   : > { %v1239_v17 = vpop.permute.xlu1 %1238 }
 0x350   : > { %v3146_v58 = vpop.eup %3145 }
 0x351   : > { %v1094_v60 = vmul.f32 %v3146_v58, %v3142_v47 }
 0x353   : > { %v1095_v61 = vpack.c.bf16 %v1094_v60, %v1094_v60 }
 0x355   : > { %2929 = vmatmul.mubr.msk.bf16.vlgmr.msra.gmra.mxu0 %vm925_vm2, %v1095_v61 }
 0x356   : > { %2939 = vmatpush3.bf16.msra.mxu0 %v1196_v62  ;;  %2940 = vmatprep.mubr.msk.bf16.mxu0 %vm3186_vm0, %v3185_v1 }
 0x357   : > { %2950 = vmatprep.subr.bf16.mxu0 %v3185_v1 }
 0x3a2   : > { %v1025_v0 = vpop.f32.mrf.mxu0 }
 0x3a3   : > { %v1031_v2 = vpack.c.bf16 %v1025_v0, %v1025_v0 }
 0x3a4   : > { %v2918_v3 = vpop.f32.mrf.mxu0 }
 0x3a5   : > { %2941 = vmatmul.mubr.msk.bf16.vlgmr.msra.gmra.mxu0 %vm925_vm2, %v1031_v2  ;;  %v759_v2 = vld [vmem:[%s3764_s24 + $0xc] sm:$0xf] }
 0x3a6   : > { %2951 = vmatpush3.bf16.msra.mxu0 %v1306_v5  ;;  %v1028_v6 = vpop.f32.mrf.mxu0  ;;  %2952 = vmatprep.mubr.msk.bf16.mxu0 %vm3186_vm0, %v3185_v1  ;;  %v1511_v3 = vsel %vm987_vm3, %v759_v2, 0 }
 0x3a7   : > { %2962 = vmatprep.subr.bf16.mxu0 %v3185_v1 }
 0x3a8   : > { %v2919_v7 = vpop.f32.mrf.mxu0 }
 0x415   : > { %v1139_v10 = vpop.f32.mrf.mxu0 }
 0x416   : > { %v1145_v11 = vpack.c.bf16 %v1139_v10, %v1139_v10  ;;  %v3123_v10 = vld [vmem:[%s3730_s10 + $0x8] sm:$0xff]  }
 0x417   : > { %v2930_v12 = vpop.f32.mrf.mxu0 }
 0x418   : > { %2935 = vmatmul.mubr.msk.bf16.vlgmr.msra.gmra.mxu1 %vm925_vm2, %v1145_v11  ;;  %v3124_v12 = vld [vmem:[%s3730_s10] sm:$0xff]  }
 0x419   : > { %2945 = vmatpush3.bf16.xpose.msra.mxu1 %v1246_v13  ;;  %v1142_v15 = vpop.f32.mrf.mxu0  ;;  %2946 = vmatprep.mubr.msk.bf16.mxu1 %vm3186_vm0, %v3185_v1  ;;  %v741_v13 = vld [vmem:[%s727_s0] sm:$0xff] }
 0x41a   : > { %2956 = vmatprep.subr.bf16.mxu1 %v3185_v1  ;;  %v1609_v15 = vpack.c.bf16 %v741_v13, %v741_v13 }
 0x41b   : > { %v2931_v16 = vpop.f32.mrf.mxu0 }
 0x420   : > { %2947 = vmatmul.mubr.msk.bf16.vlgmr.msra.gmra.mxu1 %vm925_vm2, %v1239_v17  ;;  %v3125_v17 = vld [vmem:[%s3731_s11 + $0x8] sm:$0xff]  }
 0x421   : > { %2958 = vmatprep.mubr.msk.bf16.mxu1 %vm3186_vm0, %v3185_v1 }
 0x465   : > { %v3435_v18 = vpop.f32.mrf.mxu0 }
 0x467   : > { %v2942_v19 = vpop.f32.mrf.mxu0 }
 0x469   : > { %v1235_v20 = vpop.f32.mrf.mxu0 }
 0x46b   : > { %v2943_v21 = vpop.f32.mrf.mxu0 }
 0x46c   : > { %v3126_v21 = vld [vmem:[%s3731_s11] sm:$0xff]  }
 0x4d8   : > { %v1186_v22 = vpop.f32.mrf.mxu1 }
 0x4d9   : > { %v1233_v59 = vadd.f32 %v3435_v18, %v1186_v22  ;;  %v742_v22 = vld [vmem:[%s731_s28] sm:$0xff] }
 0x4da   : > { %v2936_v23 = vpop.f32.mrf.mxu1 }
 0x4dc   : > { %v1189_v24 = vpop.f32.mrf.mxu1 }
 0x4dd   : > { %v1665_v24 = vpack.c.bf16 %v742_v22, %v742_v22 }
 0x4de   : > { %v2937_v25 = vpop.f32.mrf.mxu1 }
 0x4e0   : > { %v1282_v26 = vpop.f32.mrf.mxu1 }
 0x4e1   : > { %v1288_v27 = vsel %vm925_vm2, %v1282_v26, -inf }
 0x4e2   : > { %1289 = vmax.xlane.f32.xlu1 %v1288_v27  ;;  %v2948_v28 = vpop.f32.mrf.mxu1 }
 0x4e4   : > { %v1285_v29 = vpop.f32.mrf.mxu1 }
 0x4e6   : > { %v2949_v30 = vpop.f32.mrf.mxu1 }
 0x56b   : > { %v1290_v31 = vpop.xlane.xlu1 %1289 }
 0x56c   : > { %v1291_v32 = vsub.f32 %v1282_v26, %v1290_v31  ;;  %v2762_v31 = vld [vmem:[%s3767_s29] ss:$0 sm:$0xff] }
 0x56e   : > { %v1292_v33 = vmul.f32 1.442695, %v1291_v32 }
 0x570   : > { %3147 = vpow2.f32 %v1292_v33 }
 0x57d   : > { %v3148_v34 = vpop.eup %3147 }
 0x57e   : > { %v1294_v35 = vsel %vm925_vm2, %v3148_v34, 0.0 }
 0x57f   : > { %1295 = vadd.xlane.f32.xlu0 %v1294_v35 }
 0x595   : > { %1398 = vrot.lane.b32.xlu0 %v3356_v8, %s3748_s26 }
 0x599   : > { %1396 = vrot.lane.b32.xlu0 %v3363_v14, %s3748_s26  ;;  %v758_v14 = vld [vmem:[%s3764_s24 + $0x8] sm:$0xf] }
 0x59a   : > { %v1353_v43 = vsel %vm987_vm3, %v758_v14, 0 }
 0x59b   : > { %2957 = vmatpush3.bf16.msra.mxu1 %v1353_v43 }
 0x59c   : > { %2968 = vmatprep.subr.bf16.mxu1 %v3185_v1 }
 0x608   : > { %v1296_v36 = vpop.xlane.xlu0 %1295 }
 0x609   : > { %3149 = vrcp.f32 %v1296_v36 }
 0x60c   : > { %v1399_v39 = vpop.permute.xlu0 %1398 }
 0x60d   : > { %v1404_v41 = vsel %vm925_vm2, %v1399_v39, 0 }
 0x610   : > { %v1397_v8 = vpop.permute.xlu0 %1396 }
 0x616   : > { %v3150_v37 = vpop.eup %3149 }
 0x617   : > { %v1298_v38 = vmul.f32 %v3150_v37, %v3148_v34 }
 0x619   : > { %v1299_v40 = vpack.c.bf16 %v1298_v38, %v1298_v38 }
 0x61b   : > { %2953 = vmatmul.mubr.msk.bf16.vlgmr.msra.gmra.mxu0 %vm925_vm2, %v1299_v40 }
 0x61c   : > { %2963 = vmatpush3.bf16.xpose.msra.mxu0 %v1404_v41  ;;  %2964 = vmatprep.mubr.msk.bf16.mxu0 %vm3186_vm0, %v3185_v1 }
 0x61d   : > { %2974 = vmatprep.subr.bf16.mxu0 %v3185_v1 }
 0x623   : > { %2965 = vmatmul.mubr.msk.bf16.vlgmr.msra.gmra.mxu0 %vm925_vm2, %v1397_v8 }
 0x624   : > { %2976 = vmatprep.mubr.msk.bf16.mxu0 %vm3186_vm0, %v3185_v1  ;;  %2975 = vmatpush3.bf16.msra.mxu0 %v1511_v3 }
 0x625   : > { %2988 = vmatprep.subr.bf16.mxu0 %v3185_v1 }
 0x6db   : > { %v1342_v44 = vpop.f32.mrf.mxu0 }
 0x6dc   : > { %v1348_v45 = vpack.c.bf16 %v1342_v44, %v1342_v44 }
 0x6dd   : > { %v2954_v46 = vpop.f32.mrf.mxu0 }
 0x6de   : > { %2959 = vmatmul.mubr.msk.bf16.vlgmr.msra.gmra.mxu1 %vm925_vm2, %v1348_v45 }
 0x6df   : > { %v1345_v47 = vpop.f32.mrf.mxu0  ;;  %2970 = vmatprep.mubr.msk.bf16.mxu1 %vm3186_vm0, %v3185_v1 }
 0x6e1   : > { %v2955_v48 = vpop.f32.mrf.mxu0 }
 0x6e3   : > { %v1440_v49 = vpop.f32.mrf.mxu0 }
 0x6e4   : > { %v1446_v50 = vsel %vm925_vm2, %v1440_v49, -inf }
 0x6e5   : > { %1447 = vmax.xlane.f32.xlu0 %v1446_v50  ;;  %v2966_v51 = vpop.f32.mrf.mxu0 }
 0x6e6   : > { %v3127_v51 = vld [vmem:[%s3732_s12 + $0x8] sm:$0xff]  }
 0x6e7   : > { %v1443_v52 = vpop.f32.mrf.mxu0 }
 0x6e8   : > { %v3128_v52 = vld [vmem:[%s3732_s12] sm:$0xff]  }
 0x6e9   : > { %v2967_v53 = vpop.f32.mrf.mxu0 }
 0x76e   : > { %v1448_v54 = vpop.xlane.xlu0 %1447 }
 0x76f   : > { %v1449_v55 = vsub.f32 %v1440_v49, %v1448_v54 }
 0x771   : > { %v1450_v56 = vmul.f32 1.442695, %v1449_v55 }
 0x773   : > { %3151 = vpow2.f32 %v1450_v56 }
 0x780   : > { %v3152_v57 = vpop.eup %3151 }
 0x781   : > { %v1452_v58 = vsel %vm925_vm2, %v3152_v57, 0.0 }
 0x782   : > { %1453 = vadd.xlane.f32.xlu1 %v1452_v58 }
 0x793   : > { %1458 = vrot.lane.b32.xlu1 %v3390_v42, %s3748_s26  ;;  %s3768_s26 = smov 112  }
 0x79e   : > { %v1389_v60 = vpop.f32.mrf.mxu1 }
 0x79f   : > { %v1395_v61 = vadd.f32 %v1389_v60, %v1233_v59 }
 0x7a0   : > { %v2960_v62 = vpop.f32.mrf.mxu1 }
 0x7a1   : > { %v2763_v62 = vld [vmem:[%s3728_s8] ss:$0 sm:$0xff] }
 0x7a2   : > { %v1392_v63 = vpop.f32.mrf.mxu1 }
 0x7a4   : > { %v2961_v0 = vpop.f32.mrf.mxu1 }
 0x7a5   : > { %v2764_v0 = vld [vmem:[%s3729_s9] ss:$0 sm:$0xff] }
 0x80b   : > { %v1454_v5 = vpop.xlane.xlu1 %1453 }
 0x80c   : > { %3153 = vrcp.f32 %v1454_v5 }
 0x80f   : > { %v1459_v42 = vpop.permute.xlu1 %1458 }
 0x810   : > { %v1464_v6 = vsel %vm987_vm3, %v1459_v42, 0 }
 0x811   : > { %2969 = vmatpush3.bf16.msra.mxu1 %v1464_v6 }
 0x812   : > { %2980 = vmatprep.subr.bf16.mxu1 %v3185_v1 }
 0x819   : > { %v3154_v7 = vpop.eup %3153 }
 0x81a   : > { %v1456_v9 = vmul.f32 %v3154_v7, %v3152_v57 }
 0x81c   : > { %v1457_v11 = vpack.c.bf16 %v1456_v9, %v1456_v9 }
 0x81e   : > { %2971 = vmatmul.mubr.msk.bf16.vlgmr.msra.gmra.mxu1 %vm925_vm2, %v1457_v11 }
 0x81f   : > { %2981 = vmatpush3.bf16.msra.mxu1 %v3123_v10  ;;  %2984 = vmatprep.mubr.msk.bf16.mxu1 %vm3186_vm0, %v3185_v1 }
 0x820   : > { %2982 = vmatprep.subr.bf16.mxu1 %v3185_v1 }
 0x823   : > { %2983 = vmatpush3.bf16.msra.mxu1 %v3124_v12 }
 0x824   : > { %2996 = vmatprep.subr.bf16.mxu1 %v3185_v1 }
 0x826   : > { %2985 = vmatmul.mubr.msk.bf16.vlgmr.msra.gmra.mxu1 %vm774_vm1, %v1609_v15 }
 0x827   : > { %3000 = vmatprep.mubr.msk.bf16.mxu1 %vm3186_vm0, %v3185_v1  ;;  %2997 = vmatpush3.bf16.msra.mxu1 %v3127_v51 }
 0x828   : > { %2998 = vmatprep.subr.bf16.mxu1 %v3185_v1 }
 0x82b   : > { %2999 = vmatpush3.bf16.msra.mxu1 %v3128_v52 }
 0x82c   : > { %3010 = vmatprep.subr.bf16.mxu1 %v3185_v1 }
 0x8de   : > { %v1500_v16 = vpop.f32.mrf.mxu1 }
 0x8df   : > { %v1506_v18 = vpack.c.bf16 %v1500_v16, %v1500_v16 }
 0x8e0   : > { %v2972_v19 = vpop.f32.mrf.mxu1 }
 0x8e1   : > { %2977 = vmatmul.mubr.msk.bf16.vlgmr.msra.gmra.mxu0 %vm925_vm2, %v1506_v18 }
 0x8e2   : > { %v1503_v20 = vpop.f32.mrf.mxu1  ;;  %2989 = vmatpush3.bf16.msra.mxu0 %v3125_v17  ;;  %2992 = vmatprep.mubr.msk.bf16.mxu0 %vm3186_vm0, %v3185_v1 }
 0x8e3   : > { %2990 = vmatprep.subr.bf16.mxu0 %v3185_v1 }
 0x8e4   : > { %v2973_v23 = vpop.f32.mrf.mxu1 }
 0x8e6   : > { %2991 = vmatpush3.bf16.msra.mxu0 %v3126_v21  ;;  %v1659_v25 = vpop.f32.mrf.mxu1 }
 0x8e7   : > { %v3503_v26 = vpack.c.bf16 %v1659_v25, %v1659_v25  ;;  %3004 = vmatprep.subr.bf16.mxu0 %v3185_v1 }
 0x8e8   : > { %v2986_v27 = vpop.f32.mrf.mxu1 }
 0x8e9   : > { %2993 = vmatmul.mubr.msk.bf16.vlgmr.msra.gmra.mxu0 %vm774_vm1, %v1665_v24  ;;  %1889 = vrot.lane.b32.xlu1 %v3503_v26, %s3187_s25  ;;  %v1784_v28 = vsel %vm925_vm2, %v3503_v26, 0 }
 0x8ea   : > { %v1662_v29 = vpop.f32.mrf.mxu1  ;;  %3005 = vmatpush3.bf16.xpose.msra.mxu0 %v1784_v28  ;;  %3006 = vmatprep.mubr.msk.bf16.mxu0 %vm3186_vm0, %v3185_v1 }
 0x8eb   : > { %3016 = vmatprep.subr.bf16.mxu0 %v3185_v1 }
 0x8ec   : > { %v2987_v30 = vpop.f32.mrf.mxu1 }
 0x95b   : > { %v1890_v39 = vpop.permute.xlu1 %1889 }
 0x95c   : > { %v1895_v14 = vsel %vm925_vm2, %v1890_v39, 0  ;;  %v1604_v39 = vld [vmem:[%s3733_s13] sm:$0xf] }
 0x9a1   : > { %v1547_v32 = vpop.f32.mrf.mxu0 }
 0x9a2   : > { %v1553_v33 = vadd.f32 %v1547_v32, %v1395_v61 }
 0x9a3   : > { %v2978_v34 = vpop.f32.mrf.mxu0 }
 0x9a4   : > { %v1560_v35 = vadd.f32 %v2762_v31, %v1553_v33  ;;  %v1605_v33 = vld [vmem:[%s3733_s13 + $0x4] sm:$0xf] }
 0x9a5   : > { %v1550_v36 = vpop.f32.mrf.mxu0  ;;  %v2003_v34 = vsel %vm987_vm3, %v1605_v33, 0 }
 0x9a6   : > { %v1563_v37 = vadd.f32 %v1560_v35, %v3341_v4 }
 0x9a7   : > { %v2979_v38 = vpop.f32.mrf.mxu0 }
 0x9a8   : > { %v1564_v40 = vsel %vm774_vm1, %v1563_v37, 0.0 }
 0x9a9   : > { %v1715_v41 = vpop.f32.mrf.mxu0  ;;  %1565 = vadd.xlane.f32.xlu1 %v1564_v40 }
 0x9aa   : > { %v3519_v8 = vpack.c.bf16 %v1715_v41, %v1715_v41 }
 0x9ab   : > { %v2994_v43 = vpop.f32.mrf.mxu0 }
 0x9ac   : > { %1886 = vrot.lane.b32.xlu0 %v3519_v8, %s3187_s25  ;;  %3007 = vmatmul.mubr.msk.bf16.vlgmr.msra.gmra.mxu0 %vm925_vm2, %v3519_v8 }
 0x9ad   : > { %v1718_v44 = vpop.f32.mrf.mxu0  ;;  %3017 = vmatpush3.bf16.xpose.msra.mxu0 %v1895_v14  ;;  %3018 = vmatprep.mubr.msk.bf16.mxu0 %vm3186_vm0, %v3185_v1  ;;  %v2049_v14 = vsel %vm987_vm3, %v1604_v39, 0 }
 0x9ae   : > { %3028 = vmatprep.subr.bf16.mxu0 %v3185_v1 }
 0x9af   : > { %v2995_v4 = vpop.f32.mrf.mxu0 }
 0xa1e   : > { %v1887_v45 = vpop.permute.xlu0 %1886 }
 0xa1f   : > { %3019 = vmatmul.mubr.msk.bf16.vlgmr.msra.gmra.mxu0 %vm925_vm2, %v1887_v45 }
 0xa20   : > { %3030 = vmatprep.mubr.msk.bf16.mxu0 %vm3186_vm0, %v3185_v1  ;;  %3029 = vmatpush3.bf16.msra.mxu0 %v2003_v34 }
 0xa21   : > { %3040 = vmatprep.subr.bf16.mxu0 %v3185_v1 }
 0xa32   : > { %v1566_v46 = vpop.xlane.xlu1 %1565 }
 0xa33   : > { %v1568_v47 = vmul.f32 0.03125, %v1566_v46 }
 0xa35   : > { %v1569_v48 = vsub.f32 %v1563_v37, %v1568_v47 }
 0xa37   : > { %v1570_v49 = vmul.f32 %v1569_v48, %v1569_v48 }
 0xa39   : > { %v1571_v50 = vsel %vm774_vm1, %v1570_v49, 0.0 }
 0xa3a   : > { %1572 = vadd.xlane.f32.xlu0 %v1571_v50 }
 0xa50   : > { %2093 = vrot.lane.b32.xlu0 %v3503_v26, %s3768_s26 }
 0xa6c   : > { %v1820_v53 = vpop.f32.mrf.mxu0 }
 0xa6d   : > { %v1826_v54 = vsel %vm925_vm2, %v1820_v53, -inf }
 0xa6e   : > { %1827 = vmax.xlane.f32.xlu1 %v1826_v54  ;;  %v3008_v55 = vpop.f32.mrf.mxu0 }
 0xa70   : > { %v1823_v56 = vpop.f32.mrf.mxu0 }
 0xa72   : > { %v3009_v57 = vpop.f32.mrf.mxu0 }
 0xac3   : > { %v1573_v58 = vpop.xlane.xlu0 %1572 }
 0xac4   : > { %v1574_v59 = vmul.f32 0.03125, %v1573_v58 }
 0xac6   : > { %v1575_v60 = vadd.f32 1e-05, %v1574_v59 }
 0xac7   : > { %v2094_v47 = vpop.permute.xlu0 %2093 }
 0xac8   : > { %3155 = vrsqrt.f32 %v1575_v60  ;;  %v2099_v51 = vsel %vm925_vm2, %v2094_v47, 0 }
 0xad5   : > { %v3156_v61 = vpop.eup %3155 }
 0xad6   : > { %v1577_v63 = vmul.f32 %v3156_v61, %v1569_v48 }
 0xad8   : > { %v1584_v2 = vmul.f32 %v2763_v62, %v1577_v63 }
 0xada   : > { %v3550_v3 = vadd.f32 %v2764_v0, %v1584_v2 }
 0xadc   : > { %v1721_v5 = vpack.c.bf16 %v3550_v3, %v3550_v3 }
 0xade   : > { %3001 = vmatmul.mubr.msk.bf16.vlgmr.msra.gmra.mxu1 %vm774_vm1, %v1721_v5 }
 0xadf   : > { %v1931_v42 = vpop.f32.mrf.mxu0  ;;  %3012 = vmatprep.mubr.msk.bf16.mxu1 %vm3186_vm0, %v3185_v1 }
 0xae0   : > { %v1937_v6 = vsel %vm925_vm2, %v1931_v42, -inf }
 0xae1   : > { %1938 = vmax.xlane.f32.xlu1 %v1937_v6  ;;  %v3020_v7 = vpop.f32.mrf.mxu0 }
 0xae3   : > { %v1934_v9 = vpop.f32.mrf.mxu0 }
 0xae5   : > { %v3021_v10 = vpop.f32.mrf.mxu0 }
 0xaf7   : > { %v1828_v11 = vpop.xlane.xlu1 %1827 }
 0xaf8   : > { %v1829_v12 = vsub.f32 %v1820_v53, %v1828_v11 }
 0xafa   : > { %v1830_v13 = vmul.f32 1.442695, %v1829_v12 }
 0xafc   : > { %3157 = vpow2.f32 %v1830_v13 }
 0xb09   : > { %v3158_v15 = vpop.eup %3157 }
 0xb0a   : > { %v1832_v16 = vsel %vm925_vm2, %v3158_v15, 0.0 }
 0xb0b   : > { %1833 = vadd.xlane.f32.xlu1 %v1832_v16 }
 0xb6a   : > { %v1939_v17 = vpop.xlane.xlu1 %1938 }
 0xb6b   : > { %v1940_v18 = vsub.f32 %v1931_v42, %v1939_v17 }
 0xb6d   : > { %v1941_v19 = vmul.f32 1.442695, %v1940_v18 }
 0xb6f   : > { %3159 = vpow2.f32 %v1941_v19 }
 0xb7c   : > { %v3160_v20 = vpop.eup %3159 }
 0xb7d   : > { %v1943_v21 = vsel %vm925_vm2, %v3160_v20, 0.0 }
 0xb7e   : > { %1944 = vadd.xlane.f32.xlu1 %v1943_v21 }
 0xb94   : > { %v1834_v22 = vpop.xlane.xlu1 %1833 }
 0xb95   : > { %3161 = vrcp.f32 %v1834_v22 }
 0xb9e   : > { %v1771_v23 = vpop.f32.mrf.mxu1 }
 0xb9f   : > { %v3560_v24 = vpack.c.bf16 %v1771_v23, %v1771_v23 }
 0xba0   : > { %v3002_v25 = vpop.f32.mrf.mxu1 }
 0xba1   : > { %1950 = vrot.lane.b32.xlu1 %v3560_v24, %s3187_s25  ;;  %v1842_v27 = vsel %vm987_vm3, %v3560_v24, 0  ;;  %s739_s25 = scalar_lea.vmem %s3743_s23, %s3331_s2 }
 0xba2   : > { %v3162_v28 = vpop.eup %3161  ;;  %v1774_v29 = vpop.f32.mrf.mxu1  ;;  %3011 = vmatpush3.bf16.msra.mxu1 %v1842_v27 }
 0xba3   : > { %v1836_v30 = vmul.f32 %v3162_v28, %v3158_v15  ;;  %3022 = vmatprep.subr.bf16.mxu1 %v3185_v1 }
 0xba4   : > { %v3003_v31 = vpop.f32.mrf.mxu1 }
 0xba5   : > { %2091 = vrot.lane.b32.xlu1 %v3519_v8, %s3768_s26  ;;  %v1837_v32 = vpack.c.bf16 %v1836_v30, %v1836_v30 }
 0xba7   : > { %3013 = vmatmul.mubr.msk.bf16.vlgmr.msra.gmra.mxu1 %vm925_vm2, %v1837_v32 }
 0xba8   : > { %3024 = vmatprep.mubr.msk.bf16.mxu1 %vm3186_vm0, %v3185_v1 }
 0xc07   : > { %v1945_v35 = vpop.xlane.xlu1 %1944 }
 0xc08   : > { %3163 = vrcp.f32 %v1945_v35 }
 0xc13   : > { %v1951_v36 = vpop.permute.xlu1 %1950 }
 0xc14   : > { %v1956_v37 = vsel %vm987_vm3, %v1951_v36, 0 }
 0xc15   : > { %v3164_v38 = vpop.eup %3163  ;;  %3023 = vmatpush3.bf16.msra.mxu1 %v1956_v37 }
 0xc16   : > { %v1947_v40 = vmul.f32 %v3164_v38, %v3160_v20  ;;  %3034 = vmatprep.subr.bf16.mxu1 %v3185_v1 }
 0xc17   : > { %v2092_v54 = vpop.permute.xlu1 %2091 }
 0xc18   : > { %v1948_v41 = vpack.c.bf16 %v1947_v40, %v1947_v40 }
 0xc1a   : > { %3025 = vmatmul.mubr.msk.bf16.vlgmr.msra.gmra.mxu1 %vm925_vm2, %v1948_v41  ;;  %v1607_v41 = vld [vmem:[%s3733_s13 + $0xc] sm:$0xf] }
 0xc1b   : > { %3035 = vmatpush3.bf16.msra.mxu1 %v2049_v14  ;;  %3036 = vmatprep.mubr.msk.bf16.mxu1 %vm3186_vm0, %v3185_v1 }
 0xc1c   : > { %3046 = vmatprep.subr.bf16.mxu1 %v3185_v1 }
 0xc67   : > { %v1878_v43 = vpop.f32.mrf.mxu1 }
 0xc68   : > { %v1884_v44 = vpack.c.bf16 %v1878_v43, %v1878_v43  ;;  %v2364_v43 = vsel %vm987_vm3, %v1607_v41, 0 }
 0xc69   : > { %v3014_v4 = vpop.f32.mrf.mxu1 }
 0xc6a   : > { %3037 = vmatmul.mubr.msk.bf16.vlgmr.msra.gmra.mxu1 %vm925_vm2, %v1884_v44 }
 0xc6b   : > { %v1881_v45 = vpop.f32.mrf.mxu1  ;;  %3048 = vmatprep.mubr.msk.bf16.mxu1 %vm3186_vm0, %v3185_v1 }
 0xc6d   : > { %v3015_v46 = vpop.f32.mrf.mxu1 }
 0xcda   : > { %v1992_v48 = vpop.f32.mrf.mxu1 }
 0xcdb   : > { %v1998_v49 = vpack.c.bf16 %v1992_v48, %v1992_v48 }
 0xcdc   : > { %v3026_v50 = vpop.f32.mrf.mxu1 }
 0xcdd   : > { %3031 = vmatmul.mubr.msk.bf16.vlgmr.msra.gmra.mxu0 %vm925_vm2, %v1998_v49 }
 0xcde   : > { %3041 = vmatpush3.bf16.xpose.msra.mxu0 %v2099_v51  ;;  %v1995_v52 = vpop.f32.mrf.mxu1  ;;  %3042 = vmatprep.mubr.msk.bf16.mxu0 %vm3186_vm0, %v3185_v1 }
 0xcdf   : > { %3052 = vmatprep.subr.bf16.mxu0 %v3185_v1 }
 0xce0   : > { %v3027_v53 = vpop.f32.mrf.mxu1 }
 0xce5   : > { %3043 = vmatmul.mubr.msk.bf16.vlgmr.msra.gmra.mxu0 %vm925_vm2, %v2092_v54 }
 0xce6   : > { %3054 = vmatprep.mubr.msk.bf16.mxu0 %vm3186_vm0, %v3185_v1 }
 0xd2a   : > { %v3598_v55 = vpop.f32.mrf.mxu1 }
 0xd2c   : > { %v3038_v56 = vpop.f32.mrf.mxu1 }
 0xd2d   : > { %v2786_v56 = vld [vmem:[%s3734_s14] ss:$0 sm:$0xff] }
 0xd2e   : > { %v2088_v57 = vpop.f32.mrf.mxu1 }
 0xd30   : > { %v3039_v58 = vpop.f32.mrf.mxu1 }
 0xd9d   : > { %v3600_v59 = vpop.f32.mrf.mxu0 }
 0xd9e   : > { %v2086_v39 = vadd.f32 %v3598_v55, %v3600_v59 }
 0xd9f   : > { %v3032_v60 = vpop.f32.mrf.mxu0 }
 0xda1   : > { %v2042_v61 = vpop.f32.mrf.mxu0 }
 0xda3   : > { %v3033_v62 = vpop.f32.mrf.mxu0 }
 0xda5   : > { %v2135_v63 = vpop.f32.mrf.mxu0 }
 0xda6   : > { %v2141_v0 = vsel %vm925_vm2, %v2135_v63, -inf }
 0xda7   : > { %2142 = vmax.xlane.f32.xlu1 %v2141_v0  ;;  %v3044_v2 = vpop.f32.mrf.mxu0 }
 0xda9   : > { %v2138_v5 = vpop.f32.mrf.mxu0 }
 0xdab   : > { %v3045_v42 = vpop.f32.mrf.mxu0 }
 0xdb8   : > { %2153 = vrot.lane.b32.xlu1 %v3560_v24, %s3768_s26 }
 0xdbc   : > { %2249 = vrot.lane.b32.xlu1 %v3519_v8, %s3769_s30 }
 0xe30   : > { %v2143_v6 = vpop.xlane.xlu1 %2142 }
 0xe31   : > { %v2144_v7 = vsub.f32 %v2135_v63, %v2143_v6 }
 0xe33   : > { %v2145_v9 = vmul.f32 1.442695, %v2144_v7 }
 0xe34   : > { %v2154_v10 = vpop.permute.xlu1 %2153 }
 0xe35   : > { %3165 = vpow2.f32 %v2145_v9  ;;  %v2159_v11 = vsel %vm987_vm3, %v2154_v10, 0  ;;  %v3129_v9 = vld [vmem:[%s3737_s17 + $0x8] sm:$0xff]   ;;  %v3131_v10 = vld [vmem:[%s3739_s19 + $0x38] sm:$0xff]  }
 0xe36   : > { %3047 = vmatpush3.bf16.msra.mxu1 %v2159_v11  ;;  %v3132_v11 = vld [vmem:[%s3739_s19 + $0x30] sm:$0xff]  }
 0xe37   : > { %3058 = vmatprep.subr.bf16.mxu1 %v3185_v1 }
 0xe38   : > { %v2250_v20 = vpop.permute.xlu1 %2249 }
 0xe42   : > { %v3166_v12 = vpop.eup %3165 }
 0xe43   : > { %v2147_v13 = vsel %vm925_vm2, %v3166_v12, 0.0 }
 0xe44   : > { %2148 = vadd.xlane.f32.xlu0 %v2147_v13  ;;  %v3134_v13 = vld [vmem:[%s3739_s19 + $0x20] sm:$0xff]  }
 0xe5a   : > { %2251 = vrot.lane.b32.xlu0 %v3503_v26, %s3769_s30  ;;  %v1606_v26 = vld [vmem:[%s3733_s13 + $0x8] sm:$0xf] }
 0xe5b   : > { %v2206_v21 = vsel %vm987_vm3, %v1606_v26, 0 }
 0xe5c   : > { %3053 = vmatpush3.bf16.msra.mxu0 %v2206_v21  ;;  %v2788_v21 = vld [vmem:[%s3736_s16] ss:$0 sm:$0xff] }
 0xe5d   : > { %3064 = vmatprep.subr.bf16.mxu0 %v3185_v1 }
 0xecd   : > { %v2149_v15 = vpop.xlane.xlu0 %2148 }
 0xece   : > { %3167 = vrcp.f32 %v2149_v15  ;;  %v3135_v15 = vld [vmem:[%s3739_s19 + $0x18] sm:$0xff]  }
 0xed1   : > { %v2252_v17 = vpop.permute.xlu0 %2251 }
 0xed2   : > { %v2257_v19 = vsel %vm925_vm2, %v2252_v17, 0 }
 0xedb   : > { %v3168_v8 = vpop.eup %3167 }
 0xedc   : > { %v2151_v16 = vmul.f32 %v3168_v8, %v3166_v12  ;;  %v3133_v12 = vld [vmem:[%s3739_s19 + $0x28] sm:$0xff]   ;;  %v3136_v8 = vld [vmem:[%s3739_s19 + $0x10] sm:$0xff]  }
 0xede   : > { %v2152_v18 = vpack.c.bf16 %v2151_v16, %v2151_v16 }
 0xee0   : > { %3049 = vmatmul.mubr.msk.bf16.vlgmr.msra.gmra.mxu1 %vm925_vm2, %v2152_v18 }
 0xee1   : > { %3059 = vmatpush3.bf16.xpose.msra.mxu1 %v2257_v19  ;;  %3060 = vmatprep.mubr.msk.bf16.mxu1 %vm3186_vm0, %v3185_v1 }
 0xee2   : > { %3070 = vmatprep.subr.bf16.mxu1 %v3185_v1 }
 0xee8   : > { %3061 = vmatmul.mubr.msk.bf16.vlgmr.msra.gmra.mxu1 %vm925_vm2, %v2250_v20  ;;  %v2787_v20 = vld [vmem:[%s3735_s15] ss:$0 sm:$0xff] }
 0xee9   : > { %3072 = vmatprep.mubr.msk.bf16.mxu1 %vm3186_vm0, %v3185_v1  ;;  %3071 = vmatpush3.bf16.msra.mxu1 %v2364_v43 }
 0xeea   : > { %3084 = vmatprep.subr.bf16.mxu1 %v3185_v1 }
 0xfa0   : > { %v2195_v22 = vpop.f32.mrf.mxu1 }
 0xfa1   : > { %v2201_v23 = vpack.c.bf16 %v2195_v22, %v2195_v22 }
 0xfa2   : > { %v3050_v25 = vpop.f32.mrf.mxu1 }
 0xfa3   : > { %3055 = vmatmul.mubr.msk.bf16.vlgmr.msra.gmra.mxu0 %vm925_vm2, %v2201_v23 }
 0xfa4   : > { %v2198_v27 = vpop.f32.mrf.mxu1  ;;  %3066 = vmatprep.mubr.msk.bf16.mxu0 %vm3186_vm0, %v3185_v1 }
 0xfa5   : > { %v3137_v27 = vld [vmem:[%s3739_s19 + $0x8] sm:$0xff]  }
 0xfa6   : > { %v3051_v28 = vpop.f32.mrf.mxu1 }
 0xfa7   : > { %v3138_v28 = vld [vmem:[%s3739_s19] sm:$0xff]  }
 0xfa8   : > { %v2293_v29 = vpop.f32.mrf.mxu1 }
 0xfa9   : > { %v2299_v30 = vsel %vm925_vm2, %v2293_v29, -inf }
 0xfaa   : > { %2300 = vmax.xlane.f32.xlu1 %v2299_v30  ;;  %v3062_v31 = vpop.f32.mrf.mxu1 }
 0xfac   : > { %v2296_v32 = vpop.f32.mrf.mxu1 }
 0xfae   : > { %v3063_v33 = vpop.f32.mrf.mxu1 }
0x1033   : > { %v2301_v34 = vpop.xlane.xlu1 %2300 }
0x1034   : > { %v2302_v35 = vsub.f32 %v2293_v29, %v2301_v34  ;;  %v2789_v29 = vld [vmem:[%s3738_s18] ss:$0 sm:$0xff] }
0x1036   : > { %v2303_v36 = vmul.f32 1.442695, %v2302_v35 }
0x1038   : > { %3169 = vpow2.f32 %v2303_v36 }
0x1045   : > { %v3170_v37 = vpop.eup %3169 }
0x1046   : > { %v2305_v38 = vsel %vm925_vm2, %v3170_v37, 0.0 }
0x1047   : > { %2306 = vadd.xlane.f32.xlu0 %v2305_v38 }
0x105d   : > { %2311 = vrot.lane.b32.xlu0 %v3560_v24, %s3769_s30 }
0x1063   : > { %v2242_v40 = vpop.f32.mrf.mxu0 }
0x1064   : > { %v2248_v14 = vadd.f32 %v2242_v40, %v2086_v39 }
0x1065   : > { %v3056_v44 = vpop.f32.mrf.mxu0 }
0x1067   : > { %v2245_v4 = vpop.f32.mrf.mxu0 }
0x1069   : > { %v3057_v45 = vpop.f32.mrf.mxu0 }
0x10d0   : > { %v2307_v46 = vpop.xlane.xlu0 %2306 }
0x10d1   : > { %3171 = vrcp.f32 %v2307_v46 }
0x10d4   : > { %v2312_v24 = vpop.permute.xlu0 %2311 }
0x10d5   : > { %v2317_v47 = vsel %vm987_vm3, %v2312_v24, 0 }
0x10d6   : > { %3065 = vmatpush3.bf16.msra.mxu0 %v2317_v47 }
0x10d7   : > { %3076 = vmatprep.subr.bf16.mxu0 %v3185_v1 }
0x10de   : > { %v3172_v48 = vpop.eup %3171 }
0x10df   : > { %v2309_v49 = vmul.f32 %v3172_v48, %v3170_v37 }
0x10e1   : > { %v2310_v50 = vpack.c.bf16 %v2309_v49, %v2309_v49 }
0x10e3   : > { %3067 = vmatmul.mubr.msk.bf16.vlgmr.msra.gmra.mxu0 %vm925_vm2, %v2310_v50 }
0x10e4   : > { %3080 = vmatprep.mubr.msk.bf16.mxu0 %vm3186_vm0, %v3185_v1  ;;  %3077 = vmatpush3.bf16.msra.mxu0 %v3129_v9 }
0x10e5   : > { %3078 = vmatprep.subr.bf16.mxu0 %v3185_v1 }
0x11a3   : > { %v2353_v51 = vpop.f32.mrf.mxu0 }
0x11a4   : > { %v2359_v52 = vpack.c.bf16 %v2353_v51, %v2353_v51  ;;  %v2802_v51 = vld [vmem:[%s3741_s21] ss:$0 sm:$0xff] }
0x11a5   : > { %v3068_v53 = vpop.f32.mrf.mxu0 }
0x11a6   : > { %3073 = vmatmul.mubr.msk.bf16.vlgmr.msra.gmra.mxu1 %vm925_vm2, %v2359_v52  ;;  %v2803_v53 = vld [vmem:[%s3742_s22] ss:$0 sm:$0xff] }
0x11a7   : > { %v2356_v54 = vpop.f32.mrf.mxu0  ;;  %3100 = vmatprep.mubr.msk.bf16.mxu1 %vm3186_vm0, %v3185_v1  ;;  %3085 = vmatpush3.bf16.msra.mxu1 %v3131_v10 }
0x11a8   : > { %3086 = vmatprep.subr.bf16.mxu1 %v3185_v1 }
0x11a9   : > { %v3069_v55 = vpop.f32.mrf.mxu0 }
0x11ab   : > { %3087 = vmatpush3.bf16.msra.mxu1 %v3132_v11 }
0x11ac   : > { %3088 = vmatprep.subr.bf16.mxu1 %v3185_v1 }
0x11af   : > { %3089 = vmatpush3.bf16.msra.mxu1 %v3133_v12 }
0x11b0   : > { %3090 = vmatprep.subr.bf16.mxu1 %v3185_v1 }
0x11b3   : > { %3091 = vmatpush3.bf16.msra.mxu1 %v3134_v13 }
0x11b4   : > { %3092 = vmatprep.subr.bf16.mxu1 %v3185_v1 }
0x11b7   : > { %3093 = vmatpush3.bf16.msra.mxu1 %v3135_v15 }
0x11b8   : > { %3094 = vmatprep.subr.bf16.mxu1 %v3185_v1 }
0x11bb   : > { %3095 = vmatpush3.bf16.msra.mxu1 %v3136_v8 }
0x11bc   : > { %3096 = vmatprep.subr.bf16.mxu1 %v3185_v1 }
0x11bf   : > { %3097 = vmatpush3.bf16.msra.mxu1 %v3137_v27 }
0x11c0   : > { %3098 = vmatprep.subr.bf16.mxu1 %v3185_v1  ;;  %v2793_v1 = vld [vmem:[%s3740_s20] ss:$0 sm:$0xff] }
0x11c3   : > { %3099 = vmatpush3.bf16.msra.mxu1 %v3138_v28 }
0x1266   : > { %v2400_v57 = vpop.f32.mrf.mxu1 }
0x1267   : > { %v2406_v58 = vadd.f32 %v2400_v57, %v2248_v14 }
0x1268   : > { %v3074_v59 = vpop.f32.mrf.mxu1 }
0x1269   : > { %v2413_v60 = vadd.f32 %v2786_v56, %v2406_v58 }
0x126a   : > { %v2403_v61 = vpop.f32.mrf.mxu1 }
0x126b   : > { %v2416_v62 = vadd.f32 %v2413_v60, %v3550_v3  ;;  %v3130_v3 = vld [vmem:[%s3737_s17] sm:$0xff]  }
0x126c   : > { %v3075_v63 = vpop.f32.mrf.mxu1  ;;  %3079 = vmatpush3.bf16.msra.mxu0 %v3130_v3 }
0x126d   : > { %v2417_v0 = vsel %vm774_vm1, %v2416_v62, 0.0 }
0x126e   : > { %2418 = vadd.xlane.f32.xlu1 %v2417_v0 }
0x12f7   : > { %v2419_v2 = vpop.xlane.xlu1 %2418 }
0x12f8   : > { %v2420_v5 = vmul.f32 0.03125, %v2419_v2 }
0x12fa   : > { %v2421_v42 = vsub.f32 %v2416_v62, %v2420_v5 }
0x12fc   : > { %v2422_v6 = vmul.f32 %v2421_v42, %v2421_v42 }
0x12fe   : > { %v2423_v7 = vsel %vm774_vm1, %v2422_v6, 0.0 }
0x12ff   : > { %2424 = vadd.xlane.f32.xlu1 %v2423_v7 }
0x1388   : > { %v2425_v16 = vpop.xlane.xlu1 %2424 }
0x1389   : > { %v2426_v17 = vmul.f32 0.03125, %v2425_v16 }
0x138b   : > { %v2427_v18 = vadd.f32 1e-05, %v2426_v17 }
0x138d   : > { %3173 = vrsqrt.f32 %v2427_v18 }
0x139a   : > { %v3174_v19 = vpop.eup %3173 }
0x139b   : > { %v2429_v26 = vmul.f32 %v3174_v19, %v2421_v42 }
0x139d   : > { %v2436_v22 = vmul.f32 %v2787_v20, %v2429_v26 }
0x139f   : > { %v2443_v23 = vadd.f32 %v2788_v21, %v2436_v22 }
0x13a1   : > { %v2466_v25 = vpack.c.bf16 %v2443_v23, %v2443_v23 }
0x13a3   : > { %3081 = vmatmul.mubr.msk.bf16.vlgmr.msra.gmra.mxu0 %vm774_vm1, %v2466_v25 }
0x1463   : > { %v2522_v30 = vpop.f32.mrf.mxu0 }
0x1464   : > { %v2523_v31 = vadd.f32 %v2789_v29, %v2522_v30 }
0x1465   : > { %v3082_v32 = vpop.f32.mrf.mxu0 }
0x1466   : > { %v2528_v33 = vmax.f32 %v2523_v31, 0.0 }
0x1467   : > { %v2525_v34 = vpop.f32.mrf.mxu0 }
0x1468   : > { %v2529_v35 = vpack.c.bf16 %v2528_v33, %v2528_v33 }
0x1469   : > { %v3083_v36 = vpop.f32.mrf.mxu0 }
0x146a   : > { %3101 = vmatmul.mubr.bf16.vlgmr.msra.gmra.mxu1 %v2529_v35 }
0x152a   : > { %v2618_v37 = vpop.f32.mrf.mxu1 }
0x152b   : > { %v2619_v38 = vadd.f32 %v2793_v1, %v2618_v37 }
0x152c   : > { %v3102_v39 = vpop.f32.mrf.mxu1 }
0x152d   : > { %v2626_v40 = vadd.f32 %v2619_v38, %v2443_v23 }
0x152e   : > { %v2621_v41 = vpop.f32.mrf.mxu1 }
0x152f   : > { %v2627_v14 = vsel %vm774_vm1, %v2626_v40, 0.0 }
0x1530   : > { %2628 = vadd.xlane.f32.xlu1 %v2627_v14  ;;  %v3103_v43 = vpop.f32.mrf.mxu1 }
0x15b9   : > { %v2629_v44 = vpop.xlane.xlu1 %2628 }
0x15ba   : > { %v2630_v4 = vmul.f32 0.03125, %v2629_v44 }
0x15bc   : > { %v2631_v45 = vsub.f32 %v2626_v40, %v2630_v4 }
0x15be   : > { %v2632_v46 = vmul.f32 %v2631_v45, %v2631_v45 }
0x15c0   : > { %v2633_v24 = vsel %vm774_vm1, %v2632_v46, 0.0 }
0x15c1   : > { %2634 = vadd.xlane.f32.xlu1 %v2633_v24 }
0x164a   : > { %v2635_v47 = vpop.xlane.xlu1 %2634 }
0x164b   : > { %v2636_v48 = vmul.f32 0.03125, %v2635_v47 }
0x164d   : > { %v2637_v49 = vadd.f32 1e-05, %v2636_v48 }
0x164f   : > { %3175 = vrsqrt.f32 %v2637_v49 }
0x165c   : > { %v3176_v50 = vpop.eup %3175 }
0x165d   : > { %v2639_v52 = vmul.f32 %v3176_v50, %v2631_v45 }
0x165f   : > { %v2646_v54 = vmul.f32 %v2802_v51, %v2639_v52 }
0x1661   : > { %v2653_v55 = vadd.f32 %v2803_v53, %v2646_v54 }
0x1663   : > { %2654 = vst.msk [vmem:[%s739_s25] sm:$0xff] %vm774_vm1, %v2653_v55 }
0x1664 PF: > { %s33_s4 = sadd.s32 1, %s3183_s4  }
0x1665   : > { %p30_p4 = scmp.ge.s32.totalorder %s33_s4, 4  }
0x1667   :  { %32 = sbr.rel (!%p30_p4) target bundleno = 9 (0x9), region = 148 }

</bundles_post_ra>
